<compile_context>
chip_gen: v5e
topology: v5e:2x2
jax: 0.10.0
libtpu: 0.0.40
codegen_flags: <defaults>
</compile_context>

<pallas_src>
import functools
import math

import jax
import jax.numpy as jnp
from jax.experimental import pallas as pl
from jax.experimental.pallas import tpu as pltpu


# Packed row indices inside the "smalls" tensor (block_num, 9, D):
_LN1_G, _LN1_B, _BQ, _BK, _BV, _BO, _LN2_G, _LN2_B, _B2 = range(9)


# -----------------------------------------------------------------------------
# Kernel: one CrossAttnBlock step for one batch tile.  Grid = (num_bt, nblk);
# the residual stream lives in `res_ref` (VMEM scratch) across the block axis.
# -----------------------------------------------------------------------------
def _cross_attn_layer_kernel(
    q_ref, k_ref,                       # activations
    wq_ref, wk_ref, wv_ref, wo_ref,     # attention weights, (1, D, D), (in,out)
    w1_ref, w2_ref,                     # FFN weights, (1, D, F) / (1, F, D)
    smalls_ref, b1_ref,                 # packed LN params + biases
    out_ref,                            # (batch_tile, Lq, D) output block
    res_ref,                            # (batch_tile*Lq, D) f32 residual stream
    oheads_ref,                         # (batch_tile*Lq, D) f32 head-output buf
    *, num_heads: int, batch_tile: int, lq: int, lk: int,
):
    blk = pl.program_id(1)
    nblk = pl.num_programs(1)

    # Initialize the residual stream with q at the first block of this tile.
    @pl.when(blk == 0)
    def _():
        res_ref[...] = q_ref[...].reshape(batch_tile * lq, -1).astype(jnp.float32)

    x = res_ref[...]                                  # (M, D) f32, M = bt*Lq
    kk = k_ref[...].reshape(batch_tile * lk, -1)      # (Mk, D) bf16
    smalls = smalls_ref[0]                            # (9, D) f32
    b1 = b1_ref[0]                                    # (1, F) f32

    D = x.shape[-1]
    dh = D // num_heads
    inv_d = 1.0 / D

    ln1_g, ln1_b = smalls[_LN1_G:_LN1_G + 1], smalls[_LN1_B:_LN1_B + 1]
    bq, bk_ = smalls[_BQ:_BQ + 1], smalls[_BK:_BK + 1]   # bq already pre-scaled
    bv, bo = smalls[_BV:_BV + 1], smalls[_BO:_BO + 1]
    ln2_g, ln2_b = smalls[_LN2_G:_LN2_G + 1], smalls[_LN2_B:_LN2_B + 1]
    b2 = smalls[_B2:_B2 + 1]

    def layernorm(v, g, b):                 # single-pass stats, f32 VPU path
        s1 = jnp.sum(v, axis=-1, keepdims=True)
        s2 = jnp.sum(v * v, axis=-1, keepdims=True)
        mu = s1 * inv_d
        var = jnp.maximum(s2 * inv_d - mu * mu, 0.0)
        return (v - mu) * jax.lax.rsqrt(var + 1e-5) * g + b

    # --- norm1 + q/k/v projections on the flattened (batch*seq) M dimension ---
    q2 = layernorm(x, ln1_g, ln1_b).astype(jnp.bfloat16)
    qp = jnp.dot(q2, wq_ref[0], preferred_element_type=jnp.float32) + bq   # (M, D)
    kp = jnp.dot(kk, wk_ref[0], preferred_element_type=jnp.float32) + bk_  # (Mk, D)
    vp = jnp.dot(kk, wv_ref[0], preferred_element_type=jnp.float32) + bv   # (Mk, D)

    # Cast once; slice the bf16 arrays inside the head loop.
    qpb = qp.astype(jnp.bfloat16)
    kpb = kp.astype(jnp.bfloat16)
    vpb = vp.astype(jnp.bfloat16)

    # --- multi-head attention: QK^T / softmax / PV are per batch element ---
    for b in range(batch_tile):
        r0, rk0 = b * lq, b * lk
        for h in range(num_heads):
            c0 = h * dh
            qh = qpb[r0:r0 + lq, c0:c0 + dh]            # (Lq, dh) (pre-scaled)
            kh = kpb[rk0:rk0 + lk, c0:c0 + dh]          # (Lk, dh)
            vh = vpb[rk0:rk0 + lk, c0:c0 + dh]          # (Lk, dh)
            s = jax.lax.dot_general(qh, kh, (((1,), (1,)), ((), ())),
                                    preferred_element_type=jnp.float32)  # (Lq, Lk)
            m = jnp.max(s, axis=-1, keepdims=True)
            p = jnp.exp(s - m)
            l = jnp.sum(p, axis=-1, keepdims=True)
            oh = jnp.dot(p.astype(jnp.bfloat16), vh,
                         preferred_element_type=jnp.float32)             # (Lq, dh)
            # Fold 1/l after the PV matmul; exact reciprocal (cheap, accurate).
            oheads_ref[r0:r0 + lq, c0:c0 + dh] = oh * pl.reciprocal(l)

    # --- single fused output projection on all heads/batches + residual 1 ---
    o = oheads_ref[...].astype(jnp.bfloat16)                             # (M, D)
    attn = jnp.dot(o, wo_ref[0], preferred_element_type=jnp.float32) + bo
    x = x + attn

    # --- norm2 + FFN + residual 2 ---
    q3 = layernorm(x, ln2_g, ln2_b).astype(jnp.bfloat16)
    h1 = jnp.dot(q3, w1_ref[0], preferred_element_type=jnp.float32) + b1
    h1 = jnp.maximum(h1, 0.0).astype(jnp.bfloat16)
    ffn = jnp.dot(h1, w2_ref[0], preferred_element_type=jnp.float32) + b2
    x = x + ffn

    res_ref[...] = x

    # Only write the HBM output once, at the last block of this batch tile.
    @pl.when(blk == nblk - 1)
    def _():
        out_ref[...] = x.reshape(batch_tile, lq, -1).astype(out_ref.dtype)


# -----------------------------------------------------------------------------
# Wrapper: whole CrossAttnLayer in a single pallas_call.
# -----------------------------------------------------------------------------
@functools.partial(jax.jit, static_argnames=("num_heads", "batch_tile"))
def cross_attn_layer(q, k, block_params, num_heads, batch_tile=None):
    """CrossAttnLayer.forward: block_num fused CrossAttnBlocks.

    q: (B, Lq, D) f32, k: (B, Lk, D) f32.  block_params: list of dicts with
    PyTorch-layout weights (out_features, in_features) and (1, D)/(1, F)
    biases / LayerNorm params.  batch_tile: batch elements per grid step
    (default: whole batch in one step; B//2 maps nicely to v7x's two cores).
    """
    B, Lq, D = q.shape
    _, Lk, _ = k.shape
    nblk = len(block_params)
    assert D % num_heads == 0, "d_model must be divisible by num_heads"
    F = block_params[0]["w1"].shape[0]
    if batch_tile is None:
        batch_tile = B
    assert B % batch_tile == 0
    num_bt = B // batch_tile

    dh = D // num_heads
    scale = 1.0 / math.sqrt(dh)

    # Pre-transpose weights to (in, out) and cast MXU operands to bf16.
    # 1/sqrt(dh) is folded into wq (and bq below).
    def stack_w(name, s=None):
        ws = [(p[name].T if s is None else p[name].T * s) for p in block_params]
        return jnp.stack(ws).astype(jnp.bfloat16)

    wq_all = stack_w("wq", scale)   # (nblk, D, D), pre-scaled
    wk_all = stack_w("wk")          # (nblk, D, D)
    wv_all = stack_w("wv")          # (nblk, D, D)
    wo_all = stack_w("wo")          # (nblk, D, D)
    w1_all = stack_w("w1")          # (nblk, D, F)
    w2_all = stack_w("w2")          # (nblk, F, D)

    # Pack the small (1, D) parameters into one (nblk, 9, D) tensor (f32).
    # bq is pre-scaled (PyTorch scales q AFTER the projection bias is added).
    smalls_all = jnp.stack([
        jnp.concatenate([p["ln1_g"], p["ln1_b"], p["bq"] * scale, p["bk"],
                         p["bv"], p["bo"], p["ln2_g"], p["ln2_b"], p["b2"]],
                        axis=0)
        for p in block_params
    ]).astype(jnp.float32)          # (nblk, 9, D)
    b1_all = jnp.stack([p["b1"] for p in block_params]).astype(jnp.float32)  # (nblk,1,F)

    k_bf16 = k.astype(jnp.bfloat16)   # k only feeds the MXU

    per_bt = lambda bt, blk: (bt, 0, 0)     # activations: depend only on batch tile
    per_blk = lambda bt, blk: (blk, 0, 0)   # weights: depend only on block index

    in_specs = [
        pl.BlockSpec((batch_tile, Lq, D), per_bt),    # q
        pl.BlockSpec((batch_tile, Lk, D), per_bt),    # k (bf16)
        pl.BlockSpec((1, D, D), per_blk),             # wq (pre-scaled)
        pl.BlockSpec((1, D, D), per_blk),             # wk
        pl.BlockSpec((1, D, D), per_blk),             # wv
        pl.BlockSpec((1, D, D), per_blk),             # wo
        pl.BlockSpec((1, D, F), per_blk),             # w1
        pl.BlockSpec((1, F, D), per_blk),             # w2
        pl.BlockSpec((1, 9, D), per_blk),             # packed LN params / biases
        pl.BlockSpec((1, 1, F), per_blk),             # b1
    ]

    # Explicit VMEM budget: double-buffered bf16 weights + activations +
    # scratch, with margin; floor at the default 32 MiB, stay under v7x's
    # 64 MiB physical VMEM.
    weight_bytes = 2 * (4 * D * D + 2 * D * F) * 2
    act_bytes = 2 * batch_tile * (2 * Lq * D * 4 + Lk * D * 2)
    scratch_bytes = 2 * batch_tile * Lq * D * 4
    vmem_limit = int(min(max(2 * (weight_bytes + act_bytes + scratch_bytes),
                             32 * 1024 * 1024), 56 * 1024 * 1024))
    # TODO(synk): for much larger D / dim_ffn, add an inner K/F tile axis for
    # the weight matrices instead of loading whole matrices per block step.

    kernel = functools.partial(_cross_attn_layer_kernel, num_heads=num_heads,
                               batch_tile=batch_tile, lq=Lq, lk=Lk)

    return pl.pallas_call(
        kernel,
        out_shape=jax.ShapeDtypeStruct((B, Lq, D), q.dtype),
        grid=(num_bt, nblk),
        in_specs=in_specs,
        out_specs=pl.BlockSpec((batch_tile, Lq, D), per_bt),
        scratch_shapes=[
            pltpu.VMEM((batch_tile * Lq, D), jnp.float32),   # residual stream
            pltpu.VMEM((batch_tile * Lq, D), jnp.float32),   # head outputs
        ],
        compiler_params=pltpu.CompilerParams(
            dimension_semantics=("parallel", "arbitrary"),
            vmem_limit_bytes=vmem_limit),
    )(q, k_bf16, wq_all, wk_all, wv_all, wo_all, w1_all, w2_all,
      smalls_all, b1_all)


# -----------------------------------------------------------------------------
# Deterministic synthetic parameter init (shapes follow the PyTorch module).
# -----------------------------------------------------------------------------
def init_block_params(key, d_model, dim_ffn):
    ks = jax.random.split(key, 8)
    s = 0.05
    return {
        "ln1_g": jnp.ones((1, d_model), jnp.float32),
        "ln1_b": jnp.zeros((1, d_model), jnp.float32),
        # in_proj split into q/k/v pieces, each (d_model, d_model), PyTorch layout
        "wq": s * jax.random.normal(ks[0], (d_model, d_model), jnp.float32),
        "bq": s * jax.random.normal(ks[1], (1, d_model), jnp.float32),
        "wk": s * jax.random.normal(ks[2], (d_model, d_model), jnp.float32),
        "bk": s * jax.random.normal(ks[3], (1, d_model), jnp.float32),
        "wv": s * jax.random.normal(ks[4], (d_model, d_model), jnp.float32),
        "bv": jnp.zeros((1, d_model), jnp.float32),
        "wo": s * jax.random.normal(ks[5], (d_model, d_model), jnp.float32),
        "bo": jnp.zeros((1, d_model), jnp.float32),
        "ln2_g": jnp.ones((1, d_model), jnp.float32),
        "ln2_b": jnp.zeros((1, d_model), jnp.float32),
        "w1": s * jax.random.normal(ks[6], (dim_ffn, d_model), jnp.float32),
        "b1": s * jax.random.normal(ks[7], (1, dim_ffn), jnp.float32),
        "w2": s * jax.random.normal(ks[0], (d_model, dim_ffn), jnp.float32),
        "b2": jnp.zeros((1, d_model), jnp.float32),
    }


# -----------------------------------------------------------------------------
# Pure-JAX f32 reference (mirrors PyTorch semantics) for the correctness check.
# -----------------------------------------------------------------------------
def _ref_block(q, k, p, num_heads):
    def ln(x, g, b):
        mu = jnp.mean(x, axis=-1, keepdims=True)
        var = jnp.mean((x - mu) ** 2, axis=-1, keepdims=True)
        return (x - mu) / jnp.sqrt(var + 1e-5) * g + b

    B, Lq, D = q.shape
    Lk = k.shape[1]
    dh = D // num_heads
    q2 = ln(q, p["ln1_g"][0], p["ln1_b"][0])
    qp = q2 @ p["wq"].T + p["bq"][0]
    kp = k @ p["wk"].T + p["bk"][0]
    vp = k @ p["wv"].T + p["bv"][0]
    qh = qp.reshape(B, Lq, num_heads, dh).transpose(0, 2, 1, 3)
    kh = kp.reshape(B, Lk, num_heads, dh).transpose(0, 2, 1, 3)
    vh = vp.reshape(B, Lk, num_heads, dh).transpose(0, 2, 1, 3)
    s = jnp.einsum("bhqd,bhkd->bhqk", qh, kh) / math.sqrt(dh)
    a = jax.nn.softmax(s, axis=-1)
    o = jnp.einsum("bhqk,bhkd->bhqd", a, vh).transpose(0, 2, 1, 3).reshape(B, Lq, D)
    attn = o @ p["wo"].T + p["bo"][0]
    q = q + attn
    q3 = ln(q, p["ln2_g"][0], p["ln2_b"][0])
    ffn = jnp.maximum(q3 @ p["w1"].T + p["b1"][0], 0.0) @ p["w2"].T + p["b2"][0]
    return q + ffn


def _ref_layer(q, k, block_params, num_heads):
    for p in block_params:
        q = _ref_block(q, k, p, num_heads)
    return q


# -----------------------------------------------------------------------------
if __name__ == "__main__":
    # Module defaults: d_model=256, num_heads=4, dim_ffn=256; small seq/batch.
    block_num, d_model, num_head, dim_ffn = 2, 256, 4, 256
    B, Lq, Lk = 2, 8, 16

    key = jax.random.PRNGKey(0)
    kq, kk, kp = jax.random.split(key, 3)
    q = jax.random.normal(kq, (B, Lq, d_model), jnp.float32)
    k = jax.random.normal(kk, (B, Lk, d_model), jnp.float32)

    block_params = [
        init_block_params(sub, d_model, dim_ffn)
        for sub in jax.random.split(kp, block_num)
    ]

    ref = _ref_layer(q, k, block_params, num_head)

    # Default layout: whole batch fused into one grid step (v5e/v6e best).
    out = jax.block_until_ready(
        cross_attn_layer(q, k, block_params, num_heads=num_head))
    assert out.shape == (B, Lq, d_model)
    assert jnp.all(jnp.isfinite(out))
    # Tolerance vs the f32 reference is set by the bf16 MXU operands.
    assert jnp.allclose(out, ref, rtol=5e-2, atol=5e-2), "mismatch vs JAX reference"

    # v7x-style layout: 2-way "parallel" batch split (one tile per TensorCore).
    out2 = jax.block_until_ready(
        cross_attn_layer(q, k, block_params, num_heads=num_head,
                         batch_tile=B // 2))
    assert jnp.allclose(out2, ref, rtol=5e-2, atol=5e-2), "mismatch (batch split)"

    print("KERNEL_OK")
</pallas_src>

<mosaic_0001>
module attributes {stable_mosaic.version = 11 : i64} {
  func.func @_cross_attn_layer_kernel(%arg0: i32, %arg1: i32, %arg2: memref<2x8x256xf32, #tpu.memory_space<vmem>>, %arg3: memref<2x16x256xbf16, #tpu.memory_space<vmem>>, %arg4: memref<1x256x256xbf16, #tpu.memory_space<vmem>>, %arg5: memref<1x256x256xbf16, #tpu.memory_space<vmem>>, %arg6: memref<1x256x256xbf16, #tpu.memory_space<vmem>>, %arg7: memref<1x256x256xbf16, #tpu.memory_space<vmem>>, %arg8: memref<1x256x256xbf16, #tpu.memory_space<vmem>>, %arg9: memref<1x256x256xbf16, #tpu.memory_space<vmem>>, %arg10: memref<1x9x256xf32, #tpu.memory_space<vmem>>, %arg11: memref<1x1x256xf32, #tpu.memory_space<vmem>>, %arg12: memref<2x8x256xf32, #tpu.memory_space<vmem>>, %arg13: memref<16x256xf32, #tpu.memory_space<vmem>>, %arg14: memref<16x256xf32, #tpu.memory_space<vmem>>) attributes {dimension_semantics = [#tpu.dimension_semantics<parallel>, #tpu.dimension_semantics<arbitrary>], iteration_bounds = array<i64: 1, 2>, scalar_prefetch = 0 : i64, scratch_operands = 2 : i64, tpu.core_type = #tpu.core_type<tc>, window_params = [{transform_indices = @transform_0, window_bounds = array<i64: 2, 8, 256>}, {transform_indices = @transform_1, window_bounds = array<i64: 2, 16, 256>}, {transform_indices = @transform_2, window_bounds = array<i64: 1, 256, 256>}, {transform_indices = @transform_3, window_bounds = array<i64: 1, 256, 256>}, {transform_indices = @transform_4, window_bounds = array<i64: 1, 256, 256>}, {transform_indices = @transform_5, window_bounds = array<i64: 1, 256, 256>}, {transform_indices = @transform_6, window_bounds = array<i64: 1, 256, 256>}, {transform_indices = @transform_7, window_bounds = array<i64: 1, 256, 256>}, {transform_indices = @transform_8, window_bounds = array<i64: 1, 9, 256>}, {transform_indices = @transform_9, window_bounds = array<i64: 1, 1, 256>}, {transform_indices = @transform_10, window_bounds = array<i64: 2, 8, 256>}]} {
    %c0_i32 = arith.constant 0 : i32
    %0 = arith.cmpi eq, %arg1, %c0_i32 : i32
    %1 = arith.extui %0 : i1 to i32
    %c0_i32_0 = arith.constant 0 : i32
    %2 = arith.cmpi ne, %1, %c0_i32_0 : i32
    scf.if %2 {
      %c0_96 = arith.constant 0 : index
      %c0_97 = arith.constant 0 : index
      %c0_98 = arith.constant 0 : index
      %249 = vector.load %arg2[%c0_96, %c0_97, %c0_98] : memref<2x8x256xf32, #tpu.memory_space<vmem>>, vector<2x8x256xf32>
      %250 = vector.shape_cast %249 : vector<2x8x256xf32> to vector<16x256xf32>
      %c0_99 = arith.constant 0 : index
      %c0_100 = arith.constant 0 : index
      %251 = vector.load %arg13[%c0_99, %c0_100] : memref<16x256xf32, #tpu.memory_space<vmem>>, vector<16x256xf32>
      tpu.vector_store %arg13[%c0_99, %c0_100], %250 {strides = array<i32>} : memref<16x256xf32, #tpu.memory_space<vmem>>, vector<16x256xf32>,
    } else {
    }
    %c0 = arith.constant 0 : index
    %c0_1 = arith.constant 0 : index
    %3 = vector.load %arg13[%c0, %c0_1] : memref<16x256xf32, #tpu.memory_space<vmem>>, vector<16x256xf32>
    %c0_2 = arith.constant 0 : index
    %c0_3 = arith.constant 0 : index
    %c0_4 = arith.constant 0 : index
    %4 = vector.load %arg3[%c0_2, %c0_3, %c0_4] : memref<2x16x256xbf16, #tpu.memory_space<vmem>>, vector<2x16x256xbf16>
    %5 = vector.shape_cast %4 : vector<2x16x256xbf16> to vector<32x256xbf16>
    %c0_5 = arith.constant 0 : index
    %c0_6 = arith.constant 0 : index
    %c0_7 = arith.constant 0 : index
    %6 = vector.load %arg10[%c0_5, %c0_6, %c0_7] : memref<1x9x256xf32, #tpu.memory_space<vmem>>, vector<1x9x256xf32>
    %7 = vector.shape_cast %6 : vector<1x9x256xf32> to vector<9x256xf32>
    %c0_8 = arith.constant 0 : index
    %c0_9 = arith.constant 0 : index
    %c0_10 = arith.constant 0 : index
    %8 = vector.load %arg11[%c0_8, %c0_9, %c0_10] : memref<1x1x256xf32, #tpu.memory_space<vmem>>, vector<1x1x256xf32>
    %9 = vector.shape_cast %8 : vector<1x1x256xf32> to vector<1x256xf32>
    %10 = vector.extract_strided_slice %7 {offsets = [0, 0], sizes = [1, 256], strides = [1, 1]} : vector<9x256xf32> to vector<1x256xf32>
    %11 = vector.extract_strided_slice %7 {offsets = [1, 0], sizes = [1, 256], strides = [1, 1]} : vector<9x256xf32> to vector<1x256xf32>
    %12 = vector.extract_strided_slice %7 {offsets = [2, 0], sizes = [1, 256], strides = [1, 1]} : vector<9x256xf32> to vector<1x256xf32>
    %13 = vector.extract_strided_slice %7 {offsets = [3, 0], sizes = [1, 256], strides = [1, 1]} : vector<9x256xf32> to vector<1x256xf32>
    %14 = vector.extract_strided_slice %7 {offsets = [4, 0], sizes = [1, 256], strides = [1, 1]} : vector<9x256xf32> to vector<1x256xf32>
    %15 = vector.extract_strided_slice %7 {offsets = [5, 0], sizes = [1, 256], strides = [1, 1]} : vector<9x256xf32> to vector<1x256xf32>
    %16 = vector.extract_strided_slice %7 {offsets = [6, 0], sizes = [1, 256], strides = [1, 1]} : vector<9x256xf32> to vector<1x256xf32>
    %17 = vector.extract_strided_slice %7 {offsets = [7, 0], sizes = [1, 256], strides = [1, 1]} : vector<9x256xf32> to vector<1x256xf32>
    %18 = vector.extract_strided_slice %7 {offsets = [8, 0], sizes = [1, 256], strides = [1, 1]} : vector<9x256xf32> to vector<1x256xf32>
    %cst = arith.constant dense<0.000000e+00> : vector<16xf32>
    %19 = vector.multi_reduction <add>, %3, %cst [1] : vector<16x256xf32> to vector<16xf32>
    %20 = vector.shape_cast %19 : vector<16xf32> to vector<16x1xf32>
    %21 = arith.mulf %3, %3 : vector<16x256xf32>
    %cst_11 = arith.constant dense<0.000000e+00> : vector<16xf32>
    %22 = vector.multi_reduction <add>, %21, %cst_11 [1] : vector<16x256xf32> to vector<16xf32>
    %23 = vector.shape_cast %22 : vector<16xf32> to vector<16x1xf32>
    %cst_12 = arith.constant 3.906250e-03 : f32
    %24 = vector.broadcast %cst_12 : f32 to vector<16x1xf32>
    %25 = arith.mulf %20, %24 : vector<16x1xf32>
    %cst_13 = arith.constant 3.906250e-03 : f32
    %26 = vector.broadcast %cst_13 : f32 to vector<16x1xf32>
    %27 = arith.mulf %23, %26 : vector<16x1xf32>
    %28 = arith.mulf %25, %25 : vector<16x1xf32>
    %29 = arith.subf %27, %28 : vector<16x1xf32>
    %cst_14 = arith.constant 0.000000e+00 : f32
    %30 = vector.broadcast %cst_14 : f32 to vector<16x1xf32>
    %31 = arith.maximumf %29, %30 : vector<16x1xf32>
    %32 = vector.broadcast %25 : vector<16x1xf32> to vector<16x256xf32>
    %33 = arith.subf %3, %32 : vector<16x256xf32>
    %cst_15 = arith.constant 9.99999974E-6 : f32
    %34 = vector.broadcast %cst_15 : f32 to vector<16x1xf32>
    %35 = arith.addf %31, %34 : vector<16x1xf32>
    %36 = math.rsqrt %35 : vector<16x1xf32>
    %37 = vector.broadcast %36 : vector<16x1xf32> to vector<16x256xf32>
    %38 = arith.mulf %33, %37 : vector<16x256xf32>
    %39 = vector.broadcast %10 : vector<1x256xf32> to vector<16x256xf32>
    %40 = arith.mulf %38, %39 : vector<16x256xf32>
    %41 = vector.broadcast %11 : vector<1x256xf32> to vector<16x256xf32>
    %42 = arith.addf %40, %41 : vector<16x256xf32>
    %43 = arith.truncf %42 : vector<16x256xf32> to vector<16x256xbf16>
    %c0_16 = arith.constant 0 : index
    %c0_17 = arith.constant 0 : index
    %c0_18 = arith.constant 0 : index
    %44 = vector.load %arg4[%c0_16, %c0_17, %c0_18] : memref<1x256x256xbf16, #tpu.memory_space<vmem>>, vector<1x256x256xbf16>
    %45 = vector.shape_cast %44 : vector<1x256x256xbf16> to vector<256x256xbf16>
    %cst_19 = arith.constant dense<0.000000e+00> : vector<16x256xf32>
    %46 = tpu.matmul %43, %45, %cst_19 {dimension_numbers = #tpu.dot_dimension_numbers<[1], [0], [0], [1], [0, 0, 1, 1], [], []>} : vector<16x256xbf16>, vector<256x256xbf16>, vector<16x256xf32> -> vector<16x256xf32>
    %47 = vector.broadcast %12 : vector<1x256xf32> to vector<16x256xf32>
    %48 = arith.addf %46, %47 : vector<16x256xf32>
    %c0_20 = arith.constant 0 : index
    %c0_21 = arith.constant 0 : index
    %c0_22 = arith.constant 0 : index
    %49 = vector.load %arg5[%c0_20, %c0_21, %c0_22] : memref<1x256x256xbf16, #tpu.memory_space<vmem>>, vector<1x256x256xbf16>
    %50 = vector.shape_cast %49 : vector<1x256x256xbf16> to vector<256x256xbf16>
    %cst_23 = arith.constant dense<0.000000e+00> : vector<32x256xf32>
    %51 = tpu.matmul %5, %50, %cst_23 {dimension_numbers = #tpu.dot_dimension_numbers<[1], [0], [0], [1], [0, 0, 1, 1], [], []>} : vector<32x256xbf16>, vector<256x256xbf16>, vector<32x256xf32> -> vector<32x256xf32>
    %52 = vector.broadcast %13 : vector<1x256xf32> to vector<32x256xf32>
    %53 = arith.addf %51, %52 : vector<32x256xf32>
    %c0_24 = arith.constant 0 : index
    %c0_25 = arith.constant 0 : index
    %c0_26 = arith.constant 0 : index
    %54 = vector.load %arg6[%c0_24, %c0_25, %c0_26] : memref<1x256x256xbf16, #tpu.memory_space<vmem>>, vector<1x256x256xbf16>
    %55 = vector.shape_cast %54 : vector<1x256x256xbf16> to vector<256x256xbf16>
    %cst_27 = arith.constant dense<0.000000e+00> : vector<32x256xf32>
    %56 = tpu.matmul %5, %55, %cst_27 {dimension_numbers = #tpu.dot_dimension_numbers<[1], [0], [0], [1], [0, 0, 1, 1], [], []>} : vector<32x256xbf16>, vector<256x256xbf16>, vector<32x256xf32> -> vector<32x256xf32>
    %57 = vector.broadcast %14 : vector<1x256xf32> to vector<32x256xf32>
    %58 = arith.addf %56, %57 : vector<32x256xf32>
    %59 = arith.truncf %48 : vector<16x256xf32> to vector<16x256xbf16>
    %60 = arith.truncf %53 : vector<32x256xf32> to vector<32x256xbf16>
    %61 = arith.truncf %58 : vector<32x256xf32> to vector<32x256xbf16>
    %62 = vector.extract_strided_slice %59 {offsets = [0, 0], sizes = [8, 64], strides = [1, 1]} : vector<16x256xbf16> to vector<8x64xbf16>
    %63 = vector.extract_strided_slice %60 {offsets = [0, 0], sizes = [16, 64], strides = [1, 1]} : vector<32x256xbf16> to vector<16x64xbf16>
    %64 = vector.extract_strided_slice %61 {offsets = [0, 0], sizes = [16, 64], strides = [1, 1]} : vector<32x256xbf16> to vector<16x64xbf16>
    %cst_28 = arith.constant dense<0.000000e+00> : vector<8x16xf32>
    %65 = tpu.matmul %62, %63, %cst_28 {dimension_numbers = #tpu.dot_dimension_numbers<[1], [1], [0], [0], [0, 0, 1, 0], [], []>} : vector<8x64xbf16>, vector<16x64xbf16>, vector<8x16xf32> -> vector<8x16xf32>
    %cst_29 = arith.constant dense<0xFF800000> : vector<8xf32>
    %66 = vector.multi_reduction <maximumf>, %65, %cst_29 [1] : vector<8x16xf32> to vector<8xf32>
    %67 = vector.shape_cast %66 : vector<8xf32> to vector<8x1xf32>
    %68 = vector.broadcast %67 : vector<8x1xf32> to vector<8x16xf32>
    %69 = arith.subf %65, %68 : vector<8x16xf32>
    %70 = math.exp %69 : vector<8x16xf32>
    %cst_30 = arith.constant dense<0.000000e+00> : vector<8xf32>
    %71 = vector.multi_reduction <add>, %70, %cst_30 [1] : vector<8x16xf32> to vector<8xf32>
    %72 = vector.shape_cast %71 : vector<8xf32> to vector<8x1xf32>
    %73 = arith.truncf %70 : vector<8x16xf32> to vector<8x16xbf16>
    %cst_31 = arith.constant dense<0.000000e+00> : vector<8x64xf32>
    %74 = tpu.matmul %73, %64, %cst_31 {dimension_numbers = #tpu.dot_dimension_numbers<[1], [0], [0], [1], [0, 0, 1, 1], [], []>} : vector<8x16xbf16>, vector<16x64xbf16>, vector<8x64xf32> -> vector<8x64xf32>
    %75 = tpu.reciprocal %72 : vector<8x1xf32> -> vector<8x1xf32>
    %76 = vector.broadcast %75 : vector<8x1xf32> to vector<8x64xf32>
    %77 = arith.mulf %74, %76 : vector<8x64xf32>
    %c0_32 = arith.constant 0 : index
    %c0_33 = arith.constant 0 : index
    %78 = vector.load %arg14[%c0_32, %c0_33] : memref<16x256xf32, #tpu.memory_space<vmem>>, vector<8x64xf32>
    tpu.vector_store %arg14[%c0_32, %c0_33], %77 {strides = array<i32>} : memref<16x256xf32, #tpu.memory_space<vmem>>, vector<8x64xf32>,
    %79 = vector.extract_strided_slice %59 {offsets = [0, 64], sizes = [8, 64], strides = [1, 1]} : vector<16x256xbf16> to vector<8x64xbf16>
    %80 = vector.extract_strided_slice %60 {offsets = [0, 64], sizes = [16, 64], strides = [1, 1]} : vector<32x256xbf16> to vector<16x64xbf16>
    %81 = vector.extract_strided_slice %61 {offsets = [0, 64], sizes = [16, 64], strides = [1, 1]} : vector<32x256xbf16> to vector<16x64xbf16>
    %cst_34 = arith.constant dense<0.000000e+00> : vector<8x16xf32>
    %82 = tpu.matmul %79, %80, %cst_34 {dimension_numbers = #tpu.dot_dimension_numbers<[1], [1], [0], [0], [0, 0, 1, 0], [], []>} : vector<8x64xbf16>, vector<16x64xbf16>, vector<8x16xf32> -> vector<8x16xf32>
    %cst_35 = arith.constant dense<0xFF800000> : vector<8xf32>
    %83 = vector.multi_reduction <maximumf>, %82, %cst_35 [1] : vector<8x16xf32> to vector<8xf32>
    %84 = vector.shape_cast %83 : vector<8xf32> to vector<8x1xf32>
    %85 = vector.broadcast %84 : vector<8x1xf32> to vector<8x16xf32>
    %86 = arith.subf %82, %85 : vector<8x16xf32>
    %87 = math.exp %86 : vector<8x16xf32>
    %cst_36 = arith.constant dense<0.000000e+00> : vector<8xf32>
    %88 = vector.multi_reduction <add>, %87, %cst_36 [1] : vector<8x16xf32> to vector<8xf32>
    %89 = vector.shape_cast %88 : vector<8xf32> to vector<8x1xf32>
    %90 = arith.truncf %87 : vector<8x16xf32> to vector<8x16xbf16>
    %cst_37 = arith.constant dense<0.000000e+00> : vector<8x64xf32>
    %91 = tpu.matmul %90, %81, %cst_37 {dimension_numbers = #tpu.dot_dimension_numbers<[1], [0], [0], [1], [0, 0, 1, 1], [], []>} : vector<8x16xbf16>, vector<16x64xbf16>, vector<8x64xf32> -> vector<8x64xf32>
    %92 = tpu.reciprocal %89 : vector<8x1xf32> -> vector<8x1xf32>
    %93 = vector.broadcast %92 : vector<8x1xf32> to vector<8x64xf32>
    %94 = arith.mulf %91, %93 : vector<8x64xf32>
    %c0_38 = arith.constant 0 : index
    %c64 = arith.constant 64 : index
    %95 = vector.load %arg14[%c0_38, %c64] : memref<16x256xf32, #tpu.memory_space<vmem>>, vector<8x64xf32>
    tpu.vector_store %arg14[%c0_38, %c64], %94 {strides = array<i32>} : memref<16x256xf32, #tpu.memory_space<vmem>>, vector<8x64xf32>,
    %96 = vector.extract_strided_slice %59 {offsets = [0, 128], sizes = [8, 64], strides = [1, 1]} : vector<16x256xbf16> to vector<8x64xbf16>
    %97 = vector.extract_strided_slice %60 {offsets = [0, 128], sizes = [16, 64], strides = [1, 1]} : vector<32x256xbf16> to vector<16x64xbf16>
    %98 = vector.extract_strided_slice %61 {offsets = [0, 128], sizes = [16, 64], strides = [1, 1]} : vector<32x256xbf16> to vector<16x64xbf16>
    %cst_39 = arith.constant dense<0.000000e+00> : vector<8x16xf32>
    %99 = tpu.matmul %96, %97, %cst_39 {dimension_numbers = #tpu.dot_dimension_numbers<[1], [1], [0], [0], [0, 0, 1, 0], [], []>} : vector<8x64xbf16>, vector<16x64xbf16>, vector<8x16xf32> -> vector<8x16xf32>
    %cst_40 = arith.constant dense<0xFF800000> : vector<8xf32>
    %100 = vector.multi_reduction <maximumf>, %99, %cst_40 [1] : vector<8x16xf32> to vector<8xf32>
    %101 = vector.shape_cast %100 : vector<8xf32> to vector<8x1xf32>
    %102 = vector.broadcast %101 : vector<8x1xf32> to vector<8x16xf32>
    %103 = arith.subf %99, %102 : vector<8x16xf32>
    %104 = math.exp %103 : vector<8x16xf32>
    %cst_41 = arith.constant dense<0.000000e+00> : vector<8xf32>
    %105 = vector.multi_reduction <add>, %104, %cst_41 [1] : vector<8x16xf32> to vector<8xf32>
    %106 = vector.shape_cast %105 : vector<8xf32> to vector<8x1xf32>
    %107 = arith.truncf %104 : vector<8x16xf32> to vector<8x16xbf16>
    %cst_42 = arith.constant dense<0.000000e+00> : vector<8x64xf32>
    %108 = tpu.matmul %107, %98, %cst_42 {dimension_numbers = #tpu.dot_dimension_numbers<[1], [0], [0], [1], [0, 0, 1, 1], [], []>} : vector<8x16xbf16>, vector<16x64xbf16>, vector<8x64xf32> -> vector<8x64xf32>
    %109 = tpu.reciprocal %106 : vector<8x1xf32> -> vector<8x1xf32>
    %110 = vector.broadcast %109 : vector<8x1xf32> to vector<8x64xf32>
    %111 = arith.mulf %108, %110 : vector<8x64xf32>
    %c0_43 = arith.constant 0 : index
    %c128 = arith.constant 128 : index
    %112 = vector.load %arg14[%c0_43, %c128] : memref<16x256xf32, #tpu.memory_space<vmem>>, vector<8x64xf32>
    tpu.vector_store %arg14[%c0_43, %c128], %111 {strides = array<i32>} : memref<16x256xf32, #tpu.memory_space<vmem>>, vector<8x64xf32>,
    %113 = vector.extract_strided_slice %59 {offsets = [0, 192], sizes = [8, 64], strides = [1, 1]} : vector<16x256xbf16> to vector<8x64xbf16>
    %114 = vector.extract_strided_slice %60 {offsets = [0, 192], sizes = [16, 64], strides = [1, 1]} : vector<32x256xbf16> to vector<16x64xbf16>
    %115 = vector.extract_strided_slice %61 {offsets = [0, 192], sizes = [16, 64], strides = [1, 1]} : vector<32x256xbf16> to vector<16x64xbf16>
    %cst_44 = arith.constant dense<0.000000e+00> : vector<8x16xf32>
    %116 = tpu.matmul %113, %114, %cst_44 {dimension_numbers = #tpu.dot_dimension_numbers<[1], [1], [0], [0], [0, 0, 1, 0], [], []>} : vector<8x64xbf16>, vector<16x64xbf16>, vector<8x16xf32> -> vector<8x16xf32>
    %cst_45 = arith.constant dense<0xFF800000> : vector<8xf32>
    %117 = vector.multi_reduction <maximumf>, %116, %cst_45 [1] : vector<8x16xf32> to vector<8xf32>
    %118 = vector.shape_cast %117 : vector<8xf32> to vector<8x1xf32>
    %119 = vector.broadcast %118 : vector<8x1xf32> to vector<8x16xf32>
    %120 = arith.subf %116, %119 : vector<8x16xf32>
    %121 = math.exp %120 : vector<8x16xf32>
    %cst_46 = arith.constant dense<0.000000e+00> : vector<8xf32>
    %122 = vector.multi_reduction <add>, %121, %cst_46 [1] : vector<8x16xf32> to vector<8xf32>
    %123 = vector.shape_cast %122 : vector<8xf32> to vector<8x1xf32>
    %124 = arith.truncf %121 : vector<8x16xf32> to vector<8x16xbf16>
    %cst_47 = arith.constant dense<0.000000e+00> : vector<8x64xf32>
    %125 = tpu.matmul %124, %115, %cst_47 {dimension_numbers = #tpu.dot_dimension_numbers<[1], [0], [0], [1], [0, 0, 1, 1], [], []>} : vector<8x16xbf16>, vector<16x64xbf16>, vector<8x64xf32> -> vector<8x64xf32>
    %126 = tpu.reciprocal %123 : vector<8x1xf32> -> vector<8x1xf32>
    %127 = vector.broadcast %126 : vector<8x1xf32> to vector<8x64xf32>
    %128 = arith.mulf %125, %127 : vector<8x64xf32>
    %c0_48 = arith.constant 0 : index
    %c192 = arith.constant 192 : index
    %129 = vector.load %arg14[%c0_48, %c192] : memref<16x256xf32, #tpu.memory_space<vmem>>, vector<8x64xf32>
    tpu.vector_store %arg14[%c0_48, %c192], %128 {strides = array<i32>} : memref<16x256xf32, #tpu.memory_space<vmem>>, vector<8x64xf32>,
    %130 = vector.extract_strided_slice %59 {offsets = [8, 0], sizes = [8, 64], strides = [1, 1]} : vector<16x256xbf16> to vector<8x64xbf16>
    %131 = vector.extract_strided_slice %60 {offsets = [16, 0], sizes = [16, 64], strides = [1, 1]} : vector<32x256xbf16> to vector<16x64xbf16>
    %132 = vector.extract_strided_slice %61 {offsets = [16, 0], sizes = [16, 64], strides = [1, 1]} : vector<32x256xbf16> to vector<16x64xbf16>
    %cst_49 = arith.constant dense<0.000000e+00> : vector<8x16xf32>
    %133 = tpu.matmul %130, %131, %cst_49 {dimension_numbers = #tpu.dot_dimension_numbers<[1], [1], [0], [0], [0, 0, 1, 0], [], []>} : vector<8x64xbf16>, vector<16x64xbf16>, vector<8x16xf32> -> vector<8x16xf32>
    %cst_50 = arith.constant dense<0xFF800000> : vector<8xf32>
    %134 = vector.multi_reduction <maximumf>, %133, %cst_50 [1] : vector<8x16xf32> to vector<8xf32>
    %135 = vector.shape_cast %134 : vector<8xf32> to vector<8x1xf32>
    %136 = vector.broadcast %135 : vector<8x1xf32> to vector<8x16xf32>
    %137 = arith.subf %133, %136 : vector<8x16xf32>
    %138 = math.exp %137 : vector<8x16xf32>
    %cst_51 = arith.constant dense<0.000000e+00> : vector<8xf32>
    %139 = vector.multi_reduction <add>, %138, %cst_51 [1] : vector<8x16xf32> to vector<8xf32>
    %140 = vector.shape_cast %139 : vector<8xf32> to vector<8x1xf32>
    %141 = arith.truncf %138 : vector<8x16xf32> to vector<8x16xbf16>
    %cst_52 = arith.constant dense<0.000000e+00> : vector<8x64xf32>
    %142 = tpu.matmul %141, %132, %cst_52 {dimension_numbers = #tpu.dot_dimension_numbers<[1], [0], [0], [1], [0, 0, 1, 1], [], []>} : vector<8x16xbf16>, vector<16x64xbf16>, vector<8x64xf32> -> vector<8x64xf32>
    %143 = tpu.reciprocal %140 : vector<8x1xf32> -> vector<8x1xf32>
    %144 = vector.broadcast %143 : vector<8x1xf32> to vector<8x64xf32>
    %145 = arith.mulf %142, %144 : vector<8x64xf32>
    %c8 = arith.constant 8 : index
    %c0_53 = arith.constant 0 : index
    %146 = vector.load %arg14[%c8, %c0_53] : memref<16x256xf32, #tpu.memory_space<vmem>>, vector<8x64xf32>
    tpu.vector_store %arg14[%c8, %c0_53], %145 {strides = array<i32>} : memref<16x256xf32, #tpu.memory_space<vmem>>, vector<8x64xf32>,
    %147 = vector.extract_strided_slice %59 {offsets = [8, 64], sizes = [8, 64], strides = [1, 1]} : vector<16x256xbf16> to vector<8x64xbf16>
    %148 = vector.extract_strided_slice %60 {offsets = [16, 64], sizes = [16, 64], strides = [1, 1]} : vector<32x256xbf16> to vector<16x64xbf16>
    %149 = vector.extract_strided_slice %61 {offsets = [16, 64], sizes = [16, 64], strides = [1, 1]} : vector<32x256xbf16> to vector<16x64xbf16>
    %cst_54 = arith.constant dense<0.000000e+00> : vector<8x16xf32>
    %150 = tpu.matmul %147, %148, %cst_54 {dimension_numbers = #tpu.dot_dimension_numbers<[1], [1], [0], [0], [0, 0, 1, 0], [], []>} : vector<8x64xbf16>, vector<16x64xbf16>, vector<8x16xf32> -> vector<8x16xf32>
    %cst_55 = arith.constant dense<0xFF800000> : vector<8xf32>
    %151 = vector.multi_reduction <maximumf>, %150, %cst_55 [1] : vector<8x16xf32> to vector<8xf32>
    %152 = vector.shape_cast %151 : vector<8xf32> to vector<8x1xf32>
    %153 = vector.broadcast %152 : vector<8x1xf32> to vector<8x16xf32>
    %154 = arith.subf %150, %153 : vector<8x16xf32>
    %155 = math.exp %154 : vector<8x16xf32>
    %cst_56 = arith.constant dense<0.000000e+00> : vector<8xf32>
    %156 = vector.multi_reduction <add>, %155, %cst_56 [1] : vector<8x16xf32> to vector<8xf32>
    %157 = vector.shape_cast %156 : vector<8xf32> to vector<8x1xf32>
    %158 = arith.truncf %155 : vector<8x16xf32> to vector<8x16xbf16>
    %cst_57 = arith.constant dense<0.000000e+00> : vector<8x64xf32>
    %159 = tpu.matmul %158, %149, %cst_57 {dimension_numbers = #tpu.dot_dimension_numbers<[1], [0], [0], [1], [0, 0, 1, 1], [], []>} : vector<8x16xbf16>, vector<16x64xbf16>, vector<8x64xf32> -> vector<8x64xf32>
    %160 = tpu.reciprocal %157 : vector<8x1xf32> -> vector<8x1xf32>
    %161 = vector.broadcast %160 : vector<8x1xf32> to vector<8x64xf32>
    %162 = arith.mulf %159, %161 : vector<8x64xf32>
    %c8_58 = arith.constant 8 : index
    %c64_59 = arith.constant 64 : index
    %163 = vector.load %arg14[%c8_58, %c64_59] : memref<16x256xf32, #tpu.memory_space<vmem>>, vector<8x64xf32>
    tpu.vector_store %arg14[%c8_58, %c64_59], %162 {strides = array<i32>} : memref<16x256xf32, #tpu.memory_space<vmem>>, vector<8x64xf32>,
    %164 = vector.extract_strided_slice %59 {offsets = [8, 128], sizes = [8, 64], strides = [1, 1]} : vector<16x256xbf16> to vector<8x64xbf16>
    %165 = vector.extract_strided_slice %60 {offsets = [16, 128], sizes = [16, 64], strides = [1, 1]} : vector<32x256xbf16> to vector<16x64xbf16>
    %166 = vector.extract_strided_slice %61 {offsets = [16, 128], sizes = [16, 64], strides = [1, 1]} : vector<32x256xbf16> to vector<16x64xbf16>
    %cst_60 = arith.constant dense<0.000000e+00> : vector<8x16xf32>
    %167 = tpu.matmul %164, %165, %cst_60 {dimension_numbers = #tpu.dot_dimension_numbers<[1], [1], [0], [0], [0, 0, 1, 0], [], []>} : vector<8x64xbf16>, vector<16x64xbf16>, vector<8x16xf32> -> vector<8x16xf32>
    %cst_61 = arith.constant dense<0xFF800000> : vector<8xf32>
    %168 = vector.multi_reduction <maximumf>, %167, %cst_61 [1] : vector<8x16xf32> to vector<8xf32>
    %169 = vector.shape_cast %168 : vector<8xf32> to vector<8x1xf32>
    %170 = vector.broadcast %169 : vector<8x1xf32> to vector<8x16xf32>
    %171 = arith.subf %167, %170 : vector<8x16xf32>
    %172 = math.exp %171 : vector<8x16xf32>
    %cst_62 = arith.constant dense<0.000000e+00> : vector<8xf32>
    %173 = vector.multi_reduction <add>, %172, %cst_62 [1] : vector<8x16xf32> to vector<8xf32>
    %174 = vector.shape_cast %173 : vector<8xf32> to vector<8x1xf32>
    %175 = arith.truncf %172 : vector<8x16xf32> to vector<8x16xbf16>
    %cst_63 = arith.constant dense<0.000000e+00> : vector<8x64xf32>
    %176 = tpu.matmul %175, %166, %cst_63 {dimension_numbers = #tpu.dot_dimension_numbers<[1], [0], [0], [1], [0, 0, 1, 1], [], []>} : vector<8x16xbf16>, vector<16x64xbf16>, vector<8x64xf32> -> vector<8x64xf32>
    %177 = tpu.reciprocal %174 : vector<8x1xf32> -> vector<8x1xf32>
    %178 = vector.broadcast %177 : vector<8x1xf32> to vector<8x64xf32>
    %179 = arith.mulf %176, %178 : vector<8x64xf32>
    %c8_64 = arith.constant 8 : index
    %c128_65 = arith.constant 128 : index
    %180 = vector.load %arg14[%c8_64, %c128_65] : memref<16x256xf32, #tpu.memory_space<vmem>>, vector<8x64xf32>
    tpu.vector_store %arg14[%c8_64, %c128_65], %179 {strides = array<i32>} : memref<16x256xf32, #tpu.memory_space<vmem>>, vector<8x64xf32>,
    %181 = vector.extract_strided_slice %59 {offsets = [8, 192], sizes = [8, 64], strides = [1, 1]} : vector<16x256xbf16> to vector<8x64xbf16>
    %182 = vector.extract_strided_slice %60 {offsets = [16, 192], sizes = [16, 64], strides = [1, 1]} : vector<32x256xbf16> to vector<16x64xbf16>
    %183 = vector.extract_strided_slice %61 {offsets = [16, 192], sizes = [16, 64], strides = [1, 1]} : vector<32x256xbf16> to vector<16x64xbf16>
    %cst_66 = arith.constant dense<0.000000e+00> : vector<8x16xf32>
    %184 = tpu.matmul %181, %182, %cst_66 {dimension_numbers = #tpu.dot_dimension_numbers<[1], [1], [0], [0], [0, 0, 1, 0], [], []>} : vector<8x64xbf16>, vector<16x64xbf16>, vector<8x16xf32> -> vector<8x16xf32>
    %cst_67 = arith.constant dense<0xFF800000> : vector<8xf32>
    %185 = vector.multi_reduction <maximumf>, %184, %cst_67 [1] : vector<8x16xf32> to vector<8xf32>
    %186 = vector.shape_cast %185 : vector<8xf32> to vector<8x1xf32>
    %187 = vector.broadcast %186 : vector<8x1xf32> to vector<8x16xf32>
    %188 = arith.subf %184, %187 : vector<8x16xf32>
    %189 = math.exp %188 : vector<8x16xf32>
    %cst_68 = arith.constant dense<0.000000e+00> : vector<8xf32>
    %190 = vector.multi_reduction <add>, %189, %cst_68 [1] : vector<8x16xf32> to vector<8xf32>
    %191 = vector.shape_cast %190 : vector<8xf32> to vector<8x1xf32>
    %192 = arith.truncf %189 : vector<8x16xf32> to vector<8x16xbf16>
    %cst_69 = arith.constant dense<0.000000e+00> : vector<8x64xf32>
    %193 = tpu.matmul %192, %183, %cst_69 {dimension_numbers = #tpu.dot_dimension_numbers<[1], [0], [0], [1], [0, 0, 1, 1], [], []>} : vector<8x16xbf16>, vector<16x64xbf16>, vector<8x64xf32> -> vector<8x64xf32>
    %194 = tpu.reciprocal %191 : vector<8x1xf32> -> vector<8x1xf32>
    %195 = vector.broadcast %194 : vector<8x1xf32> to vector<8x64xf32>
    %196 = arith.mulf %193, %195 : vector<8x64xf32>
    %c8_70 = arith.constant 8 : index
    %c192_71 = arith.constant 192 : index
    %197 = vector.load %arg14[%c8_70, %c192_71] : memref<16x256xf32, #tpu.memory_space<vmem>>, vector<8x64xf32>
    tpu.vector_store %arg14[%c8_70, %c192_71], %196 {strides = array<i32>} : memref<16x256xf32, #tpu.memory_space<vmem>>, vector<8x64xf32>,
    %c0_72 = arith.constant 0 : index
    %c0_73 = arith.constant 0 : index
    %198 = vector.load %arg14[%c0_72, %c0_73] : memref<16x256xf32, #tpu.memory_space<vmem>>, vector<16x256xf32>
    %199 = arith.truncf %198 : vector<16x256xf32> to vector<16x256xbf16>
    %c0_74 = arith.constant 0 : index
    %c0_75 = arith.constant 0 : index
    %c0_76 = arith.constant 0 : index
    %200 = vector.load %arg7[%c0_74, %c0_75, %c0_76] : memref<1x256x256xbf16, #tpu.memory_space<vmem>>, vector<1x256x256xbf16>
    %201 = vector.shape_cast %200 : vector<1x256x256xbf16> to vector<256x256xbf16>
    %cst_77 = arith.constant dense<0.000000e+00> : vector<16x256xf32>
    %202 = tpu.matmul %199, %201, %cst_77 {dimension_numbers = #tpu.dot_dimension_numbers<[1], [0], [0], [1], [0, 0, 1, 1], [], []>} : vector<16x256xbf16>, vector<256x256xbf16>, vector<16x256xf32> -> vector<16x256xf32>
    %203 = vector.broadcast %15 : vector<1x256xf32> to vector<16x256xf32>
    %204 = arith.addf %202, %203 : vector<16x256xf32>
    %205 = arith.addf %3, %204 : vector<16x256xf32>
    %cst_78 = arith.constant dense<0.000000e+00> : vector<16xf32>
    %206 = vector.multi_reduction <add>, %205, %cst_78 [1] : vector<16x256xf32> to vector<16xf32>
    %207 = vector.shape_cast %206 : vector<16xf32> to vector<16x1xf32>
    %208 = arith.mulf %205, %205 : vector<16x256xf32>
    %cst_79 = arith.constant dense<0.000000e+00> : vector<16xf32>
    %209 = vector.multi_reduction <add>, %208, %cst_79 [1] : vector<16x256xf32> to vector<16xf32>
    %210 = vector.shape_cast %209 : vector<16xf32> to vector<16x1xf32>
    %cst_80 = arith.constant 3.906250e-03 : f32
    %211 = vector.broadcast %cst_80 : f32 to vector<16x1xf32>
    %212 = arith.mulf %207, %211 : vector<16x1xf32>
    %cst_81 = arith.constant 3.906250e-03 : f32
    %213 = vector.broadcast %cst_81 : f32 to vector<16x1xf32>
    %214 = arith.mulf %210, %213 : vector<16x1xf32>
    %215 = arith.mulf %212, %212 : vector<16x1xf32>
    %216 = arith.subf %214, %215 : vector<16x1xf32>
    %cst_82 = arith.constant 0.000000e+00 : f32
    %217 = vector.broadcast %cst_82 : f32 to vector<16x1xf32>
    %218 = arith.maximumf %216, %217 : vector<16x1xf32>
    %219 = vector.broadcast %212 : vector<16x1xf32> to vector<16x256xf32>
    %220 = arith.subf %205, %219 : vector<16x256xf32>
    %cst_83 = arith.constant 9.99999974E-6 : f32
    %221 = vector.broadcast %cst_83 : f32 to vector<16x1xf32>
    %222 = arith.addf %218, %221 : vector<16x1xf32>
    %223 = math.rsqrt %222 : vector<16x1xf32>
    %224 = vector.broadcast %223 : vector<16x1xf32> to vector<16x256xf32>
    %225 = arith.mulf %220, %224 : vector<16x256xf32>
    %226 = vector.broadcast %16 : vector<1x256xf32> to vector<16x256xf32>
    %227 = arith.mulf %225, %226 : vector<16x256xf32>
    %228 = vector.broadcast %17 : vector<1x256xf32> to vector<16x256xf32>
    %229 = arith.addf %227, %228 : vector<16x256xf32>
    %230 = arith.truncf %229 : vector<16x256xf32> to vector<16x256xbf16>
    %c0_84 = arith.constant 0 : index
    %c0_85 = arith.constant 0 : index
    %c0_86 = arith.constant 0 : index
    %231 = vector.load %arg8[%c0_84, %c0_85, %c0_86] : memref<1x256x256xbf16, #tpu.memory_space<vmem>>, vector<1x256x256xbf16>
    %232 = vector.shape_cast %231 : vector<1x256x256xbf16> to vector<256x256xbf16>
    %cst_87 = arith.constant dense<0.000000e+00> : vector<16x256xf32>
    %233 = tpu.matmul %230, %232, %cst_87 {dimension_numbers = #tpu.dot_dimension_numbers<[1], [0], [0], [1], [0, 0, 1, 1], [], []>} : vector<16x256xbf16>, vector<256x256xbf16>, vector<16x256xf32> -> vector<16x256xf32>
    %234 = vector.broadcast %9 : vector<1x256xf32> to vector<16x256xf32>
    %235 = arith.addf %233, %234 : vector<16x256xf32>
    %cst_88 = arith.constant 0.000000e+00 : f32
    %236 = vector.broadcast %cst_88 : f32 to vector<16x256xf32>
    %237 = arith.maximumf %235, %236 : vector<16x256xf32>
    %238 = arith.truncf %237 : vector<16x256xf32> to vector<16x256xbf16>
    %c0_89 = arith.constant 0 : index
    %c0_90 = arith.constant 0 : index
    %c0_91 = arith.constant 0 : index
    %239 = vector.load %arg9[%c0_89, %c0_90, %c0_91] : memref<1x256x256xbf16, #tpu.memory_space<vmem>>, vector<1x256x256xbf16>
    %240 = vector.shape_cast %239 : vector<1x256x256xbf16> to vector<256x256xbf16>
    %cst_92 = arith.constant dense<0.000000e+00> : vector<16x256xf32>
    %241 = tpu.matmul %238, %240, %cst_92 {dimension_numbers = #tpu.dot_dimension_numbers<[1], [0], [0], [1], [0, 0, 1, 1], [], []>} : vector<16x256xbf16>, vector<256x256xbf16>, vector<16x256xf32> -> vector<16x256xf32>
    %242 = vector.broadcast %18 : vector<1x256xf32> to vector<16x256xf32>
    %243 = arith.addf %241, %242 : vector<16x256xf32>
    %244 = arith.addf %205, %243 : vector<16x256xf32>
    %c0_93 = arith.constant 0 : index
    %c0_94 = arith.constant 0 : index
    %245 = vector.load %arg13[%c0_93, %c0_94] : memref<16x256xf32, #tpu.memory_space<vmem>>, vector<16x256xf32>
    tpu.vector_store %arg13[%c0_93, %c0_94], %244 {strides = array<i32>} : memref<16x256xf32, #tpu.memory_space<vmem>>, vector<16x256xf32>,
    %c1_i32 = arith.constant 1 : i32
    %246 = arith.cmpi eq, %arg1, %c1_i32 : i32
    %247 = arith.extui %246 : i1 to i32
    %c0_i32_95 = arith.constant 0 : i32
    %248 = arith.cmpi ne, %247, %c0_i32_95 : i32
    scf.if %248 {
      %249 = vector.shape_cast %244 : vector<16x256xf32> to vector<2x8x256xf32>
      %c0_96 = arith.constant 0 : index
      %c0_97 = arith.constant 0 : index
      %c0_98 = arith.constant 0 : index
      %250 = vector.load %arg12[%c0_96, %c0_97, %c0_98] : memref<2x8x256xf32, #tpu.memory_space<vmem>>, vector<2x8x256xf32>
      tpu.vector_store %arg12[%c0_96, %c0_97, %c0_98], %249 {strides = array<i32>} : memref<2x8x256xf32, #tpu.memory_space<vmem>>, vector<2x8x256xf32>,
    } else {
    }
    return
  }
  func.func @transform_0(%arg0: i32, %arg1: i32) -> (i32, i32, i32) {
    %c0_i32 = arith.constant 0 : i32
    %c0_i32_0 = arith.constant 0 : i32
    %c0_i32_1 = arith.constant 0 : i32
    return %arg0, %c0_i32, %c0_i32_0 : i32, i32, i32
  }
  func.func @transform_1(%arg0: i32, %arg1: i32) -> (i32, i32, i32) {
    %c0_i32 = arith.constant 0 : i32
    %c0_i32_0 = arith.constant 0 : i32
    %c0_i32_1 = arith.constant 0 : i32
    return %arg0, %c0_i32, %c0_i32_0 : i32, i32, i32
  }
  func.func @transform_2(%arg0: i32, %arg1: i32) -> (i32, i32, i32) {
    %c0_i32 = arith.constant 0 : i32
    %c0_i32_0 = arith.constant 0 : i32
    %c0_i32_1 = arith.constant 0 : i32
    return %arg1, %c0_i32, %c0_i32_0 : i32, i32, i32
  }
  func.func @transform_3(%arg0: i32, %arg1: i32) -> (i32, i32, i32) {
    %c0_i32 = arith.constant 0 : i32
    %c0_i32_0 = arith.constant 0 : i32
    %c0_i32_1 = arith.constant 0 : i32
    return %arg1, %c0_i32, %c0_i32_0 : i32, i32, i32
  }
  func.func @transform_4(%arg0: i32, %arg1: i32) -> (i32, i32, i32) {
    %c0_i32 = arith.constant 0 : i32
    %c0_i32_0 = arith.constant 0 : i32
    %c0_i32_1 = arith.constant 0 : i32
    return %arg1, %c0_i32, %c0_i32_0 : i32, i32, i32
  }
  func.func @transform_5(%arg0: i32, %arg1: i32) -> (i32, i32, i32) {
    %c0_i32 = arith.constant 0 : i32
    %c0_i32_0 = arith.constant 0 : i32
    %c0_i32_1 = arith.constant 0 : i32
    return %arg1, %c0_i32, %c0_i32_0 : i32, i32, i32
  }
  func.func @transform_6(%arg0: i32, %arg1: i32) -> (i32, i32, i32) {
    %c0_i32 = arith.constant 0 : i32
    %c0_i32_0 = arith.constant 0 : i32
    %c0_i32_1 = arith.constant 0 : i32
    return %arg1, %c0_i32, %c0_i32_0 : i32, i32, i32
  }
  func.func @transform_7(%arg0: i32, %arg1: i32) -> (i32, i32, i32) {
    %c0_i32 = arith.constant 0 : i32
    %c0_i32_0 = arith.constant 0 : i32
    %c0_i32_1 = arith.constant 0 : i32
    return %arg1, %c0_i32, %c0_i32_0 : i32, i32, i32
  }
  func.func @transform_8(%arg0: i32, %arg1: i32) -> (i32, i32, i32) {
    %c0_i32 = arith.constant 0 : i32
    %c0_i32_0 = arith.constant 0 : i32
    %c0_i32_1 = arith.constant 0 : i32
    return %arg1, %c0_i32, %c0_i32_0 : i32, i32, i32
  }
  func.func @transform_9(%arg0: i32, %arg1: i32) -> (i32, i32, i32) {
    %c0_i32 = arith.constant 0 : i32
    %c0_i32_0 = arith.constant 0 : i32
    %c0_i32_1 = arith.constant 0 : i32
    return %arg1, %c0_i32, %c0_i32_0 : i32, i32, i32
  }
  func.func @transform_10(%arg0: i32, %arg1: i32) -> (i32, i32, i32) {
    %c0_i32 = arith.constant 0 : i32
    %c0_i32_0 = arith.constant 0 : i32
    %c0_i32_1 = arith.constant 0 : i32
    return %arg0, %c0_i32, %c0_i32_0 : i32, i32, i32
  }
}

</mosaic_0001>

<bundles_post_ra>
// kernel: cross_attn_layer.1
= control target key start
LH: loop header
LB: loop body
LE: loop exit
PB: predicated region body
PF: predicated region fallthrough
CT: control target
= control target key end

     0   :  { %s5140_s0 = inlined_call_operand.vmem [shape: f32[2,8,256], index: 0, kind: input, shape index: {}]   ;;  %s5141_s1 = inlined_call_operand.vmem [shape: bf16[2,16,256], index: 1, kind: input, shape index: {}]   ;;  %s5142_s2 = inlined_call_operand.vmem [shape: bf16[2,256,256], index: 2, kind: input, shape index: {}]   ;;  %s5143_s3 = inlined_call_operand.vmem [shape: bf16[2,256,256], index: 3, kind: input, shape index: {}]   ;;  %s5144_s4 = inlined_call_operand.vmem [shape: bf16[2,256,256], index: 4, kind: input, shape index: {}]   ;;  %s5145_s5 = inlined_call_operand.vmem [shape: bf16[2,256,256], index: 5, kind: input, shape index: {}]   ;;  %s5146_s6 = inlined_call_operand.vmem [shape: bf16[2,256,256], index: 6, kind: input, shape index: {}]   ;;  %s5147_s7 = inlined_call_operand.vmem [shape: bf16[2,256,256], index: 7, kind: input, shape index: {}]   ;;  %s5148_s8 = inlined_call_operand.vmem [shape: f32[2,9,256], index: 8, kind: input, shape index: {}]   ;;  %s5149_s9 = inlined_call_operand.vmem [shape: f32[2,1,256], index: 9, kind: input, shape index: {}]   ;;  %s5150_s10 = inlined_call_operand.hbm [shape: f32[2,8,256], index: 10, kind: output, shape index: {}]  }
   0x1   :  { %5151 = sst [smem:[#allocation8_spill]] %s5142_s2 }
   0x2   :  { %5152 = sst [smem:[#allocation9_spill]] %s5143_s3 }
   0x3   :  { %5153 = sst [smem:[#allocation10_spill]] %s5144_s4 }
   0x4   :  { %15 = vsyncpa [#allocation5], 0  ;;  %s4309_s13 = smov 0   ;;  %s4311_s14 = smov 0  }
   0x5   :  { %s4313_s15 = smov 0  }
   0x6 LB: > { %s30_s17 = sadd.s32 1, %s4244_s14  ;;  %p3087_p1 = scmp.ge.s32.totalorder %s4248_s15, 1  ;;  %s4248_s15 = sphi %s4313_s15, %s21_s15   ;;  %s4244_s14 = sphi %s4311_s14, %s5165_s14   ;;  %s4240_s13 = sphi %s4309_s13, %s5164_s13  }
   0x7   : > { %p31_p0 = scmp.ge.s32.totalorder %s30_s17, 2  ;;  %p418_p2 = scmp.lt.s32.totalorder %s4248_s15, 3 }
   0x9   : > { %s5167_s17 = smov (%p31_p0, %s30_s17), 0  ;;  %p419_p3 = pnand %p3087_p1, %p418_p2 }
   0xa   : > { %5154 = sst [smem:[#allocation7_spill]] %s5167_s17  ;;  %p511_p4 = scmp.lt.s32.totalorder (!%p419_p3), %s4240_s13, 1 }
   0xb   : > { %422 = sbr.rel (%p419_p3) target bundleno = 1652 (0x674), region = 60  ;;  %s5155_s2 = sld [smem:[#allocation8_spill]] (!%p419_p3) }
   0xc   : > { %s5156_s3 = sld [smem:[#allocation9_spill]] (!%p419_p3)  ;;  %p3103_p5 = scmp.ne.s32.totalorder (!%p419_p3), %s4240_s13, 0 }
   0xd   : > { %s5157_s4 = sld [smem:[#allocation10_spill]] (!%p419_p3) }
  0x10   : > { %s512_s18 = scalar_select %p511_p4, %s4240_s13, 1 }
  0x12   : > { %s3909_s19 = sshll.u32 %s512_s18, 8  ;;  %s3915_s20 = sshll.u32 %s512_s18, 5 }
  0x13   : > { %s4335_s23 = scalar_lea.vmem %s5155_s2, %s3909_s19  ;;  %s4340_s26 = scalar_lea.vmem %s5156_s3, %s3909_s19 }
  0x14   : > { %s4345_s29 = scalar_lea.vmem %s5157_s4, %s3909_s19  ;;  %s4350_s12 = scalar_lea.vmem %s5145_s5, %s3909_s19 }
  0x15   : > { %s4355_s21 = scalar_lea.vmem %s5146_s6, %s3909_s19  ;;  %s4360_s24 = scalar_lea.vmem %s5147_s7, %s3909_s19 }
  0x16   : > { %s4365_s27 = scalar_lea.vmem %s5148_s8, %s3915_s20  ;;  %s3102_s28 = sshll.u32 %s512_s18, 1 }
  0x17   : > { %s4370_s11 = scalar_lea.vmem %s5149_s9, %s3102_s28  ;;  %555 = sbr.rel (%p3103_p5) target bundleno = 33 (0x21), region = 64 }
  0x1c   : > { %v556_v0 = vld [vmem:[%s5140_s0] sm:$0xff]  ;;  %v557_v1 = vld [vmem:[%s5140_s0 + $0x8] sm:$0xff]  ;;  %v558_v2 = vld [vmem:[%s5140_s0 + $0x10] sm:$0xff] }
  0x1d   : > { %560 = vst [vmem:[#allocation2 + $0x10] sm:$0xff] %v556_v0  ;;  %v559_v3 = vld [vmem:[%s5140_s0 + $0x18] sm:$0xff] }
  0x1e   : > { %561 = vst [vmem:[#allocation2] sm:$0xff] %v557_v1 }
  0x1f   : > { %562 = vst [vmem:[#allocation2 + $0x18] sm:$0xff] %v558_v2 }
  0x20   : > { %563 = vst [vmem:[#allocation2 + $0x8] sm:$0xff] %v559_v3 }
  0x21 PF: > { %v3162_v16 = vld [vmem:[%s4335_s23 + $0x70] sm:$0xf]  ;;  %v3935_v17 = vld [vmem:[%s4335_s23 + $0x74] sm:$0xf0]  ;;  %v3934_v21 = vld [vmem:[%s4335_s23 + $0x74] sm:$0xf] }
  0x22   : > { %v3226_v18 = vld [vmem:[%s4335_s23 + $0xf0] sm:$0xf]  ;;  %v3163_v19 = vor.u32 %v3935_v17, %v3162_v16  ;;  %v3951_v20 = vld [vmem:[%s4335_s23 + $0xf4] sm:$0xf0]  ;;  %v3164_v22 = vld [vmem:[%s4335_s23 + $0x78] sm:$0xf0] }
  0x23   : > { %v3227_v23 = vor.u32 %v3951_v20, %v3226_v18  ;;  %v3167_v24 = vor.u32 %v3934_v21, %v3164_v22  ;;  %v3950_v25 = vld [vmem:[%s4335_s23 + $0xf4] sm:$0xf]  ;;  %v3228_v26 = vld [vmem:[%s4335_s23 + $0xf8] sm:$0xf0]  ;;  %v3154_v28 = vld [vmem:[%s4335_s23 + $0x60] sm:$0xf] }
  0x24   : > { %v4385_v4 = vld [vmem:[#allocation2 + $0x10] sm:$0xff]  ;;  %841 = vmatpush.bf16.msra.mxu0 %v3163_v19  ;;  %v3231_v27 = vor.u32 %v3950_v25, %v3228_v26  ;;  %v3933_v29 = vld [vmem:[%s4335_s23 + $0x64] sm:$0xf0]  ;;  %v3218_v30 = vld [vmem:[%s4335_s23 + $0xe0] sm:$0xf]  ;;  %s4250_s22 = smov 64  }
  0x25   : > { %v4387_v5 = vld [vmem:[#allocation2] sm:$0xff]  ;;  %v583_v7 = vmul.f32 %v4385_v4, %v4385_v4  ;;  %855 = vmatpush.bf16.msra.mxu1 %v3227_v23  ;;  %869 = vmatpush.bf16.msra.mxu2 %v3167_v24  ;;  %v3155_v31 = vor.u32 %v3933_v29, %v3154_v28  ;;  %v3949_v32 = vld [vmem:[%s4335_s23 + $0xe4] sm:$0xf0]  ;;  %v3156_v34 = vld [vmem:[%s4335_s23 + $0x68] sm:$0xf0]  ;;  %vm1472_vm6 = vcmask 523264  }
  0x26   : > { %v577_v6 = vadd.f32 %v4387_v5, %v4385_v4  ;;  %v584_v8 = vmul.f32 %v4387_v5, %v4387_v5  ;;  %v4395_v9 = vld [vmem:[#allocation2 + $0x18] sm:$0xff]  ;;  %883 = vmatpush.bf16.msra.mxu3 %v3231_v27  ;;  %v3932_v33 = vld [vmem:[%s4335_s23 + $0x64] sm:$0xf]  ;;  %v3219_v35 = vor.u32 %v3949_v32, %v3218_v30  ;;  %v3220_v38 = vld [vmem:[%s4335_s23 + $0xe8] sm:$0xf0]  ;;  %vm1492_vm7 = vcmask 130048  }
  0x27   : > { %v4397_v10 = vld [vmem:[#allocation2 + $0x8] sm:$0xff]  ;;  %v585_v12 = vmul.f32 %v4395_v9, %v4395_v9  ;;  %v3159_v36 = vor.u32 %v3932_v33, %v3156_v34  ;;  %v3948_v37 = vld [vmem:[%s4335_s23 + $0xe4] sm:$0xf]  ;;  %v3146_v40 = vld [vmem:[%s4335_s23 + $0x50] sm:$0xf]  ;;  %p3904_p6 = scmp.ne.s32.totalorder %s4240_s13, 1 }
  0x28   : > { %578 = vadd.xlane.f32.xlu0 %v577_v6  ;;  %v587_v11 = vadd.f32 %v584_v8, %v583_v7  ;;  %v586_v13 = vmul.f32 %v4397_v10, %v4397_v10  ;;  %v580_v14 = vadd.f32 %v4397_v10, %v4395_v9  ;;  %842 = vmatpush.bf16.msra.mxu0 %v3155_v31  ;;  %v3931_v41 = vld [vmem:[%s4335_s23 + $0x54] sm:$0xf0]  ;;  %v3210_v42 = vld [vmem:[%s4335_s23 + $0xd0] sm:$0xf]  ;;  %v3930_v45 = vld [vmem:[%s4335_s23 + $0x54] sm:$0xf] }
  0x29   : > { %v3223_v39 = vor.u32 %v3948_v37, %v3220_v38  ;;  %856 = vmatpush.bf16.msra.mxu1 %v3219_v35  ;;  %870 = vmatpush.bf16.msra.mxu2 %v3159_v36  ;;  %v3147_v43 = vor.u32 %v3931_v41, %v3146_v40  ;;  %v3947_v44 = vld [vmem:[%s4335_s23 + $0xd4] sm:$0xf0]  ;;  %v3148_v46 = vld [vmem:[%s4335_s23 + $0x58] sm:$0xf0]  ;;  %v3946_v49 = vld [vmem:[%s4335_s23 + $0xd4] sm:$0xf] }
  0x2a   : > { %588 = vadd.xlane.f32.xlu1 %v587_v11  ;;  %v590_v15 = vadd.f32 %v586_v13, %v585_v12  ;;  %v3211_v47 = vor.u32 %v3947_v44, %v3210_v42  ;;  %v3151_v48 = vor.u32 %v3930_v45, %v3148_v46  ;;  %v3212_v50 = vld [vmem:[%s4335_s23 + $0xd8] sm:$0xf0]  ;;  %v3138_v52 = vld [vmem:[%s4335_s23 + $0x40] sm:$0xf]  ;;  %v3929_v53 = vld [vmem:[%s4335_s23 + $0x44] sm:$0xf0] }
  0x2b   : > { %884 = vmatpush.bf16.msra.mxu3 %v3223_v39  ;;  %v3215_v51 = vor.u32 %v3946_v49, %v3212_v50  ;;  %v3202_v54 = vld [vmem:[%s4335_s23 + $0xc0] sm:$0xf]  ;;  %v3139_v55 = vor.u32 %v3929_v53, %v3138_v52  ;;  %v3945_v56 = vld [vmem:[%s4335_s23 + $0xc4] sm:$0xf0]  ;;  %v3928_v57 = vld [vmem:[%s4335_s23 + $0x44] sm:$0xf] }
  0x2c   : > { %843 = vmatpush.bf16.msra.mxu0 %v3147_v43  ;;  %v3140_v58 = vld [vmem:[%s4335_s23 + $0x48] sm:$0xf0]  ;;  %v3203_v59 = vor.u32 %v3945_v56, %v3202_v54  ;;  %v3944_v61 = vld [vmem:[%s4335_s23 + $0xc4] sm:$0xf]  ;;  %v3130_v0 = vld [vmem:[%s4335_s23 + $0x30] sm:$0xf] }
  0x2d   : > { %857 = vmatpush.bf16.msra.mxu1 %v3211_v47  ;;  %871 = vmatpush.bf16.msra.mxu2 %v3151_v48  ;;  %v3143_v60 = vor.u32 %v3928_v57, %v3140_v58  ;;  %v3204_v62 = vld [vmem:[%s4335_s23 + $0xc8] sm:$0xf0]  ;;  %v3927_v1 = vld [vmem:[%s4335_s23 + $0x34] sm:$0xf0]  ;;  %v3194_v2 = vld [vmem:[%s4335_s23 + $0xb0] sm:$0xf] }
  0x2e   : > { %v3207_v63 = vor.u32 %v3944_v61, %v3204_v62  ;;  %v3131_v3 = vor.u32 %v3927_v1, %v3130_v0  ;;  %v3943_v6 = vld [vmem:[%s4335_s23 + $0xb4] sm:$0xf0]  ;;  %v3926_v7 = vld [vmem:[%s4335_s23 + $0x34] sm:$0xf]  ;;  %v3132_v8 = vld [vmem:[%s4335_s23 + $0x38] sm:$0xf0] }
  0x2f   : > { %885 = vmatpush.bf16.msra.mxu3 %v3215_v51  ;;  %v3195_v11 = vor.u32 %v3943_v6, %v3194_v2  ;;  %v3135_v12 = vor.u32 %v3926_v7, %v3132_v8  ;;  %v3942_v13 = vld [vmem:[%s4335_s23 + $0xb4] sm:$0xf]  ;;  %v3122_v16 = vld [vmem:[%s4335_s23 + $0x20] sm:$0xf]  ;;  %v3925_v17 = vld [vmem:[%s4335_s23 + $0x24] sm:$0xf0] }
  0x30   : > { %581 = vadd.xlane.f32.xlu0 %v580_v14  ;;  %844 = vmatpush.bf16.msra.mxu0 %v3139_v55  ;;  %v3196_v14 = vld [vmem:[%s4335_s23 + $0xb8] sm:$0xf0]  ;;  %v3186_v18 = vld [vmem:[%s4335_s23 + $0xa0] sm:$0xf]  ;;  %v3123_v19 = vor.u32 %v3925_v17, %v3122_v16  ;;  %v3941_v20 = vld [vmem:[%s4335_s23 + $0xa4] sm:$0xf0] }
  0x31   : > { %858 = vmatpush.bf16.msra.mxu1 %v3203_v59  ;;  %872 = vmatpush.bf16.msra.mxu2 %v3143_v60  ;;  %v3924_v21 = vld [vmem:[%s4335_s23 + $0x24] sm:$0xf]  ;;  %v3124_v22 = vld [vmem:[%s4335_s23 + $0x28] sm:$0xf0]  ;;  %v3187_v23 = vor.u32 %v3941_v20, %v3186_v18  ;;  %v3114_v28 = vld [vmem:[%s4335_s23 + $0x10] sm:$0xf] }
  0x32   : > { %591 = vadd.xlane.f32.xlu1 %v590_v15  ;;  %v3199_v15 = vor.u32 %v3942_v13, %v3196_v14  ;;  %v3127_v24 = vor.u32 %v3924_v21, %v3124_v22  ;;  %v3940_v25 = vld [vmem:[%s4335_s23 + $0xa4] sm:$0xf]  ;;  %v3188_v26 = vld [vmem:[%s4335_s23 + $0xa8] sm:$0xf0]  ;;  %v3923_v29 = vld [vmem:[%s4335_s23 + $0x14] sm:$0xf0] }
  0x33   : > { %886 = vmatpush.bf16.msra.mxu3 %v3207_v63  ;;  %v3191_v27 = vor.u32 %v3940_v25, %v3188_v26  ;;  %v3178_v30 = vld [vmem:[%s4335_s23 + $0x90] sm:$0xf]  ;;  %v3115_v31 = vor.u32 %v3923_v29, %v3114_v28  ;;  %v3939_v32 = vld [vmem:[%s4335_s23 + $0x94] sm:$0xf0]  ;;  %v3922_v33 = vld [vmem:[%s4335_s23 + $0x14] sm:$0xf] }
  0x34   : > { %845 = vmatpush.bf16.msra.mxu0 %v3131_v3  ;;  %v3116_v34 = vld [vmem:[%s4335_s23 + $0x18] sm:$0xf0]  ;;  %v3179_v35 = vor.u32 %v3939_v32, %v3178_v30  ;;  %v3938_v37 = vld [vmem:[%s4335_s23 + $0x94] sm:$0xf]  ;;  %v3106_v40 = vld [vmem:[%s4335_s23] sm:$0xf] }
  0x35   : > { %859 = vmatpush.bf16.msra.mxu1 %v3195_v11  ;;  %873 = vmatpush.bf16.msra.mxu2 %v3135_v12  ;;  %v3119_v36 = vor.u32 %v3922_v33, %v3116_v34  ;;  %v3180_v38 = vld [vmem:[%s4335_s23 + $0x98] sm:$0xf0]  ;;  %v3921_v41 = vld [vmem:[%s4335_s23 + $0x4] sm:$0xf0]  ;;  %v3170_v42 = vld [vmem:[%s4335_s23 + $0x80] sm:$0xf] }
  0x36   : > { %v3183_v39 = vor.u32 %v3938_v37, %v3180_v38  ;;  %v3107_v43 = vor.u32 %v3921_v41, %v3106_v40  ;;  %v3937_v44 = vld [vmem:[%s4335_s23 + $0x84] sm:$0xf0]  ;;  %v3920_v45 = vld [vmem:[%s4335_s23 + $0x4] sm:$0xf]  ;;  %v3108_v46 = vld [vmem:[%s4335_s23 + $0x8] sm:$0xf0] }
  0x37   : > { %887 = vmatpush.bf16.msra.mxu3 %v3199_v15  ;;  %v3171_v47 = vor.u32 %v3937_v44, %v3170_v42  ;;  %v3111_v48 = vor.u32 %v3920_v45, %v3108_v46  ;;  %v3936_v49 = vld [vmem:[%s4335_s23 + $0x84] sm:$0xf]  ;;  %v3172_v50 = vld [vmem:[%s4335_s23 + $0x88] sm:$0xf0]  ;;  %v3306_v51 = vld [vmem:[%s4340_s26 + $0x70] sm:$0xf] }
  0x38   : > { %846 = vmatpush.bf16.msra.mxu0 %v3123_v19  ;;  %v3175_v52 = vor.u32 %v3936_v49, %v3172_v50  ;;  %v3967_v53 = vld [vmem:[%s4340_s26 + $0x74] sm:$0xf0]  ;;  %v3370_v54 = vld [vmem:[%s4340_s26 + $0xf0] sm:$0xf]  ;;  %v3966_v58 = vld [vmem:[%s4340_s26 + $0x74] sm:$0xf] }
  0x39   : > { %860 = vmatpush.bf16.msra.mxu1 %v3187_v23  ;;  %874 = vmatpush.bf16.msra.mxu2 %v3127_v24  ;;  %v3983_v55 = vld [vmem:[%s4340_s26 + $0xf4] sm:$0xf0]  ;;  %v3307_v56 = vor.u32 %v3967_v53, %v3306_v51  ;;  %v3308_v59 = vld [vmem:[%s4340_s26 + $0x78] sm:$0xf0]  ;;  %v3982_v60 = vld [vmem:[%s4340_s26 + $0xf4] sm:$0xf] }
  0x3a   : > { %v3371_v57 = vor.u32 %v3983_v55, %v3370_v54  ;;  %v3311_v62 = vor.u32 %v3966_v58, %v3308_v59  ;;  %v3372_v63 = vld [vmem:[%s4340_s26 + $0xf8] sm:$0xf0]  ;;  %v3298_v0 = vld [vmem:[%s4340_s26 + $0x60] sm:$0xf]  ;;  %v3965_v1 = vld [vmem:[%s4340_s26 + $0x64] sm:$0xf0] }
  0x3b   : > { %888 = vmatpush.bf16.msra.mxu3 %v3191_v27  ;;  %v3375_v3 = vor.u32 %v3982_v60, %v3372_v63  ;;  %v3299_v6 = vor.u32 %v3965_v1, %v3298_v0  ;;  %v3362_v7 = vld [vmem:[%s4340_s26 + $0xe0] sm:$0xf]  ;;  %v3981_v8 = vld [vmem:[%s4340_s26 + $0xe4] sm:$0xf0]  ;;  %v3964_v13 = vld [vmem:[%s4340_s26 + $0x64] sm:$0xf] }
  0x3c   : > { %847 = vmatpush.bf16.msra.mxu0 %v3115_v31  ;;  %v3363_v12 = vor.u32 %v3981_v8, %v3362_v7  ;;  %v3300_v14 = vld [vmem:[%s4340_s26 + $0x68] sm:$0xf0]  ;;  %v3980_v15 = vld [vmem:[%s4340_s26 + $0xe4] sm:$0xf]  ;;  %v3290_v19 = vld [vmem:[%s4340_s26 + $0x50] sm:$0xf] }
  0x3d   : > { %861 = vmatpush.bf16.msra.mxu1 %v3179_v35  ;;  %875 = vmatpush.bf16.msra.mxu2 %v3119_v36  ;;  %v3364_v18 = vld [vmem:[%s4340_s26 + $0xe8] sm:$0xf0]  ;;  %v3303_v20 = vor.u32 %v3964_v13, %v3300_v14  ;;  %v3963_v22 = vld [vmem:[%s4340_s26 + $0x54] sm:$0xf0]  ;;  %v3354_v23 = vld [vmem:[%s4340_s26 + $0xd0] sm:$0xf] }
  0x3e   : > { %v3367_v21 = vor.u32 %v3980_v15, %v3364_v18  ;;  %v3979_v24 = vld [vmem:[%s4340_s26 + $0xd4] sm:$0xf0]  ;;  %v3291_v26 = vor.u32 %v3963_v22, %v3290_v19  ;;  %v3962_v28 = vld [vmem:[%s4340_s26 + $0x54] sm:$0xf]  ;;  %v3292_v29 = vld [vmem:[%s4340_s26 + $0x58] sm:$0xf0] }
  0x3f   : > { %889 = vmatpush.bf16.msra.mxu3 %v3183_v39  ;;  %v3355_v27 = vor.u32 %v3979_v24, %v3354_v23  ;;  %v3978_v30 = vld [vmem:[%s4340_s26 + $0xd4] sm:$0xf]  ;;  %v3295_v31 = vor.u32 %v3962_v28, %v3292_v29  ;;  %v3356_v32 = vld [vmem:[%s4340_s26 + $0xd8] sm:$0xf0]  ;;  %v3282_v33 = vld [vmem:[%s4340_s26 + $0x40] sm:$0xf] }
  0x40   : > { %848 = vmatpush.bf16.msra.mxu0 %v3107_v43  ;;  %v3961_v34 = vld [vmem:[%s4340_s26 + $0x44] sm:$0xf0]  ;;  %v3359_v36 = vor.u32 %v3978_v30, %v3356_v32  ;;  %v3346_v37 = vld [vmem:[%s4340_s26 + $0xc0] sm:$0xf]  ;;  %v3960_v40 = vld [vmem:[%s4340_s26 + $0x44] sm:$0xf] }
  0x41   : > { %862 = vmatpush.bf16.msra.mxu1 %v3171_v47  ;;  %876 = vmatpush.bf16.msra.mxu2 %v3111_v48  ;;  %v3977_v38 = vld [vmem:[%s4340_s26 + $0xc4] sm:$0xf0]  ;;  %v3284_v41 = vld [vmem:[%s4340_s26 + $0x48] sm:$0xf0]  ;;  %v3976_v42 = vld [vmem:[%s4340_s26 + $0xc4] sm:$0xf]  ;;  %v3283_v45 = vor.u32 %v3961_v34, %v3282_v33 }
  0x42   : > { %v3347_v46 = vor.u32 %v3977_v38, %v3346_v37  ;;  %v3348_v47 = vld [vmem:[%s4340_s26 + $0xc8] sm:$0xf0]  ;;  %v3287_v49 = vor.u32 %v3960_v40, %v3284_v41  ;;  %v3274_v53 = vld [vmem:[%s4340_s26 + $0x30] sm:$0xf]  ;;  %v3959_v54 = vld [vmem:[%s4340_s26 + $0x34] sm:$0xf0] }
  0x43   : > { %890 = vmatpush.bf16.msra.mxu3 %v3175_v52  ;;  %v3351_v50 = vor.u32 %v3976_v42, %v3348_v47  ;;  %v3338_v55 = vld [vmem:[%s4340_s26 + $0xb0] sm:$0xf]  ;;  %v3975_v58 = vld [vmem:[%s4340_s26 + $0xb4] sm:$0xf0]  ;;  %v3958_v59 = vld [vmem:[%s4340_s26 + $0x34] sm:$0xf] }
  0x44   : > { %1111 = vmatpush.bf16.msrb.mxu0 %v3307_v56  ;;  %v3276_v60 = vld [vmem:[%s4340_s26 + $0x38] sm:$0xf0]  ;;  %v3974_v63 = vld [vmem:[%s4340_s26 + $0xb4] sm:$0xf]  ;;  %v3266_v1 = vld [vmem:[%s4340_s26 + $0x20] sm:$0xf] }
  0x45   : > { %1130 = vmatpush.bf16.msrb.mxu1 %v3371_v57  ;;  %1149 = vmatpush.bf16.msrb.mxu2 %v3311_v62  ;;  %v3275_v57 = vor.u32 %v3959_v54, %v3274_v53  ;;  %v3279_v62 = vor.u32 %v3958_v59, %v3276_v60  ;;  %v3340_v0 = vld [vmem:[%s4340_s26 + $0xb8] sm:$0xf0]  ;;  %v3957_v7 = vld [vmem:[%s4340_s26 + $0x24] sm:$0xf0]  ;;  %v3330_v8 = vld [vmem:[%s4340_s26 + $0xa0] sm:$0xf] }
  0x46   : > { %v3973_v13 = vld [vmem:[%s4340_s26 + $0xa4] sm:$0xf0]  ;;  %v3956_v14 = vld [vmem:[%s4340_s26 + $0x24] sm:$0xf]  ;;  %v3268_v15 = vld [vmem:[%s4340_s26 + $0x28] sm:$0xf0] }
  0x47   : > { %1168 = vmatpush.bf16.msrb.mxu3 %v3375_v3  ;;  %v3331_v18 = vor.u32 %v3973_v13, %v3330_v8  ;;  %v3972_v19 = vld [vmem:[%s4340_s26 + $0xa4] sm:$0xf]  ;;  %v3258_v23 = vld [vmem:[%s4340_s26 + $0x10] sm:$0xf]  ;;  %v3955_v24 = vld [vmem:[%s4340_s26 + $0x14] sm:$0xf0] }
  0x48   : > { %1112 = vmatpush.bf16.msrb.mxu0 %v3299_v6  ;;  %v3343_v6 = vor.u32 %v3974_v63, %v3340_v0  ;;  %v3954_v28 = vld [vmem:[%s4340_s26 + $0x14] sm:$0xf]  ;;  %v3259_v29 = vor.u32 %v3955_v24, %v3258_v23  ;;  %v3324_v33 = vld [vmem:[%s4340_s26 + $0x98] sm:$0xf0]  ;;  %v3953_v37 = vld [vmem:[%s4340_s26 + $0x4] sm:$0xf0] }
  0x49   : > { %1131 = vmatpush.bf16.msrb.mxu1 %v3363_v12  ;;  %1150 = vmatpush.bf16.msrb.mxu2 %v3303_v20  ;;  %v3267_v12 = vor.u32 %v3957_v7, %v3266_v1  ;;  %v3332_v20 = vld [vmem:[%s4340_s26 + $0xa8] sm:$0xf0]  ;;  %v3970_v32 = vld [vmem:[%s4340_s26 + $0x94] sm:$0xf]  ;;  %v3969_v40 = vld [vmem:[%s4340_s26 + $0x84] sm:$0xf0] }
  0x4a   : > { %v3335_v22 = vor.u32 %v3972_v19, %v3332_v20  ;;  %v3327_v38 = vor.u32 %v3970_v32, %v3324_v33  ;;  %v3952_v41 = vld [vmem:[%s4340_s26 + $0x4] sm:$0xf]  ;;  %v4561_v59 = vld [vmem:[%s4365_s27 + $0x8] sm:$0xff]  ;;  %v3434_v19 = vld [vmem:[%s4345_s29 + $0x70] sm:$0xf] }
  0x4b   : > { %1169 = vmatpush.bf16.msrb.mxu3 %v3367_v21  ;;  %v3271_v21 = vor.u32 %v3956_v14, %v3268_v15  ;;  %v634_v1 = vperm.slane %v4561_v59, 0  ;;  %v3999_v20 = vld [vmem:[%s4345_s29 + $0x74] sm:$0xf0]  ;;  %v3997_v23 = vld [vmem:[%s4345_s29 + $0x64] sm:$0xf0] }
  0x4c   : > { %1113 = vmatpush.bf16.msrb.mxu0 %v3291_v26  ;;  %v3322_v26 = vld [vmem:[%s4340_s26 + $0x90] sm:$0xf]  ;;  %v3410_v32 = vld [vmem:[%s4345_s29 + $0x40] sm:$0xf]  ;;  %v3993_v33 = vld [vmem:[%s4345_s29 + $0x44] sm:$0xf0] }
  0x4d   : > { %1132 = vmatpush.bf16.msrb.mxu1 %v3355_v27  ;;  %1151 = vmatpush.bf16.msrb.mxu2 %v3295_v31  ;;  %v3971_v27 = vld [vmem:[%s4340_s26 + $0x94] sm:$0xf0]  ;;  %v3260_v31 = vld [vmem:[%s4340_s26 + $0x18] sm:$0xf0] }
  0x4e   : > { %v3323_v30 = vor.u32 %v3971_v27, %v3322_v26  ;;  %v3995_v26 = vld [vmem:[%s4345_s29 + $0x54] sm:$0xf0]  ;;  %v3234_v27 = vld [vmem:[%s5141_s1] sm:$0xf] }
  0x4f   : > { %1170 = vmatpush.bf16.msrb.mxu3 %v3359_v36  ;;  %v3250_v36 = vld [vmem:[%s4340_s26] sm:$0xf] }
  0x50   : > { %1114 = vmatpush.bf16.msrb.mxu0 %v3283_v45  ;;  %v3252_v45 = vld [vmem:[%s4340_s26 + $0x8] sm:$0xf0]  ;;  %v3251_v47 = vor.u32 %v3953_v37, %v3250_v36  ;;  %v3411_v36 = vor.u32 %v3993_v33, %v3410_v32  ;;  %v3242_v37 = vld [vmem:[%s5141_s1 + $0x10] sm:$0xf] }
  0x51   : > { %1133 = vmatpush.bf16.msrb.mxu1 %v3347_v46  ;;  %1152 = vmatpush.bf16.msrb.mxu2 %v3287_v49  ;;  %v3968_v46 = vld [vmem:[%s4340_s26 + $0x84] sm:$0xf]  ;;  %v3316_v49 = vld [vmem:[%s4340_s26 + $0x88] sm:$0xf0] }
  0x52   : > { %v3319_v54 = vor.u32 %v3968_v46, %v3316_v49  ;;  %v3991_v46 = vld [vmem:[%s4345_s29 + $0x34] sm:$0xf0]  ;;  %v3989_v49 = vld [vmem:[%s4345_s29 + $0x24] sm:$0xf0] }
  0x53   : > { %1171 = vmatpush.bf16.msrb.mxu3 %v3351_v50 }
  0x54   : > { %1115 = vmatpush.bf16.msrb.mxu0 %v3275_v57  ;;  %v4557_v57 = vld [vmem:[%s4365_s27] sm:$0xff] }
  0x55   : > { %1153 = vmatpush.bf16.msrb.mxu2 %v3279_v62  ;;  %v633_v63 = vperm.slane %v4557_v57, 0 }
  0x57   : > { %1172 = vmatpush.bf16.msrb.mxu3 %v3343_v6 }
  0x58   : > { %1116 = vmatpush.bf16.msrb.mxu0 %v3267_v12 }
  0x59   : > { %1154 = vmatpush.bf16.msrb.mxu2 %v3271_v21  ;;  %v3426_v21 = vld [vmem:[%s4345_s29 + $0x60] sm:$0xf] }
  0x5a   : > { %v3427_v24 = vor.u32 %v3997_v23, %v3426_v21 }
  0x5b   : > { %1173 = vmatpush.bf16.msrb.mxu3 %v3335_v22  ;;  %v3435_v22 = vor.u32 %v3999_v20, %v3434_v19 }
  0x5c   : > { %1117 = vmatpush.bf16.msrb.mxu0 %v3259_v29  ;;  %v3917_v29 = vld [vmem:[%s5141_s1 + $0x4] sm:$0xf0] }
  0x5f   : > { %1174 = vmatpush.bf16.msrb.mxu3 %v3327_v38  ;;  %v3919_v38 = vld [vmem:[%s5141_s1 + $0x14] sm:$0xf0] }
  0x60   : > { %1118 = vmatpush.bf16.msrb.mxu0 %v3251_v47 }
  0x63   : > { %1175 = vmatpush.bf16.msrb.mxu3 %v3319_v54  ;;  %v3378_v54 = vld [vmem:[%s4345_s29] sm:$0xf] }
  0x9b   : > { %v579_v61 = vpop.xlane.xlu0 %578 }
  0x9c   : > { %v4479_v2 = vmul.f32 0.00390625, %v579_v61  ;;  %v3339_v61 = vor.u32 %v3975_v58, %v3338_v55 }
  0x9d   : > { %v589_v11 = vpop.xlane.xlu1 %588 }
  0x9e   : > { %v595_v16 = vmul.f32 0.00390625, %v589_v11  ;;  %v597_v17 = vmul.f32 %v4479_v2, %v4479_v2  ;;  %1134 = vmatpush.bf16.msrb.mxu1 %v3339_v61  ;;  %v603_v60 = vsub.f32 %v4385_v4, %v4479_v2  ;;  %v604_v61 = vsub.f32 %v4387_v5, %v4479_v2 }
  0x9f   : > { %v639_v5 = vperm.slane %v4557_v57, 1  ;;  %v640_v2 = vperm.slane %v4561_v59, 1 }
  0xa0   : > { %v599_v25 = vsub.f32 %v595_v16, %v597_v17 }
  0xa2   : > { %v601_v35 = vmax.f32 %v599_v25, 0.0  ;;  %1135 = vmatpush.bf16.msrb.mxu1 %v3331_v18 }
  0xa3   : > { %v582_v39 = vpop.xlane.xlu0 %581 }
  0xa4   : > { %v4504_v43 = vadd.f32 1e-05, %v601_v35  ;;  %v4506_v44 = vmul.f32 0.00390625, %v582_v39  ;;  %v3263_v35 = vor.u32 %v3954_v28, %v3260_v31  ;;  %v3314_v39 = vld [vmem:[%s4340_s26 + $0x80] sm:$0xf] }
  0xa5   : > { %v592_v48 = vpop.xlane.xlu1 %591  ;;  %v3236_v31 = vld [vmem:[%s5141_s1 + $0x8] sm:$0xf0] }
  0xa6   : > { %4148 = vrsqrt.f32 %v4504_v43  ;;  %v596_v51 = vmul.f32 0.00390625, %v592_v48  ;;  %v598_v52 = vmul.f32 %v4506_v44, %v4506_v44  ;;  %1136 = vmatpush.bf16.msrb.mxu1 %v3323_v30  ;;  %v3315_v48 = vor.u32 %v3969_v40, %v3314_v39  ;;  %1155 = vmatpush.bf16.msrb.mxu2 %v3263_v35  ;;  %v3916_v30 = vld [vmem:[%s5141_s1 + $0x4] sm:$0xf]  ;;  %v3918_v39 = vld [vmem:[%s5141_s1 + $0x14] sm:$0xf] }
  0xa7   : > { %vm615_vm1 = vweird.f32 %v4504_v43  ;;  %v605_v6 = vsub.f32 %v4395_v9, %v4506_v44  ;;  %v606_v4 = vsub.f32 %v4397_v10, %v4506_v44  ;;  %v4598_v35 = vor.u32 %v3916_v30, %v3236_v31  ;;  %v3244_v40 = vld [vmem:[%s5141_s1 + $0x18] sm:$0xf0] }
  0xa8   : > { %v600_v56 = vsub.f32 %v596_v51, %v598_v52  ;;  %v3255_v51 = vor.u32 %v3952_v41, %v3252_v45  ;;  %v4616_v41 = vor.u32 %v3919_v38, %v3242_v37  ;;  %v3402_v45 = vld [vmem:[%s4345_s29 + $0x30] sm:$0xf]  ;;  %v3436_v30 = vld [vmem:[%s4345_s29 + $0x78] sm:$0xf0] }
  0xa9   : > { %v3403_v47 = vor.u32 %v3991_v46, %v3402_v45  ;;  %v3996_v45 = vld [vmem:[%s4345_s29 + $0x64] sm:$0xf] }
  0xaa   : > { %v602_v3 = vmax.f32 %v600_v56, 0.0  ;;  %1137 = vmatpush.bf16.msrb.mxu1 %v3315_v48  ;;  %1156 = vmatpush.bf16.msrb.mxu2 %v3255_v51  ;;  %v3394_v48 = vld [vmem:[%s4345_s29 + $0x20] sm:$0xf]  ;;  %v3386_v51 = vld [vmem:[%s4345_s29 + $0x10] sm:$0xf] }
  0xac   : > { %v4523_v11 = vpop.eup %4148  ;;  %v4530_v17 = vadd.f32 1e-05, %v602_v3 }
  0xad   : > { %v610_v16 = vmul.f32 %v4523_v11, %v4504_v43  ;;  %vm616_vm0 = vweird.f32 %v4523_v11 }
  0xae   : > { %4150 = vrsqrt.f32 %v4530_v17  ;;  %vm617_vm2 = vmor %vm615_vm1, %vm616_vm0  ;;  %vm625_vm4 = vweird.f32 %v4530_v17 }
  0xaf   : > { %v611_v25 = vmul.f32 %v4523_v11, %v610_v16 }
  0xb1   : > { %v612_v34 = vmul.f32 0.5, %v611_v25  ;;  %v3418_v25 = vld [vmem:[%s4345_s29 + $0x50] sm:$0xf] }
  0xb2   : > { %v3419_v28 = vor.u32 %v3995_v26, %v3418_v25 }
  0xb3   : > { %v613_v42 = vsub.f32 1.5, %v612_v34  ;;  %v4596_v34 = vor.u32 %v3917_v29, %v3234_v27  ;;  %v3998_v29 = vld [vmem:[%s4345_s29 + $0x74] sm:$0xf] }
  0xb4   : > { %v4151_v50 = vpop.eup %4150 }
  0xb5   : > { %v620_v52 = vmul.f32 %v4151_v50, %v4530_v17  ;;  %v614_v53 = vmul.f32 %v4523_v11, %v613_v42  ;;  %vm626_vm3 = vweird.f32 %v4151_v50  ;;  %v4618_v42 = vor.u32 %v3918_v39, %v3244_v40  ;;  %v4014_v39 = vld [vmem:[%s4345_s29 + $0xf4] sm:$0xf]  ;;  %v3500_v40 = vld [vmem:[%s4345_s29 + $0xf8] sm:$0xf0] }
  0xb6   : > { %vm627_vm5 = vmor %vm625_vm4, %vm626_vm3 }
  0xb7   : > { %v621_v55 = vmul.f32 %v4151_v50, %v620_v52  ;;  %v618_v58 = vsel %vm617_vm2, %v4523_v11, %v614_v53  ;;  %v3987_v52 = vld [vmem:[%s4345_s29 + $0x14] sm:$0xf0] }
  0xb8   : > { %v629_v62 = vmul.f32 %v618_v58, %v603_v60  ;;  %v630_v0 = vmul.f32 %v618_v58, %v604_v61  ;;  %v3387_v53 = vor.u32 %v3987_v52, %v3386_v51  ;;  %v679_v61 = vperm.slane %v4557_v57, 2 }
  0xb9   : > { %v622_v56 = vmul.f32 0.5, %v621_v55  ;;  %v3985_v55 = vld [vmem:[%s4345_s29 + $0x4] sm:$0xf0] }
  0xba   : > { %v635_v11 = vmul.f32 %v633_v63, %v629_v62  ;;  %v636_v13 = vmul.f32 %v634_v1, %v630_v0 }
  0xbb   : > { %v623_v43 = vsub.f32 1.5, %v622_v56  ;;  %v3379_v56 = vor.u32 %v3985_v55, %v3378_v54 }
  0xbc   : > { %v641_v9 = vadd.f32 %v639_v5, %v635_v11  ;;  %v642_v10 = vadd.f32 %v640_v2, %v636_v13 }
  0xbd   : > { %v624_v3 = vmul.f32 %v4151_v50, %v623_v43  ;;  %v680_v43 = vperm.slane %v4561_v59, 2 }
  0xbf   : > { %v628_v7 = vsel %vm627_vm5, %v4151_v50, %v624_v3  ;;  %v3395_v50 = vor.u32 %v3989_v49, %v3394_v48  ;;  %v3428_v48 = vld [vmem:[%s4345_s29 + $0x68] sm:$0xf0]  ;;  %v4012_v49 = vld [vmem:[%s4345_s29 + $0xe4] sm:$0xf] }
  0xc0   : > { %v631_v8 = vmul.f32 %v628_v7, %v605_v6  ;;  %v632_v12 = vmul.f32 %v628_v7, %v606_v4  ;;  %v3431_v52 = vor.u32 %v3996_v45, %v3428_v48  ;;  %v4011_v45 = vld [vmem:[%s4345_s29 + $0xd4] sm:$0xf0]  ;;  %v3404_v48 = vld [vmem:[%s4345_s29 + $0x38] sm:$0xf0] }
  0xc2   : > { %v637_v14 = vmul.f32 %v633_v63, %v631_v8  ;;  %v638_v15 = vmul.f32 %v634_v1, %v632_v12 }
  0xc4   : > { %v643_v16 = vadd.f32 %v639_v5, %v637_v14  ;;  %v644_v44 = vadd.f32 %v640_v2, %v638_v15  ;;  %v4644_v15 = vperm.slane %v4557_v57, 3 }
  0xc6   : > { %v645_v17 = vpack.c.bf16 %v643_v16, %v641_v9  ;;  %v646_v18 = vpack.c.bf16 %v644_v44, %v642_v10  ;;  %v4647_v9 = vperm.slane %v4561_v59, 3 }
  0xc8   : > { %849 = vmatmul.bf16.vlgmr.msra.gmra.mxu0 %v645_v17  ;;  %863 = vmatmul.bf16.vlgmr.msra.gmra.mxu1 %v646_v18 }
  0xc9   : > { %877 = vmatmul.bf16.vlgmr.msra.gmra.mxu2 %v645_v17  ;;  %891 = vmatmul.bf16.vlgmr.msra.gmra.mxu3 %v646_v18 }
  0xca   : > { %1381 = vmatpush.bf16.msra.mxu0 %v3435_v22 }
  0xce   : > { %1382 = vmatpush.bf16.msra.mxu0 %v3427_v24 }
  0xd2   : > { %1383 = vmatpush.bf16.msra.mxu0 %v3419_v28 }
  0xd6   : > { %1384 = vmatpush.bf16.msra.mxu0 %v3411_v36  ;;  %v3439_v36 = vor.u32 %v3998_v29, %v3436_v30 }
  0xd8   : > { %1119 = vmatmul.bf16.vlgmr.msrb.gmra.mxu0 %v4596_v34  ;;  %1138 = vmatmul.bf16.vlgmr.msrb.gmra.mxu1 %v4598_v35 }
  0xd9   : > { %1157 = vmatmul.bf16.vlgmr.msrb.gmra.mxu2 %v4596_v34  ;;  %1176 = vmatmul.bf16.vlgmr.msrb.gmra.mxu3 %v4598_v35 }
  0xda   : > { %1385 = vmatpush.bf16.msra.mxu0 %v3403_v47  ;;  %1419 = vmatpush.bf16.msra.mxu2 %v3439_v36  ;;  %v3503_v47 = vor.u32 %v4014_v39, %v3500_v40  ;;  %v3482_v40 = vld [vmem:[%s4345_s29 + $0xd0] sm:$0xf] }
  0xdc   : > { %1438 = vmatpush.bf16.msra.mxu3 %v3503_v47 }
  0xde   : > { %1386 = vmatpush.bf16.msra.mxu0 %v3395_v50  ;;  %v3492_v50 = vld [vmem:[%s4345_s29 + $0xe8] sm:$0xf0]  ;;  %1420 = vmatpush.bf16.msra.mxu2 %v3431_v52  ;;  %v3474_v52 = vld [vmem:[%s4345_s29 + $0xc0] sm:$0xf] }
  0xe2   : > { %1387 = vmatpush.bf16.msra.mxu0 %v3387_v53 }
  0xe6   : > { %1388 = vmatpush.bf16.msra.mxu0 %v3379_v56 }
  0xe8   : > { %1124 = vmatmul.bf16.gmra.mxu0 %v4616_v41  ;;  %1143 = vmatmul.bf16.gmra.mxu1 %v4618_v42 }
  0xe9   : > { %1162 = vmatmul.bf16.gmra.mxu2 %v4616_v41  ;;  %1181 = vmatmul.bf16.gmra.mxu3 %v4618_v42 }
  0xf8   : > { %1389 = vmatmul.bf16.vlgmr.msra.gmra.mxu0 %v4596_v34 }
 0x108   : > { %1394 = vmatmul.bf16.gmra.mxu0 %v4616_v41 }
 0x145   : > { %v850_v58 = vpop.f32.mrf.mxu0  ;;  %v864_v60 = vpop.f32.mrf.mxu1 }
 0x146   : > { %v851_v62 = vadd.f32 %v850_v58, %v679_v61 }
 0x148   : > { %v865_v4 = vadd.f32 %v864_v60, %v851_v62  ;;  %v3495_v62 = vor.u32 %v4012_v49, %v3492_v50  ;;  %v4006_v50 = vld [vmem:[%s4345_s29 + $0xb4] sm:$0xf] }
 0x14a   : > { %1439 = vmatpush.bf16.msra.mxu3 %v3495_v62  ;;  %v4004_v62 = vld [vmem:[%s4345_s29 + $0xa4] sm:$0xf] }
 0x14c   : > { %v878_v63 = vpop.f32.mrf.mxu2  ;;  %v892_v0 = vpop.f32.mrf.mxu3 }
 0x14d   : > { %v879_v1 = vadd.f32 %v878_v63, %v680_v43  ;;  %v852_v3 = vpop.f32.mrf.mxu0  ;;  %v866_v6 = vpop.f32.mrf.mxu1 }
 0x14e   : > { %v853_v28 = vadd.f32 %v852_v3, %v679_v61 }
 0x14f   : > { %v893_v7 = vadd.f32 %v892_v0, %v879_v1 }
 0x150   : > { %v867_v51 = vadd.f32 %v866_v6, %v853_v28  ;;  %v3498_v6 = vld [vmem:[%s4345_s29 + $0xf0] sm:$0xf] }
 0x151   : > { %v4636_v5 = vpack.c.bf16 %v893_v7, %v865_v4  ;;  %v4015_v4 = vld [vmem:[%s4345_s29 + $0xf4] sm:$0xf0]  ;;  %v3994_v7 = vld [vmem:[%s4345_s29 + $0x54] sm:$0xf] }
 0x153   : > { %v1617_v2 = vunpack.c.h.b16 %v4636_v5 }
 0x154   : > { %v880_v8 = vpop.f32.mrf.mxu2  ;;  %v894_v11 = vpop.f32.mrf.mxu3 }
 0x155   : > { %v1120_v12 = vpop.f32.mrf.mxu0  ;;  %v4639_v13 = vpack.c.b16 %v1617_v2, %v1617_v2  ;;  %v1139_v14 = vpop.f32.mrf.mxu1  ;;  %v881_v23 = vadd.f32 %v880_v8, %v680_v43 }
 0x156   : > { %v1121_v17 = vadd.f32 %v1120_v12, %v4644_v15  ;;  %v3420_v12 = vld [vmem:[%s4345_s29 + $0x58] sm:$0xf0] }
 0x157   : > { %1687 = vrot.lane.b32.xlu1 %v4639_v13, %s4250_s22  ;;  %v895_v37 = vadd.f32 %v894_v11, %v881_v23  ;;  %v3499_v11 = vor.u32 %v4015_v4, %v3498_v6  ;;  %v3490_v23 = vld [vmem:[%s4345_s29 + $0xe0] sm:$0xf]  ;;  %v3986_v6 = vld [vmem:[%s4345_s29 + $0x14] sm:$0xf]  ;;  %v3388_v4 = vld [vmem:[%s4345_s29 + $0x18] sm:$0xf0] }
 0x158   : > { %v1140_v20 = vadd.f32 %v1139_v14, %v1121_v17  ;;  %v4010_v17 = vld [vmem:[%s4345_s29 + $0xd4] sm:$0xf] }
 0x159   : > { %v4661_v58 = vpack.c.bf16 %v895_v37, %v867_v51  ;;  %1400 = vmatpush.bf16.msra.mxu1 %v3499_v11  ;;  %v3468_v51 = vld [vmem:[%s4345_s29 + $0xb8] sm:$0xf0] }
 0x15c   : > { %v1158_v16 = vpop.f32.mrf.mxu2  ;;  %v1177_v10 = vpop.f32.mrf.mxu3 }
 0x15d   : > { %v1122_v44 = vpop.f32.mrf.mxu0  ;;  %v1159_v18 = vadd.f32 %v1158_v16, %v4647_v9  ;;  %v1141_v19 = vpop.f32.mrf.mxu1  ;;  %v1906_v16 = vunpack.c.h.b16 %v4661_v58 }
 0x15e   : > { %v1123_v22 = vadd.f32 %v1122_v44, %v4644_v15  ;;  %v3423_v44 = vor.u32 %v3994_v7, %v3420_v12 }
 0x15f   : > { %v1178_v21 = vadd.f32 %v1177_v10, %v1159_v18  ;;  %v1542_v10 = vunpack.c.l.b16 %v4636_v5  ;;  %v3484_v18 = vld [vmem:[%s4345_s29 + $0xd8] sm:$0xf0]  ;;  %v4682_v30 = vpack.c.b16 %v1906_v16, %v1906_v16 }
 0x160   : > { %v1142_v32 = vadd.f32 %v1141_v19, %v1123_v22  ;;  %1421 = vmatpush.bf16.msra.mxu2 %v3423_v44  ;;  %v3452_v44 = vld [vmem:[%s4345_s29 + $0x98] sm:$0xf0] }
 0x161   : > { %v1459_v31 = vpack.c.bf16 %v1178_v21, %v1140_v20  ;;  %v3487_v21 = vor.u32 %v4010_v17, %v3484_v18  ;;  %v1832_v17 = vunpack.c.l.b16 %v4661_v58 }
 0x163   : > { %v1619_v53 = vunpack.c.h.b16 %v1459_v31  ;;  %v1469_v55 = vunpack.c.l.b16 %v1459_v31  ;;  %v1543_v31 = vpack.c.b16 %v1542_v10, %v1542_v10  ;;  %1440 = vmatpush.bf16.msra.mxu3 %v3487_v21  ;;  %v4002_v10 = vld [vmem:[%s4345_s29 + $0x94] sm:$0xf]  ;;  %v4005_v21 = vld [vmem:[%s4345_s29 + $0xa4] sm:$0xf0] }
 0x164   : > { %v1160_v24 = vpop.f32.mrf.mxu2  ;;  %v1179_v25 = vpop.f32.mrf.mxu3  ;;  %v3455_v18 = vor.u32 %v4002_v10, %v3452_v44 }
 0x165   : > { %v1161_v26 = vadd.f32 %v1160_v24, %v4647_v9  ;;  %v1125_v27 = vpop.f32.mrf.mxu0  ;;  %v1144_v38 = vpop.f32.mrf.mxu1  ;;  %v4013_v24 = vld [vmem:[%s4345_s29 + $0xe4] sm:$0xf0] }
 0x166   : > { %v1126_v60 = vadd.f32 %v1125_v27, %v4644_v15  ;;  %v3412_v27 = vld [vmem:[%s4345_s29 + $0x48] sm:$0xf0] }
 0x167   : > { %v1180_v33 = vadd.f32 %v1179_v25, %v1161_v26  ;;  %v3992_v25 = vld [vmem:[%s4345_s29 + $0x44] sm:$0xf]  ;;  %v3491_v26 = vor.u32 %v4013_v24, %v3490_v23  ;;  %v3380_v24 = vld [vmem:[%s4345_s29 + $0x8] sm:$0xf0] }
 0x168   : > { %v1145_v14 = vadd.f32 %v1144_v38, %v1126_v60  ;;  %v3988_v60 = vld [vmem:[%s4345_s29 + $0x24] sm:$0xf] }
 0x169   : > { %v1460_v46 = vpack.c.bf16 %v1180_v33, %v1142_v32  ;;  %v4008_v32 = vld [vmem:[%s4345_s29 + $0xc4] sm:$0xf]  ;;  %v3476_v33 = vld [vmem:[%s4345_s29 + $0xc8] sm:$0xf0]  ;;  %1401 = vmatpush.bf16.msra.mxu1 %v3491_v26 }
 0x16a   : > { %v3479_v39 = vor.u32 %v4008_v32, %v3476_v33  ;;  %v4000_v26 = vld [vmem:[%s4345_s29 + $0x84] sm:$0xf]  ;;  %v4003_v32 = vld [vmem:[%s4345_s29 + $0x94] sm:$0xf0] }
 0x16b   : > { %v1620_v54 = vunpack.c.h.b16 %v1460_v46  ;;  %v1470_v56 = vunpack.c.l.b16 %v1460_v46  ;;  %v3990_v46 = vld [vmem:[%s4345_s29 + $0x34] sm:$0xf] }
 0x16c   : > { %v1163_v61 = vpop.f32.mrf.mxu2  ;;  %v1182_v43 = vpop.f32.mrf.mxu3  ;;  %1441 = vmatpush.bf16.msra.mxu3 %v3479_v39  ;;  %v3407_v49 = vor.u32 %v3990_v46, %v3404_v48  ;;  %v1219_v39 = vperm.slane %v4557_v57, 4 }
 0x16d   : > { %v1164_v63 = vadd.f32 %v1163_v61, %v4647_v9  ;;  %v1621_v0 = vpack.c.b16 %v1620_v54, %v1619_v53  ;;  %v1471_v1 = vpack.c.b16 %v1470_v56, %v1469_v55  ;;  %v1127_v3 = vpop.f32.mrf.mxu0  ;;  %v1146_v22 = vpop.f32.mrf.mxu1  ;;  %v3471_v55 = vor.u32 %v4006_v50, %v3468_v51  ;;  %v4009_v56 = vld [vmem:[%s4345_s29 + $0xc4] sm:$0xf0]  ;;  %v3396_v61 = vld [vmem:[%s4345_s29 + $0x28] sm:$0xf0] }
 0x16e   : > { %v1128_v20 = vadd.f32 %v1127_v3, %v4644_v15  ;;  %v3415_v15 = vor.u32 %v3992_v25, %v3412_v27  ;;  %v4007_v3 = vld [vmem:[%s4345_s29 + $0xb4] sm:$0xf0]  ;;  %v3444_v27 = vld [vmem:[%s4345_s29 + $0x88] sm:$0xf0] }
 0x16f   : > { %1689 = vrot.lane.b32.xlu0 %v1621_v0, %s4250_s22  ;;  %1546 = vrot.lane.b32.xlu2 %v1471_v1, %s4250_s22  ;;  %v1477_v2 = vsel %vm1472_vm6, %v1471_v1, 0  ;;  %v1626_v8 = vsel %vm1472_vm6, %v1621_v0, 0  ;;  %v1183_v19 = vadd.f32 %v1182_v43, %v1164_v63  ;;  %v3399_v43 = vor.u32 %v3988_v60, %v3396_v61  ;;  %v3460_v63 = vld [vmem:[%s4345_s29 + $0xa8] sm:$0xf0]  ;;  %v3466_v0 = vld [vmem:[%s4345_s29 + $0xb0] sm:$0xf] }
 0x170   : > { %1486 = vmatpush.bf16.xpose.msrb.mxu0 %v1477_v2  ;;  %v1147_v38 = vadd.f32 %v1146_v22, %v1128_v20  ;;  %1422 = vmatpush.bf16.msra.mxu2 %v3415_v15  ;;  %v3463_v7 = vor.u32 %v4004_v62, %v3460_v63  ;;  %v3458_v20 = vld [vmem:[%s4345_s29 + $0xa0] sm:$0xf]  ;;  %v3984_v22 = vld [vmem:[%s4345_s29 + $0x4] sm:$0xf]  ;;  %v3450_v15 = vld [vmem:[%s4345_s29 + $0x90] sm:$0xf] }
 0x171   : > { %v1461_v36 = vpack.c.bf16 %v1183_v19, %v1145_v14  ;;  %1442 = vmatpush.bf16.msra.mxu3 %v3471_v55  ;;  %v3391_v14 = vor.u32 %v3986_v6, %v3388_v4  ;;  %v3459_v23 = vor.u32 %v4005_v21, %v3458_v20  ;;  %v3383_v25 = vor.u32 %v3984_v22, %v3380_v24 }
 0x172   : > { %v3451_v33 = vor.u32 %v4003_v32, %v3450_v15 }
 0x173   : > { %v1761_v53 = vunpack.c.l.b16 %v1461_v36  ;;  %v1908_v11 = vunpack.c.h.b16 %v1461_v36  ;;  %v3442_v36 = vld [vmem:[%s4345_s29 + $0x80] sm:$0xf] }
 0x174   : > { %v1165_v28 = vpop.f32.mrf.mxu2  ;;  %v1184_v29 = vpop.f32.mrf.mxu3  ;;  %1423 = vmatpush.bf16.msra.mxu2 %v3407_v49 }
 0x175   : > { %v1166_v37 = vadd.f32 %v1165_v28, %v4647_v9  ;;  %v3483_v9 = vor.u32 %v4011_v45, %v3482_v40  ;;  %1443 = vmatpush.bf16.msra.mxu3 %v3463_v7  ;;  %v1833_v28 = vpack.c.b16 %v1832_v17, %v1832_v17 }
 0x177   : > { %v1185_v47 = vadd.f32 %v1184_v29, %v1166_v37  ;;  %1976 = vrot.lane.b32.xlu0 %v4682_v30, %s4250_s22  ;;  %1544 = vrot.lane.b32.xlu2 %v1543_v31, %s4250_s22  ;;  %v3447_v29 = vor.u32 %v4000_v26, %v3444_v27  ;;  %v4001_v37 = vld [vmem:[%s4345_s29 + $0x84] sm:$0xf0] }
 0x178   : > { %1635 = vmatpush.bf16.xpose.msra.mxu0 %v1626_v8  ;;  %1402 = vmatpush.bf16.msra.mxu1 %v3483_v9  ;;  %v3467_v8 = vor.u32 %v4007_v3, %v3466_v0 }
 0x179   : > { %3504 = vmatmul.msk.bf16.vlgmr.msrb.gmra.mxu0 %vm1472_vm6, %v4636_v5  ;;  %v1462_v54 = vpack.c.bf16 %v1185_v47, %v1147_v38  ;;  %v3475_v5 = vor.u32 %v4009_v56, %v3474_v52  ;;  %1424 = vmatpush.bf16.msra.mxu2 %v3399_v43  ;;  %v3443_v38 = vor.u32 %v4001_v37, %v3442_v36 }
 0x17a   : > { %1444 = vmatpush.bf16.msra.mxu3 %v3455_v18 }
 0x17b   : > { %v1762_v1 = vunpack.c.l.b16 %v1462_v54  ;;  %v1909_v12 = vunpack.c.h.b16 %v1462_v54 }
 0x17c   : > { %1403 = vmatpush.bf16.msra.mxu1 %v3475_v5  ;;  %v1220_v5 = vperm.slane %v4561_v59, 4 }
 0x17d   : > { %v1763_v2 = vpack.c.b16 %v1762_v1, %v1761_v53  ;;  %v1910_v19 = vpack.c.b16 %v1909_v12, %v1908_v11  ;;  %1425 = vmatpush.bf16.msra.mxu2 %v3391_v14 }
 0x17e   : > { %1445 = vmatpush.bf16.msra.mxu3 %v3447_v29 }
 0x17f   : > { %1836 = vrot.lane.b32.xlu2 %v1763_v2, %s4250_s22  ;;  %v1768_v16 = vsel %vm1472_vm6, %v1763_v2, 0  ;;  %v1915_v31 = vsel %vm1472_vm6, %v1910_v19, 0 }
 0x180   : > { %1777 = vmatpush.bf16.xpose.msrb.mxu0 %v1768_v16  ;;  %1404 = vmatpush.bf16.msra.mxu1 %v3467_v8 }
 0x181   : > { %1426 = vmatpush.bf16.msra.mxu2 %v3383_v25  ;;  %1446 = vmatmul.bf16.vlgmr.msra.gmra.mxu3 %v4598_v35 }
 0x184   : > { %1405 = vmatpush.bf16.msra.mxu1 %v3459_v23  ;;  %1427 = vmatmul.bf16.vlgmr.msra.gmra.mxu2 %v4596_v34  ;;  %v1390_v34 = vpop.f32.mrf.mxu0 }
 0x185   : > { %v1391_v60 = vadd.f32 %v1390_v34, %v1219_v39 }
 0x187   : > { %1834 = vrot.lane.b32.xlu2 %v1833_v28, %s4250_s22 }
 0x188   : > { %1406 = vmatpush.bf16.msra.mxu1 %v3451_v33 }
 0x189   : > { %3508 = vmatmul.msk.bf16.vlgmr.msra.gmra.mxu0 %vm1472_vm6, %v4639_v13 }
 0x18a   : > { %1924 = vmatpush.bf16.xpose.msra.mxu0 %v1915_v31 }
 0x18c   : > { %1407 = vmatpush.bf16.msra.mxu1 %v3443_v38  ;;  %v1392_v13 = vpop.f32.mrf.mxu0 }
 0x18d   : > { %v1393_v3 = vadd.f32 %v1392_v13, %v1219_v39 }
 0x18f   : > { %1978 = vrot.lane.b32.xlu2 %v1910_v19, %s4250_s22  ;;  %1408 = vmatmul.bf16.vlgmr.msra.gmra.mxu1 %v4598_v35 }
 0x191   : > { %1451 = vmatmul.bf16.gmra.mxu3 %v4618_v42 }
 0x194   : > { %1432 = vmatmul.bf16.gmra.mxu2 %v4616_v41  ;;  %v1395_v40 = vpop.f32.mrf.mxu0 }
 0x195   : > { %v1396_v45 = vadd.f32 %v1395_v40, %v1219_v39 }
 0x199   : > { %3512 = vmatmul.msk.bf16.vlgmr.msrb.gmra.mxu0 %vm1472_vm6, %v4661_v58 }
 0x19c   : > { %v1397_v58 = vpop.f32.mrf.mxu0 }
 0x19d   : > { %v4740_v47 = vadd.f32 %v1397_v58, %v1219_v39 }
 0x19f   : > { %1413 = vmatmul.bf16.gmra.mxu1 %v4618_v42 }
 0x1a9   : > { %3516 = vmatmul.msk.bf16.vlgmr.msra.gmra.mxu0 %vm1472_vm6, %v4682_v30 }
 0x1c9   : > { %v1547_v46 = vpop.permute.xlu2 %1546  ;;  %v1688_v57 = vpop.permute.xlu1 %1687 }
 0x1ca   : > { %v1552_v35 = vsel %vm1472_vm6, %v1547_v46, 0 }
 0x1cb   : > { %1561 = vmatpush.bf16.xpose.msrb.mxu2 %v1552_v35 }
 0x1d1   : > { %v1545_v41 = vpop.permute.xlu2 %1544 }
 0x1d2   : > { %3506 = vmatmul.msk.bf16.vlgmr.msrb.gmra.mxu2 %vm1472_vm6, %v1545_v41 }
 0x1d9   : > { %v1837_v42 = vpop.permute.xlu2 %1836 }
 0x1da   : > { %v1842_v9 = vsel %vm1472_vm6, %v1837_v42, 0 }
 0x1e1   : > { %v1690_v30 = vpop.permute.xlu0 %1689  ;;  %v1835_v48 = vpop.permute.xlu2 %1834 }
 0x1e2   : > { %v1695_v49 = vsel %vm1472_vm6, %v1690_v30, 0 }
 0x1e3   : > { %1704 = vmatpush.bf16.xpose.msra.mxu2 %v1695_v49 }
 0x1e9   : > { %v1979_v50 = vpop.permute.xlu2 %1978  ;;  %v1977_v55 = vpop.permute.xlu0 %1976 }
 0x1ea   : > { %3510 = vmatmul.msk.bf16.vlgmr.msra.gmra.mxu2 %vm1472_vm6, %v1688_v57  ;;  %v1984_v51 = vsel %vm1472_vm6, %v1979_v50, 0 }
 0x1eb   : > { %1851 = vmatpush.bf16.xpose.msrb.mxu2 %v1842_v9 }
 0x1f3   : > { %1993 = vmatpush.bf16.xpose.msra.mxu2 %v1984_v51 }
 0x1f6   : > { %v4747_v52 = vpop.f32.mrf.mxu0 }
 0x1f7   : > { %v1493_v30 = vsel %vm1492_vm7, %v4747_v52, -inf }
 0x1fa   : > { %3514 = vmatmul.msk.bf16.vlgmr.msrb.gmra.mxu2 %vm1472_vm6, %v1835_v48 }
 0x1fe   : > { %v1490_v53 = vpop.f32.mrf.mxu0 }
 0x204   : > { %v1447_v62 = vpop.f32.mrf.mxu3 }
 0x206   : > { %v4750_v54 = vpop.f32.mrf.mxu0 }
 0x207   : > { %v1428_v56 = vpop.f32.mrf.mxu2 }
 0x208   : > { %v1429_v63 = vadd.f32 %v1428_v56, %v1220_v5  ;;  %v1641_v56 = vsel %vm1492_vm7, %v4750_v54, -inf }
 0x20a   : > { %3518 = vmatmul.msk.bf16.vlgmr.msra.gmra.mxu2 %vm1472_vm6, %v1977_v55  ;;  %v1448_v1 = vadd.f32 %v1447_v62, %v1429_v63 }
 0x20c   : > { %v1409_v43 = vpop.f32.mrf.mxu1  ;;  %v1449_v11 = vpop.f32.mrf.mxu3 }
 0x20d   : > { %v1410_v0 = vadd.f32 %v1409_v43, %v1391_v60 }
 0x20e   : > { %v1639_v61 = vpop.f32.mrf.mxu0 }
 0x20f   : > { %v1430_v6 = vpop.f32.mrf.mxu2  ;;  %v1463_v7 = vpack.c.bf16 %v1448_v1, %v1410_v0 }
 0x210   : > { %v1431_v2 = vadd.f32 %v1430_v6, %v1220_v5 }
 0x211   : > { %v1505_v16 = vunpack.c.l.b16 %v1463_v7  ;;  %v1651_v10 = vunpack.c.h.b16 %v1463_v7 }
 0x212   : > { %v1450_v14 = vadd.f32 %v1449_v11, %v1431_v2 }
 0x214   : > { %v1411_v8 = vpop.f32.mrf.mxu1  ;;  %v1452_v24 = vpop.f32.mrf.mxu3 }
 0x215   : > { %v1412_v12 = vadd.f32 %v1411_v8, %v1393_v3 }
 0x216   : > { %v4754_v4 = vpop.f32.mrf.mxu0 }
 0x217   : > { %v1464_v44 = vpack.c.bf16 %v1450_v14, %v1412_v12  ;;  %v1433_v18 = vpop.f32.mrf.mxu2  ;;  %v1783_v60 = vsel %vm1492_vm7, %v4754_v4, -inf }
 0x218   : > { %v1434_v22 = vadd.f32 %v1433_v18, %v1220_v5 }
 0x219   : > { %v1506_v17 = vunpack.c.l.b16 %v1464_v44  ;;  %v1652_v59 = vunpack.c.h.b16 %v1464_v44 }
 0x21a   : > { %v1453_v26 = vadd.f32 %v1452_v24, %v1434_v22 }
 0x21b   : > { %v1653_v20 = vpack.c.b16 %v1652_v59, %v1651_v10  ;;  %v1507_v21 = vpack.c.b16 %v1506_v17, %v1505_v16 }
 0x21c   : > { %v1414_v23 = vpop.f32.mrf.mxu1  ;;  %v1454_v32 = vpop.f32.mrf.mxu3 }
 0x21d   : > { %1577 = vrot.lane.b32.xlu1 %v1507_v21, %s4250_s22  ;;  %1519 = vmatpush.bf16.msrb.mxu1 %v1507_v21  ;;  %v1415_v25 = vadd.f32 %v1414_v23, %v1396_v45 }
 0x21e   : > { %v1781_v19 = vpop.f32.mrf.mxu0 }
 0x21f   : > { %v1465_v27 = vpack.c.bf16 %v1453_v26, %v1415_v25  ;;  %v1435_v28 = vpop.f32.mrf.mxu2 }
 0x220   : > { %v1436_v31 = vadd.f32 %v1435_v28, %v1220_v5 }
 0x221   : > { %1665 = vmatpush.bf16.msra.mxu1 %v1653_v20  ;;  %v1795_v34 = vunpack.c.l.b16 %v1465_v27  ;;  %v1940_v13 = vunpack.c.h.b16 %v1465_v27 }
 0x222   : > { %v1455_v36 = vadd.f32 %v1454_v32, %v1436_v31 }
 0x224   : > { %v1416_v15 = vpop.f32.mrf.mxu1 }
 0x225   : > { %1720 = vrot.lane.b32.xlu1 %v1653_v20, %s4250_s22  ;;  %v1417_v33 = vadd.f32 %v1416_v15, %v4740_v47 }
 0x226   : > { %v4757_v29 = vpop.f32.mrf.mxu0 }
 0x227   : > { %v1466_v37 = vpack.c.bf16 %v1455_v36, %v1417_v33  ;;  %v1930_v5 = vsel %vm1492_vm7, %v4757_v29, -inf }
 0x229   : > { %v1796_v39 = vunpack.c.l.b16 %v1466_v37  ;;  %v1941_v40 = vunpack.c.h.b16 %v1466_v37 }
 0x22b   : > { %v4761_v45 = vpack.c.b16 %v1796_v39, %v1795_v34  ;;  %v4763_v46 = vpack.c.b16 %v1941_v40, %v1940_v13 }
 0x22e   : > { %v1928_v38 = vpop.f32.mrf.mxu0 }
 0x255   : > { %v1563_v35 = vpop.f32.mrf.mxu2 }
 0x256   : > { %v1567_v58 = vsel %vm1492_vm7, %v1563_v35, -inf }
 0x257   : > { %1568 = vmax.xlane.f32.xlu2 %v1567_v58 }
 0x25d   : > { %v1565_v41 = vpop.f32.mrf.mxu2 }
 0x26d   : > { %v1706_v42 = vpop.f32.mrf.mxu2 }
 0x26e   : > { %v1710_v47 = vsel %vm1492_vm7, %v1706_v42, -inf }
 0x26f   : > { %1867 = vrot.lane.b32.xlu2 %v4761_v45, %s4250_s22  ;;  %1711 = vmax.xlane.f32.xlu0 %v1710_v47 }
 0x275   : > { %v1708_v9 = vpop.f32.mrf.mxu2 }
 0x277   : > { %1494 = vmax.xlane.f32.xlu0 %v1493_v30 }
 0x27d   : > { %v1853_v48 = vpop.f32.mrf.mxu2 }
 0x27e   : > { %v1857_v49 = vsel %vm1492_vm7, %v1853_v48, -inf }
 0x27f   : > { %1858 = vmax.xlane.f32.xlu1 %v1857_v49 }
 0x285   : > { %v1855_v57 = vpop.f32.mrf.mxu2 }
 0x28d   : > { %v1995_v50 = vpop.f32.mrf.mxu2 }
 0x28e   : > { %v1999_v51 = vsel %vm1492_vm7, %v1995_v50, -inf }
 0x28f   : > { %2000 = vmax.xlane.f32.xlu0 %v1999_v51  ;;  %v1578_v53 = vpop.permute.xlu1 %1577 }
 0x290   : > { %1590 = vmatpush.bf16.msrb.mxu3 %v1578_v53 }
 0x295   : > { %v1997_v55 = vpop.f32.mrf.mxu2 }
 0x297   : > { %1642 = vmax.xlane.f32.xlu0 %v1641_v56  ;;  %v1721_v61 = vpop.permute.xlu1 %1720 }
 0x298   : > { %2009 = vrot.lane.b32.xlu1 %v4763_v46, %s4250_s22  ;;  %1784 = vmax.xlane.f32.xlu2 %v1783_v60 }
 0x299   : > { %1733 = vmatpush.bf16.msra.mxu3 %v1721_v61 }
 0x29f   : > { %1931 = vmax.xlane.f32.xlu0 %v1930_v5 }
 0x2ca   : > { %v1569_v43 = vpop.xlane.xlu2 %1568 }
 0x2cb   : > { %v1570_v62 = vsub.f32 %v1563_v35, %v1569_v43 }
 0x2cd   : > { %v1571_v63 = vmul.f32 1.442695, %v1570_v62 }
 0x2cf   : > { %4152 = vpow2.f32 %v1571_v63 }
 0x2d2   : > { %v1868_v6 = vpop.permute.xlu2 %1867 }
 0x2d5   : > { %v4153_v0 = vpop.eup %4152 }
 0x2d6   : > { %v1576_v1 = vpack.c.bf16 %v4153_v0, %v4153_v0  ;;  %v1573_v3 = vsel %vm1492_vm7, %v4153_v0, 0.0 }
 0x2d7   : > { %1574 = vadd.xlane.f32.xlu0 %v1573_v3 }
 0x2d8   : > { %3507 = vmatmul.msk.bf16.vlgmr.msrb.gmra.mxu3 %vm1492_vm7, %v1576_v1 }
 0x2d9   : > { %1880 = vmatpush.bf16.msrb.mxu3 %v1868_v6 }
 0x2e2   : > { %v1712_v7 = vpop.xlane.xlu0 %1711 }
 0x2e3   : > { %v1713_v2 = vsub.f32 %v1706_v42, %v1712_v7 }
 0x2e5   : > { %v1714_v8 = vmul.f32 1.442695, %v1713_v2 }
 0x2e7   : > { %4154 = vpow2.f32 %v1714_v8 }
 0x2ea   : > { %v1495_v11 = vpop.xlane.xlu0 %1494 }
 0x2eb   : > { %v1496_v12 = vsub.f32 %v4747_v52, %v1495_v11 }
 0x2ed   : > { %v4155_v14 = vpop.eup %4154  ;;  %v1497_v16 = vmul.f32 1.442695, %v1496_v12 }
 0x2ee   : > { %v1719_v10 = vpack.c.bf16 %v4155_v14, %v4155_v14  ;;  %v1716_v44 = vsel %vm1492_vm7, %v4155_v14, 0.0 }
 0x2ef   : > { %4156 = vpow2.f32 %v1497_v16  ;;  %1717 = vadd.xlane.f32.xlu0 %v1716_v44 }
 0x2f0   : > { %3511 = vmatmul.msk.bf16.vlgmr.msra.gmra.mxu3 %vm1492_vm7, %v1719_v10 }
 0x2f2   : > { %v1859_v17 = vpop.xlane.xlu1 %1858 }
 0x2f3   : > { %v1860_v59 = vsub.f32 %v1853_v48, %v1859_v17 }
 0x2f5   : > { %v4157_v18 = vpop.eup %4156  ;;  %v1861_v19 = vmul.f32 1.442695, %v1860_v59 }
 0x2f6   : > { %v1502_v20 = vpack.c.bf16 %v4157_v18, %v4157_v18 }
 0x2f7   : > { %4158 = vpow2.f32 %v1861_v19 }
 0x2f8   : > { %3505 = vmatmul.msk.bf16.vlgmr.msrb.gmra.mxu1 %vm1492_vm7, %v1502_v20 }
 0x2f9   : > { %1809 = vmatpush.bf16.msrb.mxu1 %v4761_v45 }
 0x2fd   : > { %v4159_v52 = vpop.eup %4158 }
 0x2fe   : > { %v1866_v21 = vpack.c.bf16 %v4159_v52, %v4159_v52  ;;  %v1863_v22 = vsel %vm1492_vm7, %v4159_v52, 0.0 }
 0x2ff   : > { %1864 = vadd.xlane.f32.xlu1 %v1863_v22 }
 0x300   : > { %3515 = vmatmul.msk.bf16.vlgmr.msrb.gmra.mxu3 %vm1492_vm7, %v1866_v21 }
 0x302   : > { %v2001_v23 = vpop.xlane.xlu0 %2000 }
 0x303   : > { %v2002_v24 = vsub.f32 %v1995_v50, %v2001_v23 }
 0x305   : > { %v2003_v25 = vmul.f32 1.442695, %v2002_v24 }
 0x307   : > { %4160 = vpow2.f32 %v2003_v25 }
 0x30a   : > { %v2010_v26 = vpop.permute.xlu1 %2009  ;;  %v1643_v27 = vpop.xlane.xlu0 %1642 }
 0x30b   : > { %v1644_v28 = vsub.f32 %v4750_v54, %v1643_v27  ;;  %2022 = vmatpush.bf16.msra.mxu3 %v2010_v26  ;;  %v1785_v31 = vpop.xlane.xlu2 %1784 }
 0x30c   : > { %v1786_v15 = vsub.f32 %v4754_v4, %v1785_v31  ;;  %v1499_v4 = vsel %vm1492_vm7, %v4157_v18, 0.0 }
 0x30d   : > { %v4161_v32 = vpop.eup %4160  ;;  %v1645_v33 = vmul.f32 1.442695, %v1644_v28 }
 0x30e   : > { %v2008_v36 = vpack.c.bf16 %v4161_v32, %v4161_v32  ;;  %v1787_v37 = vmul.f32 1.442695, %v1786_v15  ;;  %v2005_v38 = vsel %vm1492_vm7, %v4161_v32, 0.0 }
 0x30f   : > { %4162 = vpow2.f32 %v1645_v33  ;;  %2006 = vadd.xlane.f32.xlu0 %v2005_v38 }
 0x310   : > { %4164 = vpow2.f32 %v1787_v37  ;;  %3519 = vmatmul.msk.bf16.vlgmr.msra.gmra.mxu3 %vm1492_vm7, %v2008_v36 }
 0x312   : > { %v1932_v34 = vpop.xlane.xlu0 %1931 }
 0x313   : > { %v1933_v13 = vsub.f32 %v4757_v29, %v1932_v34 }
 0x315   : > { %v4163_v39 = vpop.eup %4162  ;;  %v1934_v54 = vmul.f32 1.442695, %v1933_v13 }
 0x316   : > { %v4165_v40 = vpop.eup %4164  ;;  %v1650_v45 = vpack.c.bf16 %v4163_v39, %v4163_v39  ;;  %v1647_v41 = vsel %vm1492_vm7, %v4163_v39, 0.0 }
 0x317   : > { %4166 = vpow2.f32 %v1934_v54  ;;  %1500 = vadd.xlane.f32.xlu0 %v1499_v4  ;;  %v1789_v35 = vsel %vm1492_vm7, %v4165_v40, 0.0  ;;  %v1792_v42 = vpack.c.bf16 %v4165_v40, %v4165_v40 }
 0x318   : > { %3509 = vmatmul.msk.bf16.vlgmr.msra.gmra.mxu1 %vm1492_vm7, %v1650_v45  ;;  %1790 = vadd.xlane.f32.xlu2 %v1789_v35 }
 0x319   : > { %1954 = vmatpush.bf16.msra.mxu1 %v4763_v46 }
 0x31d   : > { %v4167_v58 = vpop.eup %4166 }
 0x31e   : > { %v1936_v29 = vsel %vm1492_vm7, %v4167_v58, 0.0  ;;  %v1939_v47 = vpack.c.bf16 %v4167_v58, %v4167_v58 }
 0x31f   : > { %1648 = vadd.xlane.f32.xlu0 %v1647_v41 }
 0x320   : > { %1937 = vadd.xlane.f32.xlu2 %v1936_v29 }
 0x328   : > { %3513 = vmatmul.msk.bf16.vlgmr.msrb.gmra.mxu1 %vm1492_vm7, %v1792_v42 }
 0x338   : > { %3517 = vmatmul.msk.bf16.vlgmr.msra.gmra.mxu1 %vm1492_vm7, %v1939_v47 }
 0x34a   : > { %v1575_v9 = vpop.xlane.xlu0 %1574 }
 0x34b   : > { %4168 = vrcp.f32 %v1575_v9  ;;  %v1607_v57 = vand.u32 2147483648, %v1575_v9  ;;  %v1605_v50 = vand.u32 2147483647, %v1575_v9  ;;  %vm1601_vm9 = vweird.f32 %v1575_v9 }
 0x34d   : > { %v1608_v53 = vor.u32 1.1754944e-38, %v1607_v57  ;;  %vm1606_vm11 = vcmp.eq.f32.partialorder %v1605_v50, 8.507059e+37 }
 0x351   : > { %v4169_v30 = vpop.eup %4168 }
 0x352   : > { %v1597_v48 = vmul.f32 %v4169_v30, %v1575_v9  ;;  %vm1602_vm8 = vweird.f32 %v4169_v30 }
 0x353   : > { %vm1603_vm10 = vmor %vm1601_vm9, %vm1602_vm8 }
 0x354   : > { %v1598_v49 = vsub.f32 1.0, %v1597_v48 }
 0x356   : > { %v1599_v46 = vmul.f32 %v4169_v30, %v1598_v49 }
 0x358   : > { %v1600_v51 = vadd.f32 %v4169_v30, %v1599_v46 }
 0x35a   : > { %v1604_v55 = vsel %vm1603_vm10, %v4169_v30, %v1600_v51 }
 0x35b   : > { %v1592_v56 = vpop.f32.mrf.mxu3  ;;  %v1609_v60 = vsel %vm1606_vm11, %v1608_v53, %v1604_v55 }
 0x35c   : > { %v1610_v61 = vmul.f32 %v1609_v60, %v1592_v56 }
 0x35e   : > { %1612 = vrot.lane.b32.xlu0 %v1610_v61, %s4250_s22 }
 0x362   : > { %v1718_v5 = vpop.xlane.xlu0 %1717 }
 0x363   : > { %4170 = vrcp.f32 %v1718_v5  ;;  %v1594_v43 = vpop.f32.mrf.mxu3  ;;  %v1750_v1 = vand.u32 2147483648, %v1718_v5  ;;  %v1748_v6 = vand.u32 2147483647, %v1718_v5  ;;  %vm1744_vm13 = vweird.f32 %v1718_v5 }
 0x365   : > { %v1751_v2 = vor.u32 1.1754944e-38, %v1750_v1  ;;  %vm1749_vm15 = vcmp.eq.f32.partialorder %v1748_v6, 8.507059e+37 }
 0x369   : > { %v4171_v62 = vpop.eup %4170 }
 0x36a   : > { %v1740_v63 = vmul.f32 %v4171_v62, %v1718_v5  ;;  %vm1745_vm12 = vweird.f32 %v4171_v62 }
 0x36b   : > { %vm1746_vm14 = vmor %vm1744_vm13, %vm1745_vm12 }
 0x36c   : > { %v1741_v0 = vsub.f32 1.0, %v1740_v63 }
 0x36e   : > { %v1742_v3 = vmul.f32 %v4171_v62, %v1741_v0 }
 0x370   : > { %v1743_v7 = vadd.f32 %v4171_v62, %v1742_v3 }
 0x372   : > { %v1865_v8 = vpop.xlane.xlu1 %1864  ;;  %v1747_v11 = vsel %vm1746_vm14, %v4171_v62, %v1743_v7  ;;  %v3578_v7 = vld [vmem:[%s4350_s12 + $0x70] sm:$0xf] }
 0x373   : > { %4172 = vrcp.f32 %v1865_v8  ;;  %v1735_v12 = vpop.f32.mrf.mxu3  ;;  %v1752_v14 = vsel %vm1749_vm15, %v1751_v2, %v1747_v11  ;;  %v1897_v20 = vand.u32 2147483648, %v1865_v8  ;;  %v1895_v21 = vand.u32 2147483647, %v1865_v8  ;;  %v4031_v2 = vld [vmem:[%s4350_s12 + $0x74] sm:$0xf0] }
 0x374   : > { %v1753_v16 = vmul.f32 %v1752_v14, %v1735_v12  ;;  %vm1891_vm1 = vweird.f32 %v1865_v8  ;;  %v3579_v12 = vor.u32 %v4031_v2, %v3578_v7  ;;  %v4030_v14 = vld [vmem:[%s4350_s12 + $0x74] sm:$0xf]  ;;  %v3530_v2 = vld [vmem:[%s4350_s12 + $0x10] sm:$0xf] }
 0x375   : > { %v4804_v10 = vpop.f32.mrf.mxu1  ;;  %v1898_v23 = vor.u32 1.1754944e-38, %v1897_v20  ;;  %vm1896_vm3 = vcmp.eq.f32.partialorder %v1895_v21, 8.507059e+37 }
 0x376   : > { %1755 = vrot.lane.b32.xlu1 %v1753_v16, %s4250_s22  ;;  %v3580_v16 = vld [vmem:[%s4350_s12 + $0x78] sm:$0xf0]  ;;  %2248 = vmatpush.bf16.msrb.mxu0 %v3579_v12 }
 0x379   : > { %v4173_v44 = vpop.eup %4172 }
 0x37a   : > { %v1887_v17 = vmul.f32 %v4173_v44, %v1865_v8  ;;  %vm1892_vm0 = vweird.f32 %v4173_v44 }
 0x37b   : > { %v1737_v59 = vpop.f32.mrf.mxu3  ;;  %vm1893_vm2 = vmor %vm1891_vm1, %vm1892_vm0 }
 0x37c   : > { %v1888_v18 = vsub.f32 1.0, %v1887_v17  ;;  %v3583_v17 = vor.u32 %v4030_v14, %v3580_v16  ;;  %v4029_v59 = vld [vmem:[%s4350_s12 + $0x64] sm:$0xf0]  ;;  %v3532_v14 = vld [vmem:[%s4350_s12 + $0x18] sm:$0xf0] }
 0x37d   : > { %v1523_v19 = vpop.f32.mrf.mxu1  ;;  %v3522_v16 = vld [vmem:[%s4350_s12] sm:$0xf] }
 0x37e   : > { %v1889_v52 = vmul.f32 %v4173_v44, %v1888_v18  ;;  %v4028_v18 = vld [vmem:[%s4350_s12 + $0x64] sm:$0xf]  ;;  %v3572_v19 = vld [vmem:[%s4350_s12 + $0x68] sm:$0xf0]  ;;  %2276 = vmatpush.bf16.msrb.mxu2 %v3583_v17 }
 0x37f   : > { %v4016_v17 = vld [vmem:[%s4350_s12 + $0x4] sm:$0xf] }
 0x380   : > { %v1890_v22 = vadd.f32 %v4173_v44, %v1889_v52  ;;  %v4047_v52 = vld [vmem:[%s4350_s12 + $0xf4] sm:$0xf0] }
 0x382   : > { %v2007_v24 = vpop.xlane.xlu0 %2006  ;;  %v1894_v25 = vsel %vm1893_vm2, %v4173_v44, %v1890_v22 }
 0x383   : > { %4174 = vrcp.f32 %v2007_v24  ;;  %v1882_v26 = vpop.f32.mrf.mxu3  ;;  %v1899_v27 = vsel %vm1896_vm3, %v1898_v23, %v1894_v25  ;;  %v2039_v38 = vand.u32 2147483648, %v2007_v24  ;;  %v2037_v13 = vand.u32 2147483647, %v2007_v24 }
 0x384   : > { %v1900_v28 = vmul.f32 %v1899_v27, %v1882_v26  ;;  %vm2033_vm5 = vweird.f32 %v2007_v24 }
 0x385   : > { %v2040_v40 = vor.u32 1.1754944e-38, %v2039_v38  ;;  %vm2038_vm8 = vcmp.eq.f32.partialorder %v2037_v13, 8.507059e+37 }
 0x386   : > { %1902 = vrot.lane.b32.xlu2 %v1900_v28, %s4250_s22 }
 0x389   : > { %v4175_v31 = vpop.eup %4174 }
 0x38a   : > { %v2029_v15 = vmul.f32 %v4175_v31, %v2007_v24  ;;  %v1501_v32 = vpop.xlane.xlu0 %1500  ;;  %vm2034_vm4 = vweird.f32 %v4175_v31  ;;  %v3575_v24 = vor.u32 %v4028_v18, %v3572_v19 }
 0x38b   : > { %4176 = vrcp.f32 %v1501_v32  ;;  %v1884_v33 = vpop.f32.mrf.mxu3  ;;  %v4808_v36 = vpop.xlane.xlu2 %1790  ;;  %vm2035_vm7 = vmor %vm2033_vm5, %vm2034_vm4  ;;  %v1536_v30 = vand.u32 2147483648, %v1501_v32  ;;  %v1534_v57 = vand.u32 2147483647, %v1501_v32  ;;  %vm1530_vm10 = vweird.f32 %v1501_v32 }
 0x38c   : > { %v2030_v37 = vsub.f32 1.0, %v2029_v15  ;;  %4178 = vrcp.f32 %v4808_v36  ;;  %v1826_v6 = vand.u32 2147483648, %v4808_v36  ;;  %vm1820_vm15 = vweird.f32 %v4808_v36  ;;  %2277 = vmatpush.bf16.msrb.mxu2 %v3575_v24  ;;  %v3634_v24 = vld [vmem:[%s4350_s12 + $0xe0] sm:$0xf] }
 0x38d   : > { %v1537_v55 = vor.u32 1.1754944e-38, %v1536_v30  ;;  %vm1535_vm12 = vcmp.eq.f32.partialorder %v1534_v57, 8.507059e+37  ;;  %v1824_v21 = vand.u32 2147483647, %v4808_v36 }
 0x38e   : > { %v2031_v34 = vmul.f32 %v4175_v31, %v2030_v37 }
 0x38f   : > { %vm1825_vm4 = vcmp.eq.f32.partialorder %v1824_v21, 8.507059e+37  ;;  %v4046_v21 = vld [vmem:[%s4350_s12 + $0xf4] sm:$0xf] }
 0x390   : > { %v2032_v39 = vadd.f32 %v4175_v31, %v2031_v34 }
 0x391   : > { %v4177_v54 = vpop.eup %4176 }
 0x392   : > { %v4811_v45 = vpop.eup %4178  ;;  %v1526_v4 = vmul.f32 %v4177_v54, %v1501_v32  ;;  %v4813_v35 = vpop.xlane.xlu0 %1648  ;;  %v2036_v58 = vsel %vm2035_vm7, %v4175_v31, %v2032_v39  ;;  %vm1531_vm9 = vweird.f32 %v4177_v54  ;;  %v1827_v31 = vor.u32 1.1754944e-38, %v1826_v6 }
 0x393   : > { %v1816_v41 = vmul.f32 %v4811_v45, %v4808_v36  ;;  %4180 = vrcp.f32 %v4813_v35  ;;  %v2024_v29 = vpop.f32.mrf.mxu3  ;;  %v2041_v42 = vsel %vm2038_vm8, %v2040_v40, %v2036_v58  ;;  %v4818_v50 = vpop.xlane.xlu2 %1937  ;;  %vm1532_vm11 = vmor %vm1530_vm10, %vm1531_vm9  ;;  %v1680_v63 = vand.u32 2147483647, %v4813_v35 }
 0x394   : > { %v1527_v47 = vsub.f32 1.0, %v1526_v4  ;;  %v2042_v9 = vmul.f32 %v2041_v42, %v2024_v29  ;;  %4182 = vrcp.f32 %v4818_v50  ;;  %v1682_v1 = vand.u32 2147483648, %v4813_v35  ;;  %v4027_v4 = vld [vmem:[%s4350_s12 + $0x54] sm:$0xf0]  ;;  %v3564_v29 = vld [vmem:[%s4350_s12 + $0x58] sm:$0xf0] }
 0x395   : > { %v1667_v48 = vpop.f32.mrf.mxu1  ;;  %v1817_v46 = vsub.f32 1.0, %v1816_v41  ;;  %vm1821_vm13 = vweird.f32 %v4811_v45  ;;  %vm1676_vm0 = vweird.f32 %v4813_v35  ;;  %vm1681_vm3 = vcmp.eq.f32.partialorder %v1680_v63, 8.507059e+37  ;;  %v3554_v42 = vld [vmem:[%s4350_s12 + $0x40] sm:$0xf]  ;;  %v4021_v63 = vld [vmem:[%s4350_s12 + $0x24] sm:$0xf0] }
 0x396   : > { %v1528_v49 = vmul.f32 %v4177_v54, %v1527_v47  ;;  %2044 = vrot.lane.b32.xlu0 %v2042_v9, %s4250_s22  ;;  %vm4842_vm1 = vmor %vm1820_vm15, %vm1821_vm13  ;;  %v1683_v23 = vor.u32 1.1754944e-38, %v1682_v1  ;;  %vm1965_vm7 = vweird.f32 %v4818_v50  ;;  %v1971_v39 = vand.u32 2147483648, %v4818_v50  ;;  %v4025_v47 = vld [vmem:[%s4350_s12 + $0x44] sm:$0xf0]  ;;  %v3540_v1 = vld [vmem:[%s4350_s12 + $0x28] sm:$0xf0] }
 0x397   : > { %v1818_v60 = vmul.f32 %v4811_v45, %v1817_v46  ;;  %v1969_v40 = vand.u32 2147483647, %v4818_v50  ;;  %v3555_v57 = vor.u32 %v4025_v47, %v3554_v42  ;;  %v3612_v42 = vld [vmem:[%s4350_s12 + $0xb8] sm:$0xf0] }
 0x398   : > { %v1529_v51 = vadd.f32 %v4177_v54, %v1528_v49  ;;  %v1972_v9 = vor.u32 1.1754944e-38, %v1971_v39  ;;  %v3556_v49 = vld [vmem:[%s4350_s12 + $0x48] sm:$0xf0]  ;;  %v3618_v39 = vld [vmem:[%s4350_s12 + $0xc0] sm:$0xf] }
 0x399   : > { %v4181_v53 = vpop.eup %4180  ;;  %v1819_v11 = vadd.f32 %v4811_v45, %v1818_v60  ;;  %vm1970_vm9 = vcmp.eq.f32.partialorder %v1969_v40, 8.507059e+37  ;;  %v4022_v60 = vld [vmem:[%s4350_s12 + $0x34] sm:$0xf]  ;;  %v4040_v40 = vld [vmem:[%s4350_s12 + $0xc4] sm:$0xf] }
 0x39a   : > { %v1672_v56 = vmul.f32 %v4181_v53, %v4813_v35  ;;  %v1533_v61 = vsel %vm1532_vm11, %v4177_v54, %v1529_v51  ;;  %vm1677_vm14 = vweird.f32 %v4181_v53  ;;  %v4183_v44 = vpop.eup %4182  ;;  %v4026_v35 = vld [vmem:[%s4350_s12 + $0x54] sm:$0xf]  ;;  %v4041_v54 = vld [vmem:[%s4350_s12 + $0xc4] sm:$0xf0] }
 0x39b   : > { %v2026_v5 = vpop.f32.mrf.mxu3  ;;  %v1538_v43 = vsel %vm1535_vm12, %v1537_v55, %v1533_v61  ;;  %vm1678_vm2 = vmor %vm1676_vm0, %vm1677_vm14  ;;  %v1961_v25 = vmul.f32 %v4183_v44, %v4818_v50  ;;  %v1823_v27 = vsel %vm4842_vm1, %v4811_v45, %v1819_v11  ;;  %vm1966_vm5 = vweird.f32 %v4183_v44  ;;  %v3562_v45 = vld [vmem:[%s4350_s12 + $0x50] sm:$0xf]  ;;  %v4023_v55 = vld [vmem:[%s4350_s12 + $0x34] sm:$0xf0] }
 0x39c   : > { %v1673_v62 = vsub.f32 1.0, %v1672_v56  ;;  %v1539_v0 = vmul.f32 %v1538_v43, %v4804_v10  ;;  %v3570_v10 = vld [vmem:[%s4350_s12 + $0x60] sm:$0xf]  ;;  %v1828_v33 = vsel %vm1825_vm4, %v1827_v31, %v1823_v27  ;;  %vm4857_vm8 = vmor %vm1965_vm7, %vm1966_vm5  ;;  %v3563_v41 = vor.u32 %v4027_v4, %v3562_v45  ;;  %v3548_v61 = vld [vmem:[%s4350_s12 + $0x38] sm:$0xf0] }
 0x39d   : > { %v1669_v3 = vpop.f32.mrf.mxu1  ;;  %v3571_v22 = vor.u32 %v4029_v59, %v3570_v10  ;;  %v1962_v36 = vsub.f32 1.0, %v1961_v25  ;;  %v3567_v30 = vor.u32 %v4026_v35, %v3564_v29  ;;  %v3551_v43 = vor.u32 %v4022_v60, %v3548_v61  ;;  %v4018_v11 = vld [vmem:[%s4350_s12 + $0x14] sm:$0xf]  ;;  %v4017_v10 = vld [vmem:[%s4350_s12 + $0x4] sm:$0xf0] }
 0x39e   : > { %v1674_v8 = vmul.f32 %v4181_v53, %v1673_v62  ;;  %1540 = vst.msk [vmem:[#allocation3] sm:$0xff] %vm1472_vm6, %v1539_v0  ;;  %v3538_v62 = vld [vmem:[%s4350_s12 + $0x20] sm:$0xf]  ;;  %v4020_v0 = vld [vmem:[%s4350_s12 + $0x24] sm:$0xf]  ;;  %v3523_v18 = vor.u32 %v4017_v10, %v3522_v16  ;;  %v3619_v4 = vor.u32 %v4041_v54, %v3618_v39 }
 0x39f   : > { %2249 = vmatpush.bf16.msrb.mxu0 %v3571_v22  ;;  %v1963_v38 = vmul.f32 %v4183_v44, %v1962_v36  ;;  %2278 = vmatpush.bf16.msrb.mxu2 %v3567_v30  ;;  %v3539_v3 = vor.u32 %v4021_v63, %v3538_v62  ;;  %v3543_v7 = vor.u32 %v4020_v0, %v3540_v1  ;;  %v3524_v59 = vld [vmem:[%s4350_s12 + $0x8] sm:$0xf0]  ;;  %v4045_v25 = vld [vmem:[%s4350_s12 + $0xe4] sm:$0xf0]  ;;  %v4044_v27 = vld [vmem:[%s4350_s12 + $0xe4] sm:$0xf] }
 0x3a0   : > { %v1675_v20 = vadd.f32 %v4181_v53, %v1674_v8  ;;  %v4019_v8 = vld [vmem:[%s4350_s12 + $0x14] sm:$0xf0]  ;;  %v3527_v19 = vor.u32 %v4016_v17, %v3524_v59  ;;  %v3635_v31 = vor.u32 %v4045_v25, %v3634_v24  ;;  %v3620_v45 = vld [vmem:[%s4350_s12 + $0xc8] sm:$0xf0]  ;;  %v4038_v29 = vld [vmem:[%s4350_s12 + $0xb4] sm:$0xf] }
 0x3a1   : > { %v1964_v13 = vadd.f32 %v4183_v44, %v1963_v38  ;;  %v3531_v12 = vor.u32 %v4019_v8, %v3530_v2  ;;  %v3628_v38 = vld [vmem:[%s4350_s12 + $0xd8] sm:$0xf0]  ;;  %v3623_v35 = vor.u32 %v4040_v40, %v3620_v45  ;;  %v3602_v30 = vld [vmem:[%s4350_s12 + $0xa0] sm:$0xf]  ;;  %v3594_v61 = vld [vmem:[%s4350_s12 + $0x90] sm:$0xf] }
 0x3a2   : > { %v1679_v26 = vsel %vm1678_vm2, %v4181_v53, %v1675_v20  ;;  %v3546_v53 = vld [vmem:[%s4350_s12 + $0x30] sm:$0xf]  ;;  %v4034_v62 = vld [vmem:[%s4350_s12 + $0x94] sm:$0xf]  ;;  %v3596_v63 = vld [vmem:[%s4350_s12 + $0x98] sm:$0xf0] }
 0x3a3   : > { %v1684_v28 = vsel %vm1681_vm3, %v1683_v23, %v1679_v26  ;;  %v1968_v58 = vsel %vm4857_vm8, %v4183_v44, %v1964_v13  ;;  %2250 = vmatpush.bf16.msrb.mxu0 %v3563_v41  ;;  %v3547_v5 = vor.u32 %v4023_v55, %v3546_v53  ;;  %v3535_v44 = vor.u32 %v4018_v11, %v3532_v14  ;;  %v3642_v20 = vld [vmem:[%s4350_s12 + $0xf0] sm:$0xf]  ;;  %v3644_v23 = vld [vmem:[%s4350_s12 + $0xf8] sm:$0xf0]  ;;  %v4039_v41 = vld [vmem:[%s4350_s12 + $0xb4] sm:$0xf0] }
 0x3a4   : > { %v1685_v15 = vmul.f32 %v1684_v28, %v1667_v48  ;;  %v4024_v48 = vld [vmem:[%s4350_s12 + $0x44] sm:$0xf]  ;;  %v1973_v50 = vsel %vm1970_vm9, %v1972_v9, %v1968_v58  ;;  %v3643_v22 = vor.u32 %v4047_v52, %v3642_v20  ;;  %v3647_v26 = vor.u32 %v4046_v21, %v3644_v23  ;;  %v3636_v28 = vld [vmem:[%s4350_s12 + $0xe8] sm:$0xf0]  ;;  %v3610_v58 = vld [vmem:[%s4350_s12 + $0xb0] sm:$0xf] }
 0x3a5   : > { %v1811_v32 = vpop.f32.mrf.mxu1  ;;  %v3559_v51 = vor.u32 %v4024_v48, %v3556_v49  ;;  %v3611_v47 = vor.u32 %v4039_v41, %v3610_v58  ;;  %v3615_v9 = vor.u32 %v4038_v29, %v3612_v42  ;;  %v4037_v48 = vld [vmem:[%s4350_s12 + $0xa4] sm:$0xf0]  ;;  %v4036_v49 = vld [vmem:[%s4350_s12 + $0xa4] sm:$0xf]  ;;  %v3586_v0 = vld [vmem:[%s4350_s12 + $0x80] sm:$0xf]  ;;  %v3599_v1 = vor.u32 %v4034_v62, %v3596_v63 }
 0x3a6   : > { %1686 = vst.msk [vmem:[#allocation3 + $0x8] sm:$0xff] %vm1472_vm6, %v1685_v15  ;;  %v1829_v37 = vmul.f32 %v1828_v33, %v1811_v32  ;;  %2262 = vmatpush.bf16.msrb.mxu1 %v3643_v22  ;;  %2290 = vmatpush.bf16.msrb.mxu3 %v3647_v26  ;;  %v3639_v15 = vor.u32 %v4044_v27, %v3636_v28  ;;  %v3626_v32 = vld [vmem:[%s4350_s12 + $0xd0] sm:$0xf]  ;;  %v4043_v33 = vld [vmem:[%s4350_s12 + $0xd4] sm:$0xf0]  ;;  %v4926_v10 = vld [vmem:[%s4365_s27] sm:$0xff] }
 0x3a7   : > { %2251 = vmatpush.bf16.msrb.mxu0 %v3555_v57  ;;  %2279 = vmatpush.bf16.msrb.mxu2 %v3559_v51  ;;  %v3604_v57 = vld [vmem:[%s4350_s12 + $0xa8] sm:$0xf0]  ;;  %v4190_v24 = vld [vmem:[#allocation2 + $0x10] sm:$0xff]  ;;  %v4191_v28 = vld [vmem:[#allocation2] sm:$0xff] }
 0x3a8   : > { %1830 = vst.msk [vmem:[#allocation3 + $0x10] sm:$0xff] %vm1472_vm6, %v1829_v37  ;;  %v4042_v37 = vld [vmem:[%s4350_s12 + $0xd4] sm:$0xf]  ;;  %v4930_v20 = vld [vmem:[%s4365_s27 + $0x8] sm:$0xff]  ;;  %v4192_v45 = vld [vmem:[#allocation2 + $0x18] sm:$0xff] }
 0x3a9   : > { %v3631_v13 = vor.u32 %v4042_v37, %v3628_v38  ;;  %v2087_v52 = vperm.slane %v4930_v20, 5  ;;  %v4077_v63 = vld [vmem:[%s4355_s21 + $0xe4] sm:$0xf0] }
 0x3aa   : > { %2263 = vmatpush.bf16.msrb.mxu1 %v3635_v31  ;;  %2291 = vmatpush.bf16.msrb.mxu3 %v3639_v15 }
 0x3ab   : > { %2252 = vmatpush.bf16.msrb.mxu0 %v3547_v5  ;;  %2280 = vmatpush.bf16.msrb.mxu2 %v3551_v43  ;;  %v4035_v5 = vld [vmem:[%s4350_s12 + $0x94] sm:$0xf0] }
 0x3ac   : > { %v3595_v43 = vor.u32 %v4035_v5, %v3594_v61  ;;  %v3698_v61 = vld [vmem:[%s4355_s21 + $0x60] sm:$0xf]  ;;  %v4061_v5 = vld [vmem:[%s4355_s21 + $0x64] sm:$0xf0] }
 0x3ad   : > { %v1813_v34 = vpop.f32.mrf.mxu1  ;;  %v3699_v62 = vor.u32 %v4061_v5, %v3698_v61  ;;  %v3730_v5 = vld [vmem:[%s4355_s21 + $0xa0] sm:$0xf] }
 0x3ae   : > { %v3627_v34 = vor.u32 %v4043_v33, %v3626_v32  ;;  %2292 = vmatpush.bf16.msrb.mxu3 %v3631_v13 }
 0x3af   : > { %2253 = vmatpush.bf16.msrb.mxu0 %v3539_v3  ;;  %2281 = vmatpush.bf16.msrb.mxu2 %v3543_v7  ;;  %v4033_v3 = vld [vmem:[%s4350_s12 + $0x84] sm:$0xf0]  ;;  %v3588_v7 = vld [vmem:[%s4350_s12 + $0x88] sm:$0xf0] }
 0x3b0   : > { %2264 = vmatpush.bf16.msrb.mxu1 %v3627_v34  ;;  %v3587_v2 = vor.u32 %v4033_v3, %v3586_v0  ;;  %v4060_v0 = vld [vmem:[%s4355_s21 + $0x64] sm:$0xf] }
 0x3b2   : > { %2293 = vmatpush.bf16.msrb.mxu3 %v3623_v35  ;;  %v4193_v35 = vld [vmem:[#allocation2 + $0x8] sm:$0xff] }
 0x3b3   : > { %2254 = vmatpush.bf16.msrb.mxu0 %v3531_v12  ;;  %2282 = vmatpush.bf16.msrb.mxu2 %v3535_v44  ;;  %v2086_v44 = vperm.slane %v4926_v10, 5 }
 0x3b4   : > { %2265 = vmatpush.bf16.msrb.mxu1 %v3619_v4 }
 0x3b5   : > { %v1956_v46 = vpop.f32.mrf.mxu1 }
 0x3b6   : > { %v1974_v56 = vmul.f32 %v1973_v50, %v1956_v46  ;;  %v3603_v46 = vor.u32 %v4037_v48, %v3602_v30  ;;  %2294 = vmatpush.bf16.msrb.mxu3 %v3615_v9  ;;  %v3607_v50 = vor.u32 %v4036_v49, %v3604_v57  ;;  %v3706_v9 = vld [vmem:[%s4355_s21 + $0x70] sm:$0xf]  ;;  %v4063_v30 = vld [vmem:[%s4355_s21 + $0x74] sm:$0xf0] }
 0x3b7   : > { %2255 = vmatpush.bf16.msrb.mxu0 %v3523_v18  ;;  %2283 = vmatpush.bf16.msrb.mxu2 %v3527_v19  ;;  %v3770_v48 = vld [vmem:[%s4355_s21 + $0xf0] sm:$0xf]  ;;  %v3707_v49 = vor.u32 %v4063_v30, %v3706_v9  ;;  %v4079_v57 = vld [vmem:[%s4355_s21 + $0xf4] sm:$0xf0]  ;;  %v4054_v9 = vld [vmem:[%s4355_s21 + $0x34] sm:$0xf] }
 0x3b8   : > { %1975 = vst.msk [vmem:[#allocation3 + $0x18] sm:$0xff] %vm1472_vm6, %v1974_v56  ;;  %vm1615_vm6 = vcmask 1048064   ;;  %2266 = vmatpush.bf16.msrb.mxu1 %v3611_v47 }
 0x3ba   : > { %2295 = vmatpush.bf16.msrb.mxu3 %v3607_v50  ;;  %v3708_v50 = vld [vmem:[%s4355_s21 + $0x78] sm:$0xf0] }
 0x3bb   : > { %2575 = vmatpush.bf16.msra.mxu0 %v3707_v49  ;;  %v3676_v49 = vld [vmem:[%s4355_s21 + $0x38] sm:$0xf0] }
 0x3bc   : > { %2267 = vmatpush.bf16.msrb.mxu1 %v3603_v46  ;;  %v4062_v46 = vld [vmem:[%s4355_s21 + $0x74] sm:$0xf] }
 0x3bd   : > { %v1958_v6 = vpop.f32.mrf.mxu1 }
 0x3be   : > { %v4032_v6 = vld [vmem:[%s4350_s12 + $0x84] sm:$0xf]  ;;  %2296 = vmatpush.bf16.msrb.mxu3 %v3599_v1  ;;  %v3700_v1 = vld [vmem:[%s4355_s21 + $0x68] sm:$0xf0] }
 0x3bf   : > { %v3591_v8 = vor.u32 %v4032_v6, %v3588_v7  ;;  %v3703_v6 = vor.u32 %v4060_v0, %v3700_v1  ;;  %v4076_v7 = vld [vmem:[%s4355_s21 + $0xe4] sm:$0xf]  ;;  %2576 = vmatpush.bf16.msra.mxu0 %v3699_v62  ;;  %v3668_v1 = vld [vmem:[%s4355_s21 + $0x28] sm:$0xf0] }
 0x3c0   : > { %2268 = vmatpush.bf16.msrb.mxu1 %v3595_v43  ;;  %v3762_v43 = vld [vmem:[%s4355_s21 + $0xe0] sm:$0xf]  ;;  %v4052_v62 = vld [vmem:[%s4355_s21 + $0x24] sm:$0xf] }
 0x3c1   : > { %v3763_v3 = vor.u32 %v4077_v63, %v3762_v43  ;;  %v4069_v43 = vld [vmem:[%s4355_s21 + $0xa4] sm:$0xf0] }
 0x3c2   : > { %2297 = vmatpush.bf16.msrb.mxu3 %v3591_v8  ;;  %v3731_v0 = vor.u32 %v4069_v43, %v3730_v5  ;;  %v4111_v43 = vld [vmem:[%s4360_s24 + $0xf4] sm:$0xf0] }
 0x3c4   : > { %2269 = vmatpush.bf16.msrb.mxu1 %v3587_v2  ;;  %v3764_v2 = vld [vmem:[%s4355_s21 + $0xe8] sm:$0xf0] }
 0x3c5   : > { %v3767_v8 = vor.u32 %v4076_v7, %v3764_v2  ;;  %v4068_v7 = vld [vmem:[%s4355_s21 + $0xa4] sm:$0xf]  ;;  %v3732_v2 = vld [vmem:[%s4355_s21 + $0xa8] sm:$0xf0] }
 0x3d0   : > { %v1613_v36 = vpop.permute.xlu0 %1612 }
 0x3d1   : > { %1616 = vst.msk [vmem:[#allocation3] sm:$0xff] %vm1615_vm6, %v1613_v36 }
 0x3d8   : > { %v2048_v55 = vld [vmem:[#allocation3] sm:$0xff] }
 0x3e0   : > { %v1903_v51 = vpop.permute.xlu2 %1902 }
 0x3e1   : > { %1905 = vst.msk [vmem:[#allocation3 + $0x10] sm:$0xff] %vm1615_vm6, %v1903_v51  ;;  %v3771_v51 = vor.u32 %v4079_v57, %v3770_v48  ;;  %v4070_v57 = vld [vmem:[%s4355_s21 + $0xb4] sm:$0xf] }
 0x3e3   : > { %2589 = vmatpush.bf16.msra.mxu1 %v3771_v51 }
 0x3e7   : > { %2590 = vmatpush.bf16.msra.mxu1 %v3763_v3 }
 0x3e8   : > { %v1756_v53 = vpop.permute.xlu1 %1755  ;;  %v2050_v56 = vld [vmem:[#allocation3 + $0x10] sm:$0xff] }
 0x3e9   : > { %1758 = vst.msk [vmem:[#allocation3 + $0x8] sm:$0xff] %vm1615_vm6, %v1756_v53  ;;  %v2052_v60 = vpack.c.bf16 %v2050_v56, %v2048_v55  ;;  %v3711_v53 = vor.u32 %v4062_v46, %v3708_v50  ;;  %v4078_v55 = vld [vmem:[%s4355_s21 + $0xf4] sm:$0xf]  ;;  %v3772_v56 = vld [vmem:[%s4355_s21 + $0xf8] sm:$0xf0]  ;;  %v3679_v50 = vor.u32 %v4054_v9, %v3676_v49 }
 0x3ea   : > { %v3740_v46 = vld [vmem:[%s4355_s21 + $0xb8] sm:$0xf0]  ;;  %v4094_v9 = vld [vmem:[%s4360_s24 + $0x74] sm:$0xf] }
 0x3eb   : > { %2256 = vmatmul.bf16.vlgmr.msrb.gmra.mxu0 %v2052_v60  ;;  %2284 = vmatmul.bf16.vlgmr.msrb.gmra.mxu2 %v2052_v60  ;;  %v3775_v60 = vor.u32 %v4078_v55, %v3772_v56  ;;  %v3743_v51 = vor.u32 %v4070_v57, %v3740_v46  ;;  %v3666_v55 = vld [vmem:[%s4355_s21 + $0x20] sm:$0xf]  ;;  %v4053_v56 = vld [vmem:[%s4355_s21 + $0x24] sm:$0xf0]  ;;  %v3836_v49 = vld [vmem:[%s4360_s24 + $0x78] sm:$0xf0] }
 0x3ec   : > { %2603 = vmatpush.bf16.msra.mxu2 %v3711_v53  ;;  %v3667_v61 = vor.u32 %v4053_v56, %v3666_v55  ;;  %v3826_v57 = vld [vmem:[%s4360_s24 + $0x60] sm:$0xf]  ;;  %v3839_v46 = vor.u32 %v4094_v9, %v3836_v49  ;;  %v3828_v56 = vld [vmem:[%s4360_s24 + $0x68] sm:$0xf0] }
 0x3ed   : > { %2617 = vmatpush.bf16.msra.mxu3 %v3775_v60 }
 0x3f0   : > { %v2049_v12 = vld [vmem:[#allocation3 + $0x8] sm:$0xff]  ;;  %2604 = vmatpush.bf16.msra.mxu2 %v3703_v6  ;;  %v3671_v6 = vor.u32 %v4052_v62, %v3668_v1  ;;  %v4110_v62 = vld [vmem:[%s4360_s24 + $0xf4] sm:$0xf]  ;;  %v3900_v1 = vld [vmem:[%s4360_s24 + $0xf8] sm:$0xf0] }
 0x3f1   : > { %2618 = vmatpush.bf16.msra.mxu3 %v3767_v8  ;;  %v3658_v8 = vld [vmem:[%s4355_s21 + $0x10] sm:$0xf] }
 0x408   : > { %v2045_v11 = vpop.permute.xlu0 %2044 }
 0x409   : > { %2047 = vst.msk [vmem:[#allocation3 + $0x18] sm:$0xff] %vm1615_vm6, %v2045_v11  ;;  %v3690_v11 = vld [vmem:[%s4355_s21 + $0x50] sm:$0xf] }
 0x410   : > { %v2051_v14 = vld [vmem:[#allocation3 + $0x18] sm:$0xff] }
 0x411   : > { %v2053_v16 = vpack.c.bf16 %v2051_v14, %v2049_v12  ;;  %v4059_v12 = vld [vmem:[%s4355_s21 + $0x54] sm:$0xf0]  ;;  %v3754_v14 = vld [vmem:[%s4355_s21 + $0xd0] sm:$0xf] }
 0x413   : > { %2270 = vmatmul.bf16.vlgmr.msrb.gmra.mxu1 %v2053_v16  ;;  %2298 = vmatmul.bf16.vlgmr.msrb.gmra.mxu3 %v2053_v16  ;;  %v3691_v16 = vor.u32 %v4059_v12, %v3690_v11  ;;  %v4051_v11 = vld [vmem:[%s4355_s21 + $0x14] sm:$0xf0]  ;;  %v3722_v12 = vld [vmem:[%s4355_s21 + $0x90] sm:$0xf] }
 0x415   : > { %2577 = vmatpush.bf16.msra.mxu0 %v3691_v16  ;;  %v3659_v16 = vor.u32 %v4051_v11, %v3658_v8  ;;  %v4090_v8 = vld [vmem:[%s4360_s24 + $0x54] sm:$0xf]  ;;  %v3820_v11 = vld [vmem:[%s4360_s24 + $0x58] sm:$0xf0] }
 0x468   : > { %v2257_v17 = vpop.f32.mrf.mxu0 }
 0x469   : > { %v2258_v19 = vadd.f32 %v2257_v17, %v2086_v44  ;;  %v4058_v17 = vld [vmem:[%s4355_s21 + $0x54] sm:$0xf] }
 0x46e   : > { %v2285_v59 = vpop.f32.mrf.mxu2 }
 0x46f   : > { %v2286_v22 = vadd.f32 %v2285_v59, %v2087_v52  ;;  %v3692_v59 = vld [vmem:[%s4355_s21 + $0x58] sm:$0xf0] }
 0x470   : > { %v2259_v27 = vpop.f32.mrf.mxu0 }
 0x471   : > { %v2260_v33 = vadd.f32 %v2259_v27, %v2086_v44  ;;  %v4075_v44 = vld [vmem:[%s4355_s21 + $0xd4] sm:$0xf0] }
 0x476   : > { %v2287_v15 = vpop.f32.mrf.mxu2 }
 0x477   : > { %v2288_v34 = vadd.f32 %v2287_v15, %v2087_v52  ;;  %v4074_v52 = vld [vmem:[%s4355_s21 + $0xd4] sm:$0xf]  ;;  %v4073_v15 = vld [vmem:[%s4355_s21 + $0xc4] sm:$0xf0] }
 0x490   : > { %v2271_v18 = vpop.f32.mrf.mxu1 }
 0x491   : > { %v2272_v21 = vadd.f32 %v2271_v18, %v2258_v19  ;;  %v3755_v18 = vor.u32 %v4075_v44, %v3754_v14  ;;  %v3695_v19 = vor.u32 %v4058_v17, %v3692_v59  ;;  %v3735_v14 = vor.u32 %v4068_v7, %v3732_v2  ;;  %v4067_v44 = vld [vmem:[%s4355_s21 + $0x94] sm:$0xf0]  ;;  %v4050_v17 = vld [vmem:[%s4355_s21 + $0x14] sm:$0xf]  ;;  %v3660_v59 = vld [vmem:[%s4355_s21 + $0x18] sm:$0xf0] }
 0x492   : > { %v4091_v7 = vld [vmem:[%s4360_s24 + $0x54] sm:$0xf0]  ;;  %v3903_v2 = vor.u32 %v4110_v62, %v3900_v1  ;;  %v3802_v62 = vld [vmem:[%s4360_s24 + $0x30] sm:$0xf]  ;;  %v4086_v1 = vld [vmem:[%s4360_s24 + $0x34] sm:$0xf] }
 0x493   : > { %v4933_v25 = vadd.f32 %v4190_v24, %v2272_v21  ;;  %v3756_v21 = vld [vmem:[%s4355_s21 + $0xd8] sm:$0xf0]  ;;  %2591 = vmatpush.bf16.msra.mxu1 %v3755_v18  ;;  %2605 = vmatpush.bf16.msra.mxu2 %v3695_v19  ;;  %v4057_v24 = vld [vmem:[%s4355_s21 + $0x44] sm:$0xf0]  ;;  %v3723_v18 = vor.u32 %v4067_v44, %v3722_v12  ;;  %v3663_v19 = vor.u32 %v4050_v17, %v3660_v59  ;;  %v3890_v12 = vld [vmem:[%s4360_s24 + $0xe0] sm:$0xf] }
 0x494   : > { %v4108_v44 = vld [vmem:[%s4360_s24 + $0xe4] sm:$0xf]  ;;  %v3892_v17 = vld [vmem:[%s4360_s24 + $0xe8] sm:$0xf0] }
 0x495   : > { %v2314_v37 = vmul.f32 %v4933_v25, %v4933_v25 }
 0x496   : > { %v2299_v23 = vpop.f32.mrf.mxu3 }
 0x497   : > { %v2300_v26 = vadd.f32 %v2299_v23, %v2286_v22  ;;  %v3759_v22 = vor.u32 %v4074_v52, %v3756_v21  ;;  %v3682_v23 = vld [vmem:[%s4355_s21 + $0x40] sm:$0xf]  ;;  %v4066_v52 = vld [vmem:[%s4355_s21 + $0x94] sm:$0xf]  ;;  %v3724_v21 = vld [vmem:[%s4355_s21 + $0x98] sm:$0xf0] }
 0x498   : > { %v2273_v32 = vpop.f32.mrf.mxu1 }
 0x499   : > { %v4935_v31 = vadd.f32 %v4191_v28, %v2300_v26  ;;  %v2274_v13 = vadd.f32 %v2273_v32, %v2260_v33  ;;  %v3746_v26 = vld [vmem:[%s4355_s21 + $0xc0] sm:$0xf]  ;;  %2619 = vmatpush.bf16.msra.mxu3 %v3759_v22  ;;  %v3683_v28 = vor.u32 %v4057_v24, %v3682_v23  ;;  %v4056_v32 = vld [vmem:[%s4355_s21 + $0x44] sm:$0xf]  ;;  %v3684_v33 = vld [vmem:[%s4355_s21 + $0x48] sm:$0xf0]  ;;  %v3727_v23 = vor.u32 %v4066_v52, %v3724_v21 }
 0x49a   : > { %v3650_v22 = vld [vmem:[%s4355_s21] sm:$0xf]  ;;  %v4049_v24 = vld [vmem:[%s4355_s21 + $0x4] sm:$0xf0]  ;;  %v3895_v52 = vor.u32 %v4108_v44, %v3892_v17 }
 0x49b   : > { %v2308_v36 = vadd.f32 %v4935_v31, %v4933_v25  ;;  %v2315_v38 = vmul.f32 %v4935_v31, %v4935_v31  ;;  %v4943_v4 = vadd.f32 %v4192_v45, %v2274_v13  ;;  %v3748_v13 = vld [vmem:[%s4355_s21 + $0xc8] sm:$0xf0]  ;;  %2578 = vmatpush.bf16.msra.mxu0 %v3683_v28  ;;  %v3651_v28 = vor.u32 %v4049_v24, %v3650_v22  ;;  %v3810_v21 = vld [vmem:[%s4360_s24 + $0x40] sm:$0xf]  ;;  %v4089_v22 = vld [vmem:[%s4360_s24 + $0x44] sm:$0xf0] }
 0x49c   : > { %v3812_v24 = vld [vmem:[%s4360_s24 + $0x48] sm:$0xf0]  ;;  %v3794_v17 = vld [vmem:[%s4360_s24 + $0x20] sm:$0xf] }
 0x49d   : > { %2309 = vadd.xlane.f32.xlu0 %v2308_v36  ;;  %v2318_v39 = vadd.f32 %v2315_v38, %v2314_v37  ;;  %v2316_v42 = vmul.f32 %v4943_v4, %v4943_v4  ;;  %v3747_v37 = vor.u32 %v4073_v15, %v3746_v26  ;;  %v3687_v38 = vor.u32 %v4056_v32, %v3684_v33  ;;  %v3714_v26 = vld [vmem:[%s4355_s21 + $0x80] sm:$0xf]  ;;  %v4048_v32 = vld [vmem:[%s4355_s21 + $0x4] sm:$0xf]  ;;  %v3652_v33 = vld [vmem:[%s4355_s21 + $0x8] sm:$0xf0] }
 0x49e   : > { %v2301_v54 = vpop.f32.mrf.mxu3 }
 0x49f   : > { %v2302_v40 = vadd.f32 %v2301_v54, %v2288_v34  ;;  %2319 = vadd.xlane.f32.xlu1 %v2318_v39  ;;  %v4072_v34 = vld [vmem:[%s4355_s21 + $0xc4] sm:$0xf]  ;;  %2592 = vmatpush.bf16.msra.mxu1 %v3747_v37 }
 0x4a0   : > { %v3751_v54 = vor.u32 %v4072_v34, %v3748_v13  ;;  %2606 = vmatpush.bf16.msra.mxu2 %v3687_v38  ;;  %v4064_v37 = vld [vmem:[%s4355_s21 + $0x84] sm:$0xf]  ;;  %v3655_v34 = vor.u32 %v4048_v32, %v3652_v33  ;;  %v3716_v13 = vld [vmem:[%s4355_s21 + $0x88] sm:$0xf0] }
 0x4a1   : > { %v4945_v58 = vadd.f32 %v4193_v35, %v2302_v40  ;;  %v3674_v35 = vld [vmem:[%s4355_s21 + $0x30] sm:$0xf] }
 0x4a2   : > { %2620 = vmatpush.bf16.msra.mxu3 %v3751_v54 }
 0x4a3   : > { %v2311_v41 = vadd.f32 %v4945_v58, %v4943_v4  ;;  %v2317_v29 = vmul.f32 %v4945_v58, %v4945_v58 }
 0x4a4   : > { %2607 = vmatpush.bf16.msra.mxu2 %v3679_v50  ;;  %v4093_v50 = vld [vmem:[%s4360_s24 + $0x64] sm:$0xf0] }
 0x4a5   : > { %2312 = vadd.xlane.f32.xlu2 %v2311_v41  ;;  %v2321_v47 = vadd.f32 %v2317_v29, %v2316_v42  ;;  %v4055_v41 = vld [vmem:[%s4355_s21 + $0x34] sm:$0xf0]  ;;  %v3738_v42 = vld [vmem:[%s4355_s21 + $0xb0] sm:$0xf]  ;;  %v3827_v55 = vor.u32 %v4093_v50, %v3826_v57 }
 0x4a6   : > { %v3675_v29 = vor.u32 %v4055_v41, %v3674_v35  ;;  %2621 = vmatpush.bf16.msra.mxu3 %v3743_v51  ;;  %v3719_v35 = vor.u32 %v4064_v37, %v3716_v13  ;;  %v4092_v51 = vld [vmem:[%s4360_s24 + $0x64] sm:$0xf] }
 0x4a7   : > { %v3831_v5 = vor.u32 %v4092_v51, %v3828_v56  ;;  %v4107_v56 = vld [vmem:[%s4360_s24 + $0xd4] sm:$0xf0] }
 0x4a8   : > { %2579 = vmatpush.bf16.msra.mxu0 %v3675_v29  ;;  %2608 = vmatpush.bf16.msra.mxu2 %v3671_v6  ;;  %v3818_v6 = vld [vmem:[%s4360_s24 + $0x50] sm:$0xf] }
 0x4aa   : > { %2622 = vmatpush.bf16.msra.mxu3 %v3735_v14  ;;  %v3819_v14 = vor.u32 %v4091_v7, %v3818_v6  ;;  %v3804_v7 = vld [vmem:[%s4360_s24 + $0x38] sm:$0xf0] }
 0x4ac   : > { %2580 = vmatpush.bf16.msra.mxu0 %v3667_v61  ;;  %2609 = vmatpush.bf16.msra.mxu2 %v3663_v19 }
 0x4ad   : > { %2322 = vadd.xlane.f32.xlu2 %v2321_v47  ;;  %v4071_v47 = vld [vmem:[%s4355_s21 + $0xb4] sm:$0xf0] }
 0x4ae   : > { %v3739_v48 = vor.u32 %v4071_v47, %v3738_v42  ;;  %2623 = vmatpush.bf16.msra.mxu3 %v3727_v23  ;;  %v3834_v42 = vld [vmem:[%s4360_s24 + $0x70] sm:$0xf]  ;;  %v4095_v47 = vld [vmem:[%s4360_s24 + $0x74] sm:$0xf0]  ;;  %v4088_v23 = vld [vmem:[%s4360_s24 + $0x44] sm:$0xf] }
 0x4af   : > { %v3815_v32 = vor.u32 %v4088_v23, %v3812_v24  ;;  %v4103_v23 = vld [vmem:[%s4360_s24 + $0xb4] sm:$0xf0]  ;;  %v4102_v24 = vld [vmem:[%s4360_s24 + $0xb4] sm:$0xf] }
 0x4b0   : > { %2593 = vmatpush.bf16.msra.mxu1 %v3739_v48  ;;  %2581 = vmatpush.bf16.msra.mxu0 %v3659_v16  ;;  %v3835_v48 = vor.u32 %v4095_v47, %v3834_v42  ;;  %v4109_v16 = vld [vmem:[%s4360_s24 + $0xe4] sm:$0xf0]  ;;  %v2371_v47 = vperm.slane %v4930_v20, 7 }
 0x4b1   : > { %2610 = vmatpush.bf16.msra.mxu2 %v3655_v34  ;;  %v3891_v19 = vor.u32 %v4109_v16, %v3890_v12  ;;  %v4104_v12 = vld [vmem:[%s4360_s24 + $0xc4] sm:$0xf]  ;;  %v3876_v16 = vld [vmem:[%s4360_s24 + $0xc8] sm:$0xf0] }
 0x4b2   : > { %2624 = vmatpush.bf16.msra.mxu3 %v3719_v35  ;;  %v2364_v35 = vperm.slane %v4926_v10, 6  ;;  %v3879_v44 = vor.u32 %v4104_v12, %v3876_v16 }
 0x4b4   : > { %2594 = vmatpush.bf16.msra.mxu1 %v3731_v0  ;;  %2582 = vmatpush.bf16.msra.mxu0 %v3651_v28 }
 0x4b5   : > { %2859 = vmatpush.bf16.msrb.mxu2 %v3839_v46 }
 0x4b6   : > { %2873 = vmatpush.bf16.msrb.mxu3 %v3903_v2  ;;  %v3807_v2 = vor.u32 %v4086_v1, %v3804_v7 }
 0x4b8   : > { %2595 = vmatpush.bf16.msra.mxu1 %v3723_v18  ;;  %2831 = vmatpush.bf16.msrb.mxu0 %v3835_v48  ;;  %v3823_v18 = vor.u32 %v4090_v8, %v3820_v11  ;;  %v3874_v8 = vld [vmem:[%s4360_s24 + $0xc0] sm:$0xf]  ;;  %v4105_v11 = vld [vmem:[%s4360_s24 + $0xc4] sm:$0xf0] }
 0x4b9   : > { %2860 = vmatpush.bf16.msrb.mxu2 %v3831_v5  ;;  %v3884_v5 = vld [vmem:[%s4360_s24 + $0xd8] sm:$0xf0] }
 0x4ba   : > { %2874 = vmatpush.bf16.msrb.mxu3 %v3895_v52  ;;  %v3796_v52 = vld [vmem:[%s4360_s24 + $0x28] sm:$0xf0] }
 0x4bc   : > { %2832 = vmatpush.bf16.msrb.mxu0 %v3827_v55 }
 0x4bd   : > { %2861 = vmatpush.bf16.msrb.mxu2 %v3823_v18 }
 0x4c0   : > { %2833 = vmatpush.bf16.msrb.mxu0 %v3819_v14  ;;  %v3875_v14 = vor.u32 %v4105_v11, %v3874_v8 }
 0x4c1   : > { %2862 = vmatpush.bf16.msrb.mxu2 %v3815_v32  ;;  %v4083_v32 = vld [vmem:[%s4360_s24 + $0x14] sm:$0xf0] }
 0x4c5   : > { %2863 = vmatpush.bf16.msrb.mxu2 %v3807_v2 }
 0x510   : > { %v2310_v27 = vpop.xlane.xlu0 %2309 }
 0x511   : > { %v4983_v36 = vmul.f32 0.00390625, %v2310_v27  ;;  %v4065_v27 = vld [vmem:[%s4355_s21 + $0x84] sm:$0xf0] }
 0x512   : > { %v2320_v39 = vpop.xlane.xlu1 %2319  ;;  %v3715_v15 = vor.u32 %v4065_v27, %v3714_v26  ;;  %v3811_v27 = vor.u32 %v4089_v22, %v3810_v21  ;;  %v3866_v22 = vld [vmem:[%s4360_s24 + $0xb0] sm:$0xf] }
 0x513   : > { %v2326_v40 = vmul.f32 0.00390625, %v2320_v39  ;;  %v2328_v45 = vmul.f32 %v4983_v36, %v4983_v36  ;;  %v2334_v34 = vsub.f32 %v4933_v25, %v4983_v36  ;;  %v2335_v13 = vsub.f32 %v4935_v31, %v4983_v36 }
 0x514   : > { %2596 = vmatpush.bf16.msra.mxu1 %v3715_v15  ;;  %2834 = vmatpush.bf16.msrb.mxu0 %v3811_v27  ;;  %v2370_v36 = vperm.slane %v4926_v10, 7  ;;  %v3868_v27 = vld [vmem:[%s4360_s24 + $0xb8] sm:$0xf0] }
 0x515   : > { %v2330_v30 = vsub.f32 %v2326_v40, %v2328_v45 }
 0x517   : > { %v2332_v53 = vmax.f32 %v2330_v30, 0.0 }
 0x518   : > { %v2313_v60 = vpop.xlane.xlu2 %2312 }
 0x519   : > { %v5002_v63 = vadd.f32 1e-05, %v2332_v53  ;;  %v5005_v3 = vmul.f32 0.00390625, %v2313_v60  ;;  %v3898_v60 = vld [vmem:[%s4360_s24 + $0xf0] sm:$0xf] }
 0x51a   : > { %v3899_v0 = vor.u32 %v4111_v43, %v3898_v60  ;;  %v4106_v60 = vld [vmem:[%s4360_s24 + $0xd4] sm:$0xf] }
 0x51b   : > { %4184 = vrsqrt.f32 %v5002_v63  ;;  %v2329_v54 = vmul.f32 %v5005_v3, %v5005_v3  ;;  %vm2346_vm11 = vweird.f32 %v5002_v63  ;;  %v3887_v43 = vor.u32 %v4106_v60, %v3884_v5 }
 0x51c   : > { %2845 = vmatpush.bf16.msrb.mxu1 %v3899_v0  ;;  %v4087_v0 = vld [vmem:[%s4360_s24 + $0x34] sm:$0xf0] }
 0x51d   : > { %v3803_v6 = vor.u32 %v4087_v0, %v3802_v62  ;;  %2875 = vmatpush.bf16.msrb.mxu3 %v3887_v43 }
 0x51f   : > { %2835 = vmatpush.bf16.msrb.mxu0 %v3803_v6 }
 0x520   : > { %v2323_v38 = vpop.xlane.xlu2 %2322  ;;  %2846 = vmatpush.bf16.msrb.mxu1 %v3891_v19  ;;  %v4084_v19 = vld [vmem:[%s4360_s24 + $0x24] sm:$0xf] }
 0x521   : > { %v5026_v39 = vpop.eup %4184  ;;  %v2327_v40 = vmul.f32 0.00390625, %v2323_v38  ;;  %2876 = vmatpush.bf16.msrb.mxu3 %v3879_v44  ;;  %v3799_v21 = vor.u32 %v4084_v19, %v3796_v52 }
 0x522   : > { %v2341_v45 = vmul.f32 %v5026_v39, %v5002_v63  ;;  %vm2347_vm10 = vweird.f32 %v5026_v39  ;;  %v2365_v63 = vperm.slane %v4930_v20, 6  ;;  %v3882_v20 = vld [vmem:[%s4360_s24 + $0xd0] sm:$0xf] }
 0x523   : > { %v2331_v41 = vsub.f32 %v2327_v40, %v2329_v54  ;;  %vm2348_vm12 = vmor %vm2346_vm11, %vm2347_vm10  ;;  %2864 = vmatpush.bf16.msrb.mxu2 %v3799_v21 }
 0x524   : > { %v2342_v29 = vmul.f32 %v5026_v39, %v2341_v45 }
 0x525   : > { %v2333_v30 = vmax.f32 %v2331_v41, 0.0 }
 0x526   : > { %v2343_v61 = vmul.f32 0.5, %v2342_v29  ;;  %v2337_v29 = vsub.f32 %v4945_v58, %v5005_v3 }
 0x527   : > { %v5040_v53 = vadd.f32 1e-05, %v2333_v30 }
 0x528   : > { %v2344_v59 = vsub.f32 1.5, %v2343_v61  ;;  %v3883_v61 = vor.u32 %v4107_v56, %v3882_v20  ;;  %v576_v20 = vld [vmem:[%s4370_s11] sm:$0x3] }
 0x529   : > { %4186 = vrsqrt.f32 %v5040_v53  ;;  %vm2356_vm14 = vweird.f32 %v5040_v53  ;;  %v2412_v0 = vperm.slane %v576_v20, 1 }
 0x52a   : > { %v2345_v28 = vmul.f32 %v5026_v39, %v2344_v59  ;;  %2847 = vmatpush.bf16.msrb.mxu1 %v3883_v61  ;;  %v4085_v59 = vld [vmem:[%s4360_s24 + $0x24] sm:$0xf0]  ;;  %v2411_v61 = vperm.slane %v576_v20, 0 }
 0x52b   : > { %v3795_v18 = vor.u32 %v4085_v59, %v3794_v17 }
 0x52c   : > { %v2349_v37 = vsel %vm2348_vm12, %v5026_v39, %v2345_v28  ;;  %v2336_v39 = vsub.f32 %v4943_v4, %v5005_v3  ;;  %v3871_v28 = vor.u32 %v4102_v24, %v3868_v27  ;;  %v4146_v24 = vld [vmem:[%s4365_s27 + $0x10] ss:$0 sm:$0xff] }
 0x52d   : > { %v2360_v40 = vmul.f32 %v2349_v37, %v2334_v34  ;;  %v2361_v45 = vmul.f32 %v2349_v37, %v2335_v13  ;;  %2836 = vmatpush.bf16.msrb.mxu0 %v3795_v18  ;;  %v3858_v13 = vld [vmem:[%s4360_s24 + $0xa0] sm:$0xf] }
 0x52e   : > { %2848 = vmatpush.bf16.msrb.mxu1 %v3875_v14  ;;  %2877 = vmatpush.bf16.msrb.mxu3 %v3871_v28 }
 0x52f   : > { %v4187_v26 = vpop.eup %4186  ;;  %v2366_v48 = vmul.f32 %v2364_v35, %v2360_v40  ;;  %v2367_v49 = vmul.f32 %v2365_v63, %v2361_v45  ;;  %v4100_v40 = vld [vmem:[%s4360_s24 + $0xa4] sm:$0xf] }
 0x530   : > { %v2351_v15 = vmul.f32 %v4187_v26, %v5040_v53  ;;  %vm2357_vm13 = vweird.f32 %v4187_v26 }
 0x531   : > { %vm2358_vm15 = vmor %vm2356_vm14, %vm2357_vm13  ;;  %v2372_v50 = vadd.f32 %v2370_v36, %v2366_v48  ;;  %v2373_v3 = vadd.f32 %v2371_v47, %v2367_v49  ;;  %v4098_v48 = vld [vmem:[%s4360_s24 + $0x94] sm:$0xf] }
 0x532   : > { %v2352_v33 = vmul.f32 %v4187_v26, %v2351_v15  ;;  %v3786_v15 = vld [vmem:[%s4360_s24 + $0x10] sm:$0xf] }
 0x533   : > { %v3787_v37 = vor.u32 %v4083_v32, %v3786_v15  ;;  %v4147_v32 = vld [vmem:[%s4365_s27 + $0x18] ss:$0 sm:$0xff] }
 0x534   : > { %v2353_v38 = vmul.f32 0.5, %v2352_v33  ;;  %v4082_v33 = vld [vmem:[%s4360_s24 + $0x14] sm:$0xf] }
 0x535   : > { %2837 = vmatpush.bf16.msrb.mxu0 %v3787_v37 }
 0x536   : > { %v2354_v54 = vsub.f32 1.5, %v2353_v38  ;;  %v3788_v38 = vld [vmem:[%s4360_s24 + $0x18] sm:$0xf0] }
 0x537   : > { %v3791_v34 = vor.u32 %v4082_v33, %v3788_v38 }
 0x538   : > { %v2355_v41 = vmul.f32 %v4187_v26, %v2354_v54  ;;  %v4101_v54 = vld [vmem:[%s4360_s24 + $0xa4] sm:$0xf0] }
 0x539   : > { %v3859_v45 = vor.u32 %v4101_v54, %v3858_v13  ;;  %2865 = vmatpush.bf16.msrb.mxu2 %v3791_v34 }
 0x53a   : > { %v2359_v42 = vsel %vm2358_vm15, %v4187_v26, %v2355_v41  ;;  %v3867_v26 = vor.u32 %v4103_v23, %v3866_v22  ;;  %v3778_v41 = vld [vmem:[%s4360_s24] sm:$0xf] }
 0x53b   : > { %v2362_v9 = vmul.f32 %v2359_v42, %v2336_v39  ;;  %v2363_v30 = vmul.f32 %v2359_v42, %v2337_v29  ;;  %v4081_v39 = vld [vmem:[%s4360_s24 + $0x4] sm:$0xf0]  ;;  %v4080_v29 = vld [vmem:[%s4360_s24 + $0x4] sm:$0xf] }
 0x53c   : > { %2849 = vmatpush.bf16.msrb.mxu1 %v3867_v26  ;;  %v3779_v42 = vor.u32 %v4081_v39, %v3778_v41 }
 0x53d   : > { %v2368_v57 = vmul.f32 %v2364_v35, %v2362_v9  ;;  %v2369_v46 = vmul.f32 %v2365_v63, %v2363_v30  ;;  %v3860_v35 = vld [vmem:[%s4360_s24 + $0xa8] sm:$0xf0]  ;;  %v3850_v9 = vld [vmem:[%s4360_s24 + $0x90] sm:$0xf]  ;;  %v4099_v30 = vld [vmem:[%s4360_s24 + $0x94] sm:$0xf0] }
 0x53e   : > { %v3863_v63 = vor.u32 %v4100_v40, %v3860_v35  ;;  %2838 = vmatpush.bf16.msrb.mxu0 %v3779_v42  ;;  %v3851_v49 = vor.u32 %v4099_v30, %v3850_v9 }
 0x53f   : > { %v2374_v51 = vadd.f32 %v2370_v36, %v2368_v57  ;;  %v2375_v53 = vadd.f32 %v2371_v47, %v2369_v46  ;;  %v3780_v36 = vld [vmem:[%s4360_s24 + $0x8] sm:$0xf0]  ;;  %v3852_v57 = vld [vmem:[%s4360_s24 + $0x98] sm:$0xf0] }
 0x540   : > { %2850 = vmatpush.bf16.msrb.mxu1 %v3859_v45  ;;  %2878 = vmatpush.bf16.msrb.mxu3 %v3863_v63  ;;  %v3783_v47 = vor.u32 %v4080_v29, %v3780_v36  ;;  %v3855_v46 = vor.u32 %v4098_v48, %v3852_v57 }
 0x541   : > { %v2376_v10 = vpack.c.bf16 %v2374_v51, %v2372_v50  ;;  %v2377_v55 = vpack.c.bf16 %v2375_v53, %v2373_v3  ;;  %v3842_v50 = vld [vmem:[%s4360_s24 + $0x80] sm:$0xf]  ;;  %v4097_v51 = vld [vmem:[%s4360_s24 + $0x84] sm:$0xf0]  ;;  %v4096_v3 = vld [vmem:[%s4360_s24 + $0x84] sm:$0xf] }
 0x542   : > { %2866 = vmatpush.bf16.msrb.mxu2 %v3783_v47  ;;  %v3843_v53 = vor.u32 %v4097_v51, %v3842_v50 }
 0x543   : > { %2583 = vmatmul.bf16.vlgmr.msra.gmra.mxu0 %v2376_v10  ;;  %2597 = vmatmul.bf16.vlgmr.msra.gmra.mxu1 %v2377_v55 }
 0x544   : > { %2611 = vmatmul.bf16.vlgmr.msra.gmra.mxu2 %v2376_v10  ;;  %2625 = vmatmul.bf16.vlgmr.msra.gmra.mxu3 %v2377_v55  ;;  %v3844_v10 = vld [vmem:[%s4360_s24 + $0x88] sm:$0xf0] }
 0x545   : > { %2851 = vmatpush.bf16.msrb.mxu1 %v3851_v49  ;;  %2879 = vmatpush.bf16.msrb.mxu3 %v3855_v46  ;;  %v3847_v55 = vor.u32 %v4096_v3, %v3844_v10 }
 0x549   : > { %2852 = vmatpush.bf16.msrb.mxu1 %v3843_v53  ;;  %2880 = vmatpush.bf16.msrb.mxu3 %v3847_v55 }
 0x5c0   : > { %v2584_v56 = vpop.f32.mrf.mxu0  ;;  %v2598_v60 = vpop.f32.mrf.mxu1 }
 0x5c1   : > { %v2585_v5 = vadd.f32 %v2584_v56, %v2411_v61 }
 0x5c3   : > { %v2599_v6 = vadd.f32 %v2598_v60, %v2585_v5 }
 0x5c5   : > { %v2631_v12 = vmax.f32 %v2599_v6, 0.0 }
 0x5c7   : > { %v2612_v43 = vpop.f32.mrf.mxu2  ;;  %v2626_v62 = vpop.f32.mrf.mxu3 }
 0x5c8   : > { %v2586_v1 = vpop.f32.mrf.mxu0  ;;  %v2600_v2 = vpop.f32.mrf.mxu1  ;;  %v2613_v11 = vadd.f32 %v2612_v43, %v2412_v0 }
 0x5c9   : > { %v2587_v7 = vadd.f32 %v2586_v1, %v2411_v61 }
 0x5ca   : > { %v2627_v17 = vadd.f32 %v2626_v62, %v2613_v11 }
 0x5cb   : > { %v2601_v8 = vadd.f32 %v2600_v2, %v2587_v7 }
 0x5cc   : > { %v2632_v52 = vmax.f32 %v2627_v17, 0.0 }
 0x5cd   : > { %v2633_v14 = vmax.f32 %v2601_v8, 0.0 }
 0x5cf   : > { %v2635_v16 = vpack.c.bf16 %v2633_v14, %v2631_v12  ;;  %v2614_v44 = vpop.f32.mrf.mxu2  ;;  %v2628_v18 = vpop.f32.mrf.mxu3 }
 0x5d0   : > { %v2615_v59 = vadd.f32 %v2614_v44, %v2412_v0 }
 0x5d1   : > { %2839 = vmatmul.bf16.vlgmr.msrb.gmra.mxu0 %v2635_v16  ;;  %2867 = vmatmul.bf16.vlgmr.msrb.gmra.mxu2 %v2635_v16 }
 0x5d2   : > { %v2629_v19 = vadd.f32 %v2628_v18, %v2615_v59 }
 0x5d4   : > { %v2634_v21 = vmax.f32 %v2629_v19, 0.0 }
 0x5d6   : > { %v2636_v22 = vpack.c.bf16 %v2634_v21, %v2632_v52 }
 0x5d8   : > { %2853 = vmatmul.bf16.vlgmr.msrb.gmra.mxu1 %v2636_v22  ;;  %2881 = vmatmul.bf16.vlgmr.msrb.gmra.mxu3 %v2636_v22 }
 0x64e   : > { %v2840_v23 = vpop.f32.mrf.mxu0 }
 0x64f   : > { %v2841_v26 = vadd.f32 %v4146_v24, %v2840_v23 }
 0x654   : > { %v2868_v28 = vpop.f32.mrf.mxu2 }
 0x655   : > { %v2854_v27 = vpop.f32.mrf.mxu1  ;;  %v2869_v38 = vadd.f32 %v4147_v32, %v2868_v28 }
 0x656   : > { %v2855_v15 = vadd.f32 %v2854_v27, %v2841_v26  ;;  %v2842_v37 = vpop.f32.mrf.mxu0 }
 0x657   : > { %v2843_v13 = vadd.f32 %v4146_v24, %v2842_v37 }
 0x658   : > { %v2887_v33 = vadd.f32 %v2855_v15, %v4933_v25 }
 0x65a   : > { %2891 = vst [vmem:[#allocation2 + $0x10] sm:$0xff] %v2887_v33 }
 0x65b   : > { %v2882_v34 = vpop.f32.mrf.mxu3 }
 0x65c   : > { %v2883_v54 = vadd.f32 %v2882_v34, %v2869_v38  ;;  %v2870_v63 = vpop.f32.mrf.mxu2 }
 0x65d   : > { %v2856_v40 = vpop.f32.mrf.mxu1  ;;  %v2871_v39 = vadd.f32 %v4147_v32, %v2870_v63 }
 0x65e   : > { %v2888_v45 = vadd.f32 %v2883_v54, %v4935_v31  ;;  %v2857_v35 = vadd.f32 %v2856_v40, %v2843_v13 }
 0x660   : > { %2892 = vst [vmem:[#allocation2] sm:$0xff] %v2888_v45  ;;  %v2889_v41 = vadd.f32 %v2857_v35, %v4943_v4 }
 0x662   : > { %2893 = vst [vmem:[#allocation2 + $0x18] sm:$0xff] %v2889_v41 }
 0x663   : > { %v2884_v29 = vpop.f32.mrf.mxu3 }
 0x664   : > { %v2885_v42 = vadd.f32 %v2884_v29, %v2871_v39  ;;  %2898 = sbr.rel (%p3904_p6) target bundleno = 1645 (0x66d), region = 68 }
 0x666   : > { %v2890_v25 = vadd.f32 %v2885_v42, %v4945_v58 }
 0x668   : > { %2894 = vst [vmem:[#allocation2 + $0x8] sm:$0xff] %v2890_v25 }
 0x669   : > { %2899 = vst [vmem:[#allocation4] sm:$0xff] %v2887_v33 }
 0x66a   : > { %2900 = vst [vmem:[#allocation4 + $0x8] sm:$0xff] %v2888_v45 }
 0x66b   : > { %2901 = vst [vmem:[#allocation4 + $0x10] sm:$0xff] %v2889_v41 }
 0x66c   : > { %2902 = vst [vmem:[#allocation4 + $0x18] sm:$0xff] %v2890_v25 }
 0x66d PF: > { %s5162_s29 = sadd.s32 4294967295, %s4248_s15   ;;  %s2914_s24 = sshll.u32 %s5150_s10, 4  ;;  %s2915_s24 = int_to_ptr.hbm [resolvable:$true] %s2914_s24 }
 0x66e   : > { %p4116_p7 = scmp.eq.s32.totalorder %s5162_s29, 1  ;;  %s4251_s27 = smov [#allocation4]  }
 0x66f   : > { %s2912_s11 = sshll.u32 %s4251_s27, 4  ;;  %s4252_s25 = smov 256   ;;  %s2913_s11 = int_to_ptr.vmem [resolvable:$true] %s2912_s11 }
 0x670   : > { %s4253_s28 = smov 16  }
 0x671   : > { %4113 = dma.vmem_to_hbm [thread:$0]  (%p4116_p7), %s2913_s11, 512, %s2915_s24, [#allocation5], %s4252_s25, %s4252_s25, %s4253_s28  }
 0x672   : > { %4235 = dma.done.wait (%p4116_p7), [#allocation5], 512  }
 0x673   : > { %4237 = vsyncadd (%p4116_p7), [#allocation5], 4294966784 }
 0x674 PF: > { %s21_s15 = sadd.s32 1, %s4248_s15   ;;  %s5163_s30 = sld [smem:[#allocation7_spill]] }
 0x675   : > { %p18_p8 = scmp.ge.s32.totalorder %s21_s15, 4   ;;  %s5164_s13 = smov %s4244_s14 }
 0x677   :  { %20 = sbr.rel (!%p18_p8) target bundleno = 6 (0x6), region = 123 }
 0x67a   : > { %s5165_s14 = smov %s5163_s30 }
 0x67c   :  { %2931 = vsyncpa [#allocation5], 1 }
 0x67d   :  { %2933 = vsyncpa [#allocation5 + $0x1], 1 }

</bundles_post_ra>
